<compile_context>
chip_gen: v7x
topology: tpu7x:2x2x1
jax: 0.10.0
libtpu: 0.0.40
codegen_flags: <defaults>
</compile_context>

<pallas_src>
import math
import functools

import jax
import jax.numpy as jnp
from jax import lax
from jax.experimental import pallas as pl
from jax.experimental.pallas import tpu as pltpu


# ----------------------------------------------------------------------------
# Parameter setup (PyTorch layout: Linear weight is (out_features, in_features))
# ----------------------------------------------------------------------------
def init_transformer_block_params(key, d_model, n_heads, d_ff, dtype=jnp.float32):
    if d_model % n_heads != 0:
        raise ValueError(f"d_model ({d_model}) must be divisible by n_heads ({n_heads})")
    ks = jax.random.split(key, 12)

    def unif(k, fan_in, shape):
        bound = 1.0 / math.sqrt(fan_in)
        return jax.random.uniform(k, shape, dtype, -bound, bound)

    return {
        "n_heads": n_heads,
        # attention projections (w_q/k/v have no bias, w_o has bias)
        "w_q": unif(ks[0], d_model, (d_model, d_model)),
        "w_k": unif(ks[1], d_model, (d_model, d_model)),
        "w_v": unif(ks[2], d_model, (d_model, d_model)),
        "w_o": unif(ks[3], d_model, (d_model, d_model)),
        "b_o": unif(ks[4], d_model, (d_model,)),
        # LayerNorms
        "ln1_g": 1.0 + 0.1 * jax.random.normal(ks[5], (d_model,), dtype),
        "ln1_b": 0.1 * jax.random.normal(ks[6], (d_model,), dtype),
        "ln2_g": 1.0 + 0.1 * jax.random.normal(ks[7], (d_model,), dtype),
        "ln2_b": 0.1 * jax.random.normal(ks[8], (d_model,), dtype),
        # feed-forward
        "w_1": unif(ks[9], d_model, (d_ff, d_model)),
        "b_1": unif(ks[10], d_model, (d_ff,)),
        "w_2": unif(ks[11], d_ff, (d_model, d_ff)),
        "b_2": jnp.zeros((d_model,), dtype),
    }


# ----------------------------------------------------------------------------
# Pallas kernel
# ----------------------------------------------------------------------------
def _layer_norm(v, gamma, beta, eps):
    mean = jnp.mean(v, axis=-1, keepdims=True)
    cent = v - mean
    var = jnp.mean(cent * cent, axis=-1, keepdims=True)
    return cent * lax.rsqrt(var + eps) * gamma + beta


def _transformer_block_kernel(*refs, n_heads, inv_scale, eps, has_mask):
    if has_mask:
        (xq_ref, xkv_ref, mask_ref, wq_ref, wk_ref, wv_ref, wo_ref, bo_ref,
         g1_ref, be1_ref, w1_ref, b1_ref, w2_ref, b2_ref, g2_ref, be2_ref,
         out_ref, attn_ref) = refs
    else:
        (xq_ref, xkv_ref, wq_ref, wk_ref, wv_ref, wo_ref, bo_ref,
         g1_ref, be1_ref, w1_ref, b1_ref, w2_ref, b2_ref, g2_ref, be2_ref,
         out_ref, attn_ref) = refs
        mask_ref = None

    f32, bf16 = jnp.float32, jnp.bfloat16

    xq32 = xq_ref[0].astype(f32)          # (Tq, D) residual path stays f32
    xq16 = xq_ref[0].astype(bf16)         # bf16 operand for the MXU
    xkv16 = xkv_ref[0].astype(bf16)       # (S, D)

    # Full-width projections (N = D, not d_k): bf16 operands, f32 accumulation.
    q = jnp.dot(xq16, wq_ref[...], preferred_element_type=f32)     # (Tq, D)
    k = jnp.dot(xkv16, wk_ref[...], preferred_element_type=f32)    # (S, D)
    v = jnp.dot(xkv16, wv_ref[...], preferred_element_type=f32)    # (S, D)

    q16 = (q * inv_scale).astype(bf16)    # fold 1/sqrt(d_k) into Q once
    k16 = k.astype(bf16)
    v16 = v.astype(bf16)

    if mask_ref is not None:
        is_masked = mask_ref[0] == 0      # (Tq, S), computed once for all heads

    d_model = q.shape[-1]
    d_k = d_model // n_heads

    # Per-head attention: matmuls in bf16 (f32 acc), softmax in f32.
    o_parts = []
    for h in range(n_heads):
        sl = slice(h * d_k, (h + 1) * d_k)           # static lane slice
        q_h, k_h, v_h = q16[:, sl], k16[:, sl], v16[:, sl]

        # scores = (q_h / sqrt(d_k)) @ k_h^T  (contract d_k directly)
        s = lax.dot_general(q_h, k_h, (((1,), (1,)), ((), ())),
                            preferred_element_type=f32)            # (Tq, S)
        if mask_ref is not None:
            s = jnp.where(is_masked, -1e9, s)

        m = jnp.max(s, axis=-1, keepdims=True)
        e = jnp.exp(s - m)
        w = e * pl.reciprocal(jnp.sum(e, axis=-1, keepdims=True), approx=True)
        w16 = w.astype(bf16)
        attn_ref[0, h] = w16.astype(attn_ref.dtype)
        o_parts.append(jnp.dot(w16, v_h, preferred_element_type=f32))   # (Tq, d_k)

    # Pack heads back onto the lane axis and do ONE full-width output projection.
    o_cat = jnp.concatenate(o_parts, axis=-1).astype(bf16)              # (Tq, D)
    attn_out = jnp.dot(o_cat, wo_ref[...], preferred_element_type=f32) + bo_ref[...]

    # residual + LayerNorm 1   (dropout = identity in eval mode)
    y = _layer_norm(xq32 + attn_out, g1_ref[...], be1_ref[...], eps)

    # feed-forward: Linear -> ReLU -> Linear   (dropout = identity in eval mode)
    hid = jnp.maximum(
        jnp.dot(y.astype(bf16), w1_ref[...], preferred_element_type=f32) + b1_ref[...],
        0.0)
    ff = jnp.dot(hid.astype(bf16), w2_ref[...], preferred_element_type=f32) + b2_ref[...]

    # residual + LayerNorm 2
    z = _layer_norm(y + ff, g2_ref[...], be2_ref[...], eps)
    out_ref[0] = z.astype(out_ref.dtype)


# ----------------------------------------------------------------------------
# Wrapper
# ----------------------------------------------------------------------------
def _default_q_tile(seq_len):
    if seq_len <= 256:
        return seq_len
    for t in (256, 128):
        if seq_len % t == 0:
            return t
    return seq_len


def transformer_block(x, params, mask=None, *, eps=1e-5, q_tile=None,
                      attn_dtype=jnp.bfloat16):
    """x: (B, S, D); mask: optional (B, S, S). Returns (out (B,S,D), attn (B,H,S,S))."""
    B, S, D = x.shape
    H = int(params["n_heads"])
    d_k = D // H
    d_ff = params["w_1"].shape[0]
    out_dt = x.dtype
    f32, bf16 = jnp.float32, jnp.bfloat16

    tq = _default_q_tile(S) if q_tile is None else int(q_tile)
    if S % tq != 0:
        raise ValueError(f"q_tile ({tq}) must divide seq_len ({S})")
    nq = S // tq

    # bf16 matmul weights, pre-transposed so the kernel only ever does `act @ W`.
    wq = params["w_q"].T.astype(bf16)        # (D, D)
    wk = params["w_k"].T.astype(bf16)
    wv = params["w_v"].T.astype(bf16)
    wo = params["w_o"].T.astype(bf16)        # (D, D)
    w1 = params["w_1"].T.astype(bf16)        # (D, d_ff)
    w2 = params["w_2"].T.astype(bf16)        # (d_ff, D)
    # Biases / LayerNorm params stay f32 (added to f32 accumulators / LN math).
    bo = params["b_o"].reshape(1, D).astype(f32)
    b1 = params["b_1"].reshape(1, d_ff).astype(f32)
    b2 = params["b_2"].reshape(1, D).astype(f32)
    g1 = params["ln1_g"].reshape(1, D).astype(f32)
    be1 = params["ln1_b"].reshape(1, D).astype(f32)
    g2 = params["ln2_g"].reshape(1, D).astype(f32)
    be2 = params["ln2_b"].reshape(1, D).astype(f32)

    has_mask = mask is not None
    kernel = functools.partial(
        _transformer_block_kernel,
        n_heads=H, inv_scale=1.0 / math.sqrt(d_k), eps=float(eps), has_mask=has_mask)

    # --- activation / output specs (query-tiled) ------------------------------
    x_q_spec = pl.BlockSpec((1, tq, D), lambda b, qi: (b, qi, 0))
    x_kv_spec = pl.BlockSpec((1, S, D), lambda b, qi: (b, 0, 0))   # constant over qi
    out_spec = pl.BlockSpec((1, tq, D), lambda b, qi: (b, qi, 0))
    attn_spec = pl.BlockSpec((1, H, tq, S), lambda b, qi: (b, 0, qi, 0))

    args = [x, x]
    act_specs = [x_q_spec, x_kv_spec]
    if has_mask:
        args.append(mask.astype(jnp.int32))   # integer mask: exact ==0 semantics
        act_specs.append(pl.BlockSpec((1, tq, S), lambda b, qi: (b, qi, 0)))
    args += [wq, wk, wv, wo, bo, g1, be1, w1, b1, w2, b2, g2, be2]

    out_shape = [jax.ShapeDtypeStruct((B, S, D), out_dt),
                 jax.ShapeDtypeStruct((B, H, S, S), attn_dtype)]

    # Advisory cost estimate for XLA's scheduler.
    attn_bytes = jnp.dtype(attn_dtype).itemsize
    flops = 2 * B * (4 * S * D * D + 2 * S * S * D + 2 * S * D * d_ff)
    bytes_accessed = int(
        2 * 4 * B * S * D                       # x read + out write (f32)
        + attn_bytes * B * H * S * S            # attention weights
        + (4 * B * S * S if has_mask else 0)    # int32 mask
        + 2 * (4 * D * D + 2 * D * d_ff)        # bf16 weights
        + 4 * (7 * D + d_ff))                   # f32 bias / LN vectors
    cost = pl.CostEstimate(flops=flops, transcendentals=B * H * S * S,
                           bytes_accessed=bytes_accessed)

    # Explicit VMEM budget: resident bf16 weights + double-buffered blocks + slack.
    weight_vmem = 2 * (4 * D * D + 2 * D * d_ff) + 4 * (7 * D + d_ff)
    block_vmem = 4 * (2 * tq * D + S * D) + attn_bytes * H * tq * S
    if has_mask:
        block_vmem += 4 * tq * S
    vmem_est = 2 * weight_vmem + 2 * block_vmem
    vmem_limit = int(min(100 * 2 ** 20, max(32 * 2 ** 20, 2 * vmem_est)))

    def call(single_buffer_weights):
        if single_buffer_weights:
            # Constant-index weight blocks: single buffer (no double-buffering).
            def wspec(shape):
                return pl.BlockSpec(shape, lambda b, qi: (0, 0),
                                    pipeline_mode=pl.Buffered(1))
        else:
            def wspec(shape):
                return pl.BlockSpec(shape, lambda b, qi: (0, 0))

        in_specs = list(act_specs) + [
            wspec((D, D)), wspec((D, D)), wspec((D, D)), wspec((D, D)),  # wq wk wv wo
            wspec((1, D)),                                               # b_o
            wspec((1, D)), wspec((1, D)),                                # ln1 g/b
            wspec((D, d_ff)), wspec((1, d_ff)),                          # w1 b1
            wspec((d_ff, D)), wspec((1, D)),                             # w2 b2
            wspec((1, D)), wspec((1, D)),                                # ln2 g/b
        ]
        return pl.pallas_call(
            kernel,
            grid=(B, nq),
            in_specs=in_specs,
            out_specs=[out_spec, attn_spec],
            out_shape=out_shape,
            compiler_params=pltpu.CompilerParams(
                dimension_semantics=("parallel", "parallel"),
                vmem_limit_bytes=vmem_limit),
            cost_estimate=cost,
        )(*args)

    try:
        return call(True)
    except Exception:
        # pl.Buffered(1) unsupported on this jax version -> default double-buffering.
        return call(False)


# ----------------------------------------------------------------------------
# Pure-JAX reference (PyTorch semantics, eval mode)
# ----------------------------------------------------------------------------
def _layer_norm_ref(v, gamma, beta, eps):
    mean = jnp.mean(v, axis=-1, keepdims=True)
    var = jnp.mean((v - mean) ** 2, axis=-1, keepdims=True)
    return (v - mean) / jnp.sqrt(var + eps) * gamma + beta


def transformer_block_ref(x, params, mask=None, eps=1e-5):
    B, S, D = x.shape
    H = int(params["n_heads"])
    d_k = D // H
    q = (x @ params["w_q"].T).reshape(B, S, H, d_k).transpose(0, 2, 1, 3)
    k = (x @ params["w_k"].T).reshape(B, S, H, d_k).transpose(0, 2, 1, 3)
    v = (x @ params["w_v"].T).reshape(B, S, H, d_k).transpose(0, 2, 1, 3)
    scores = jnp.einsum("bhqd,bhkd->bhqk", q, k) / math.sqrt(d_k)
    if mask is not None:
        scores = jnp.where(mask[:, None, :, :] == 0, -1e9, scores)
    w = jax.nn.softmax(scores, axis=-1)
    o = jnp.einsum("bhqk,bhkd->bhqd", w, v).transpose(0, 2, 1, 3).reshape(B, S, D)
    attn_out = o @ params["w_o"].T + params["b_o"]
    y = _layer_norm_ref(x + attn_out, params["ln1_g"], params["ln1_b"], eps)
    ff = (jnp.maximum(y @ params["w_1"].T + params["b_1"], 0.0)
          @ params["w_2"].T + params["b_2"])
    z = _layer_norm_ref(y + ff, params["ln2_g"], params["ln2_b"], eps)
    return z, w


# ----------------------------------------------------------------------------
# Demo / self-check
# ----------------------------------------------------------------------------
if __name__ == "__main__":
    # Small but query-tiled shapes: 2 query tiles of 16 rows per batch element.
    B, S, D_MODEL, N_HEADS, D_FF, Q_TILE = 2, 32, 64, 4, 128, 16

    root = jax.random.PRNGKey(0)
    k_x, k_p = jax.random.split(root)
    x = jax.random.normal(k_x, (B, S, D_MODEL), dtype=jnp.float32)
    params = init_transformer_block_params(k_p, D_MODEL, N_HEADS, D_FF)

    # --- no-mask path --------------------------------------------------------
    out, attn_w = transformer_block(x, params, mask=None, q_tile=Q_TILE)
    out = jax.block_until_ready(out)
    attn_w = jax.block_until_ready(attn_w)
    out_r, attn_r = transformer_block_ref(x, params, mask=None)
    assert out.shape == (B, S, D_MODEL) and attn_w.shape == (B, N_HEADS, S, S)
    assert jnp.allclose(out, out_r, atol=5e-2, rtol=5e-2), "output mismatch (no mask)"
    assert jnp.allclose(attn_w.astype(jnp.float32), attn_r, atol=2e-2, rtol=2e-2), \
        "attn mismatch (no mask)"

    # --- causal-mask path ----------------------------------------------------
    mask = jnp.tril(jnp.ones((B, S, S), dtype=jnp.int32))
    out_m, attn_m = transformer_block(x, params, mask=mask, q_tile=Q_TILE)
    out_m = jax.block_until_ready(out_m)
    out_mr, attn_mr = transformer_block_ref(x, params, mask=mask)
    assert jnp.allclose(out_m, out_mr, atol=5e-2, rtol=5e-2), "output mismatch (mask)"
    assert jnp.allclose(attn_m.astype(jnp.float32), attn_mr, atol=2e-2, rtol=2e-2), \
        "attn mismatch (mask)"

    print("KERNEL_OK")
</pallas_src>

<mosaic_0001>
module attributes {stable_mosaic.version = 11 : i64} {
  func.func @_transformer_block_kernel(%arg0: i32, %arg1: i32, %arg2: memref<1x16x64xf32, #tpu.memory_space<vmem>>, %arg3: memref<1x32x64xf32, #tpu.memory_space<vmem>>, %arg4: memref<64x64xbf16, #tpu.memory_space<vmem>>, %arg5: memref<64x64xbf16, #tpu.memory_space<vmem>>, %arg6: memref<64x64xbf16, #tpu.memory_space<vmem>>, %arg7: memref<64x64xbf16, #tpu.memory_space<vmem>>, %arg8: memref<1x64xf32, #tpu.memory_space<vmem>>, %arg9: memref<1x64xf32, #tpu.memory_space<vmem>>, %arg10: memref<1x64xf32, #tpu.memory_space<vmem>>, %arg11: memref<64x128xbf16, #tpu.memory_space<vmem>>, %arg12: memref<1x128xf32, #tpu.memory_space<vmem>>, %arg13: memref<128x64xbf16, #tpu.memory_space<vmem>>, %arg14: memref<1x64xf32, #tpu.memory_space<vmem>>, %arg15: memref<1x64xf32, #tpu.memory_space<vmem>>, %arg16: memref<1x64xf32, #tpu.memory_space<vmem>>, %arg17: memref<1x16x64xf32, #tpu.memory_space<vmem>>, %arg18: memref<1x4x16x32xbf16, #tpu.memory_space<vmem>>) attributes {dimension_semantics = [#tpu.dimension_semantics<parallel>, #tpu.dimension_semantics<parallel>], iteration_bounds = array<i64: 2, 2>, scalar_prefetch = 0 : i64, scratch_operands = 0 : i64, tpu.core_type = #tpu.core_type<tc>, window_params = [{transform_indices = @transform_0, window_bounds = array<i64: 1, 16, 64>}, {transform_indices = @transform_1, window_bounds = array<i64: 1, 32, 64>}, {pipeline_mode = #tpu.pipeline_mode<synchronous>, transform_indices = @transform_2, window_bounds = array<i64: 64, 64>}, {pipeline_mode = #tpu.pipeline_mode<synchronous>, transform_indices = @transform_3, window_bounds = array<i64: 64, 64>}, {pipeline_mode = #tpu.pipeline_mode<synchronous>, transform_indices = @transform_4, window_bounds = array<i64: 64, 64>}, {pipeline_mode = #tpu.pipeline_mode<synchronous>, transform_indices = @transform_5, window_bounds = array<i64: 64, 64>}, {pipeline_mode = #tpu.pipeline_mode<synchronous>, transform_indices = @transform_6, window_bounds = array<i64: 1, 64>}, {pipeline_mode = #tpu.pipeline_mode<synchronous>, transform_indices = @transform_7, window_bounds = array<i64: 1, 64>}, {pipeline_mode = #tpu.pipeline_mode<synchronous>, transform_indices = @transform_8, window_bounds = array<i64: 1, 64>}, {pipeline_mode = #tpu.pipeline_mode<synchronous>, transform_indices = @transform_9, window_bounds = array<i64: 64, 128>}, {pipeline_mode = #tpu.pipeline_mode<synchronous>, transform_indices = @transform_10, window_bounds = array<i64: 1, 128>}, {pipeline_mode = #tpu.pipeline_mode<synchronous>, transform_indices = @transform_11, window_bounds = array<i64: 128, 64>}, {pipeline_mode = #tpu.pipeline_mode<synchronous>, transform_indices = @transform_12, window_bounds = array<i64: 1, 64>}, {pipeline_mode = #tpu.pipeline_mode<synchronous>, transform_indices = @transform_13, window_bounds = array<i64: 1, 64>}, {pipeline_mode = #tpu.pipeline_mode<synchronous>, transform_indices = @transform_14, window_bounds = array<i64: 1, 64>}, {transform_indices = @transform_15, window_bounds = array<i64: 1, 16, 64>}, {transform_indices = @transform_16, window_bounds = array<i64: 1, 4, 16, 32>}]} {
    %c0 = arith.constant 0 : index
    %c0_0 = arith.constant 0 : index
    %c0_1 = arith.constant 0 : index
    %0 = vector.load %arg2[%c0, %c0_0, %c0_1] : memref<1x16x64xf32, #tpu.memory_space<vmem>>, vector<1x16x64xf32>
    %1 = vector.shape_cast %0 : vector<1x16x64xf32> to vector<16x64xf32>
    %c0_2 = arith.constant 0 : index
    %c0_3 = arith.constant 0 : index
    %c0_4 = arith.constant 0 : index
    %2 = vector.load %arg2[%c0_2, %c0_3, %c0_4] : memref<1x16x64xf32, #tpu.memory_space<vmem>>, vector<1x16x64xf32>
    %3 = vector.shape_cast %2 : vector<1x16x64xf32> to vector<16x64xf32>
    %4 = arith.truncf %3 : vector<16x64xf32> to vector<16x64xbf16>
    %c0_5 = arith.constant 0 : index
    %c0_6 = arith.constant 0 : index
    %c0_7 = arith.constant 0 : index
    %5 = vector.load %arg3[%c0_5, %c0_6, %c0_7] : memref<1x32x64xf32, #tpu.memory_space<vmem>>, vector<1x32x64xf32>
    %6 = vector.shape_cast %5 : vector<1x32x64xf32> to vector<32x64xf32>
    %7 = arith.truncf %6 : vector<32x64xf32> to vector<32x64xbf16>
    %c0_8 = arith.constant 0 : index
    %c0_9 = arith.constant 0 : index
    %8 = vector.load %arg4[%c0_8, %c0_9] : memref<64x64xbf16, #tpu.memory_space<vmem>>, vector<64x64xbf16>
    %cst = arith.constant dense<0.000000e+00> : vector<16x64xf32>
    %9 = tpu.matmul %4, %8, %cst {dimension_numbers = #tpu.dot_dimension_numbers<[1], [0], [0], [1], [0, 0, 1, 1], [], []>} : vector<16x64xbf16>, vector<64x64xbf16>, vector<16x64xf32> -> vector<16x64xf32>
    %c0_10 = arith.constant 0 : index
    %c0_11 = arith.constant 0 : index
    %10 = vector.load %arg5[%c0_10, %c0_11] : memref<64x64xbf16, #tpu.memory_space<vmem>>, vector<64x64xbf16>
    %cst_12 = arith.constant dense<0.000000e+00> : vector<32x64xf32>
    %11 = tpu.matmul %7, %10, %cst_12 {dimension_numbers = #tpu.dot_dimension_numbers<[1], [0], [0], [1], [0, 0, 1, 1], [], []>} : vector<32x64xbf16>, vector<64x64xbf16>, vector<32x64xf32> -> vector<32x64xf32>
    %c0_13 = arith.constant 0 : index
    %c0_14 = arith.constant 0 : index
    %12 = vector.load %arg6[%c0_13, %c0_14] : memref<64x64xbf16, #tpu.memory_space<vmem>>, vector<64x64xbf16>
    %cst_15 = arith.constant dense<0.000000e+00> : vector<32x64xf32>
    %13 = tpu.matmul %7, %12, %cst_15 {dimension_numbers = #tpu.dot_dimension_numbers<[1], [0], [0], [1], [0, 0, 1, 1], [], []>} : vector<32x64xbf16>, vector<64x64xbf16>, vector<32x64xf32> -> vector<32x64xf32>
    %cst_16 = arith.constant 2.500000e-01 : f32
    %14 = vector.broadcast %cst_16 : f32 to vector<16x64xf32>
    %15 = arith.mulf %9, %14 : vector<16x64xf32>
    %16 = arith.truncf %15 : vector<16x64xf32> to vector<16x64xbf16>
    %17 = arith.truncf %11 : vector<32x64xf32> to vector<32x64xbf16>
    %18 = arith.truncf %13 : vector<32x64xf32> to vector<32x64xbf16>
    %19 = vector.extract_strided_slice %16 {offsets = [0, 0], sizes = [16, 16], strides = [1, 1]} : vector<16x64xbf16> to vector<16x16xbf16>
    %20 = vector.extract_strided_slice %17 {offsets = [0, 0], sizes = [32, 16], strides = [1, 1]} : vector<32x64xbf16> to vector<32x16xbf16>
    %21 = vector.extract_strided_slice %18 {offsets = [0, 0], sizes = [32, 16], strides = [1, 1]} : vector<32x64xbf16> to vector<32x16xbf16>
    %cst_17 = arith.constant dense<0.000000e+00> : vector<16x32xf32>
    %22 = tpu.matmul %19, %20, %cst_17 {dimension_numbers = #tpu.dot_dimension_numbers<[1], [1], [0], [0], [0, 0, 1, 0], [], []>} : vector<16x16xbf16>, vector<32x16xbf16>, vector<16x32xf32> -> vector<16x32xf32>
    %cst_18 = arith.constant dense<0xFF800000> : vector<16xf32>
    %23 = vector.multi_reduction <maximumf>, %22, %cst_18 [1] : vector<16x32xf32> to vector<16xf32>
    %24 = vector.shape_cast %23 : vector<16xf32> to vector<16x1xf32>
    %25 = vector.broadcast %24 : vector<16x1xf32> to vector<16x32xf32>
    %26 = arith.subf %22, %25 : vector<16x32xf32>
    %27 = math.exp %26 : vector<16x32xf32>
    %cst_19 = arith.constant dense<0.000000e+00> : vector<16xf32>
    %28 = vector.multi_reduction <add>, %27, %cst_19 [1] : vector<16x32xf32> to vector<16xf32>
    %29 = vector.shape_cast %28 : vector<16xf32> to vector<16x1xf32>
    %30 = tpu.reciprocal %29 {approx = true} : vector<16x1xf32> -> vector<16x1xf32>
    %31 = vector.broadcast %30 : vector<16x1xf32> to vector<16x32xf32>
    %32 = arith.mulf %27, %31 : vector<16x32xf32>
    %33 = arith.truncf %32 : vector<16x32xf32> to vector<16x32xbf16>
    %c0_20 = arith.constant 0 : index
    %c0_21 = arith.constant 0 : index
    %c0_22 = arith.constant 0 : index
    %c0_23 = arith.constant 0 : index
    %34 = vector.load %arg18[%c0_20, %c0_21, %c0_22, %c0_23] : memref<1x4x16x32xbf16, #tpu.memory_space<vmem>>, vector<1x1x16x32xbf16>
    %35 = vector.shape_cast %34 : vector<1x1x16x32xbf16> to vector<16x32xbf16>
    %36 = vector.shape_cast %33 : vector<16x32xbf16> to vector<1x1x16x32xbf16>
    tpu.vector_store %arg18[%c0_20, %c0_21, %c0_22, %c0_23], %36 {strides = array<i32>} : memref<1x4x16x32xbf16, #tpu.memory_space<vmem>>, vector<1x1x16x32xbf16>,
    %cst_24 = arith.constant dense<0.000000e+00> : vector<16x16xf32>
    %37 = tpu.matmul %33, %21, %cst_24 {dimension_numbers = #tpu.dot_dimension_numbers<[1], [0], [0], [1], [0, 0, 1, 1], [], []>} : vector<16x32xbf16>, vector<32x16xbf16>, vector<16x16xf32> -> vector<16x16xf32>
    %38 = vector.extract_strided_slice %16 {offsets = [0, 16], sizes = [16, 16], strides = [1, 1]} : vector<16x64xbf16> to vector<16x16xbf16>
    %39 = vector.extract_strided_slice %17 {offsets = [0, 16], sizes = [32, 16], strides = [1, 1]} : vector<32x64xbf16> to vector<32x16xbf16>
    %40 = vector.extract_strided_slice %18 {offsets = [0, 16], sizes = [32, 16], strides = [1, 1]} : vector<32x64xbf16> to vector<32x16xbf16>
    %cst_25 = arith.constant dense<0.000000e+00> : vector<16x32xf32>
    %41 = tpu.matmul %38, %39, %cst_25 {dimension_numbers = #tpu.dot_dimension_numbers<[1], [1], [0], [0], [0, 0, 1, 0], [], []>} : vector<16x16xbf16>, vector<32x16xbf16>, vector<16x32xf32> -> vector<16x32xf32>
    %cst_26 = arith.constant dense<0xFF800000> : vector<16xf32>
    %42 = vector.multi_reduction <maximumf>, %41, %cst_26 [1] : vector<16x32xf32> to vector<16xf32>
    %43 = vector.shape_cast %42 : vector<16xf32> to vector<16x1xf32>
    %44 = vector.broadcast %43 : vector<16x1xf32> to vector<16x32xf32>
    %45 = arith.subf %41, %44 : vector<16x32xf32>
    %46 = math.exp %45 : vector<16x32xf32>
    %cst_27 = arith.constant dense<0.000000e+00> : vector<16xf32>
    %47 = vector.multi_reduction <add>, %46, %cst_27 [1] : vector<16x32xf32> to vector<16xf32>
    %48 = vector.shape_cast %47 : vector<16xf32> to vector<16x1xf32>
    %49 = tpu.reciprocal %48 {approx = true} : vector<16x1xf32> -> vector<16x1xf32>
    %50 = vector.broadcast %49 : vector<16x1xf32> to vector<16x32xf32>
    %51 = arith.mulf %46, %50 : vector<16x32xf32>
    %52 = arith.truncf %51 : vector<16x32xf32> to vector<16x32xbf16>
    %c0_28 = arith.constant 0 : index
    %c1 = arith.constant 1 : index
    %c0_29 = arith.constant 0 : index
    %c0_30 = arith.constant 0 : index
    %53 = vector.load %arg18[%c0_28, %c1, %c0_29, %c0_30] : memref<1x4x16x32xbf16, #tpu.memory_space<vmem>>, vector<1x1x16x32xbf16>
    %54 = vector.shape_cast %53 : vector<1x1x16x32xbf16> to vector<16x32xbf16>
    %55 = vector.shape_cast %52 : vector<16x32xbf16> to vector<1x1x16x32xbf16>
    tpu.vector_store %arg18[%c0_28, %c1, %c0_29, %c0_30], %55 {strides = array<i32>} : memref<1x4x16x32xbf16, #tpu.memory_space<vmem>>, vector<1x1x16x32xbf16>,
    %cst_31 = arith.constant dense<0.000000e+00> : vector<16x16xf32>
    %56 = tpu.matmul %52, %40, %cst_31 {dimension_numbers = #tpu.dot_dimension_numbers<[1], [0], [0], [1], [0, 0, 1, 1], [], []>} : vector<16x32xbf16>, vector<32x16xbf16>, vector<16x16xf32> -> vector<16x16xf32>
    %57 = vector.extract_strided_slice %16 {offsets = [0, 32], sizes = [16, 16], strides = [1, 1]} : vector<16x64xbf16> to vector<16x16xbf16>
    %58 = vector.extract_strided_slice %17 {offsets = [0, 32], sizes = [32, 16], strides = [1, 1]} : vector<32x64xbf16> to vector<32x16xbf16>
    %59 = vector.extract_strided_slice %18 {offsets = [0, 32], sizes = [32, 16], strides = [1, 1]} : vector<32x64xbf16> to vector<32x16xbf16>
    %cst_32 = arith.constant dense<0.000000e+00> : vector<16x32xf32>
    %60 = tpu.matmul %57, %58, %cst_32 {dimension_numbers = #tpu.dot_dimension_numbers<[1], [1], [0], [0], [0, 0, 1, 0], [], []>} : vector<16x16xbf16>, vector<32x16xbf16>, vector<16x32xf32> -> vector<16x32xf32>
    %cst_33 = arith.constant dense<0xFF800000> : vector<16xf32>
    %61 = vector.multi_reduction <maximumf>, %60, %cst_33 [1] : vector<16x32xf32> to vector<16xf32>
    %62 = vector.shape_cast %61 : vector<16xf32> to vector<16x1xf32>
    %63 = vector.broadcast %62 : vector<16x1xf32> to vector<16x32xf32>
    %64 = arith.subf %60, %63 : vector<16x32xf32>
    %65 = math.exp %64 : vector<16x32xf32>
    %cst_34 = arith.constant dense<0.000000e+00> : vector<16xf32>
    %66 = vector.multi_reduction <add>, %65, %cst_34 [1] : vector<16x32xf32> to vector<16xf32>
    %67 = vector.shape_cast %66 : vector<16xf32> to vector<16x1xf32>
    %68 = tpu.reciprocal %67 {approx = true} : vector<16x1xf32> -> vector<16x1xf32>
    %69 = vector.broadcast %68 : vector<16x1xf32> to vector<16x32xf32>
    %70 = arith.mulf %65, %69 : vector<16x32xf32>
    %71 = arith.truncf %70 : vector<16x32xf32> to vector<16x32xbf16>
    %c0_35 = arith.constant 0 : index
    %c2 = arith.constant 2 : index
    %c0_36 = arith.constant 0 : index
    %c0_37 = arith.constant 0 : index
    %72 = vector.load %arg18[%c0_35, %c2, %c0_36, %c0_37] : memref<1x4x16x32xbf16, #tpu.memory_space<vmem>>, vector<1x1x16x32xbf16>
    %73 = vector.shape_cast %72 : vector<1x1x16x32xbf16> to vector<16x32xbf16>
    %74 = vector.shape_cast %71 : vector<16x32xbf16> to vector<1x1x16x32xbf16>
    tpu.vector_store %arg18[%c0_35, %c2, %c0_36, %c0_37], %74 {strides = array<i32>} : memref<1x4x16x32xbf16, #tpu.memory_space<vmem>>, vector<1x1x16x32xbf16>,
    %cst_38 = arith.constant dense<0.000000e+00> : vector<16x16xf32>
    %75 = tpu.matmul %71, %59, %cst_38 {dimension_numbers = #tpu.dot_dimension_numbers<[1], [0], [0], [1], [0, 0, 1, 1], [], []>} : vector<16x32xbf16>, vector<32x16xbf16>, vector<16x16xf32> -> vector<16x16xf32>
    %76 = vector.extract_strided_slice %16 {offsets = [0, 48], sizes = [16, 16], strides = [1, 1]} : vector<16x64xbf16> to vector<16x16xbf16>
    %77 = vector.extract_strided_slice %17 {offsets = [0, 48], sizes = [32, 16], strides = [1, 1]} : vector<32x64xbf16> to vector<32x16xbf16>
    %78 = vector.extract_strided_slice %18 {offsets = [0, 48], sizes = [32, 16], strides = [1, 1]} : vector<32x64xbf16> to vector<32x16xbf16>
    %cst_39 = arith.constant dense<0.000000e+00> : vector<16x32xf32>
    %79 = tpu.matmul %76, %77, %cst_39 {dimension_numbers = #tpu.dot_dimension_numbers<[1], [1], [0], [0], [0, 0, 1, 0], [], []>} : vector<16x16xbf16>, vector<32x16xbf16>, vector<16x32xf32> -> vector<16x32xf32>
    %cst_40 = arith.constant dense<0xFF800000> : vector<16xf32>
    %80 = vector.multi_reduction <maximumf>, %79, %cst_40 [1] : vector<16x32xf32> to vector<16xf32>
    %81 = vector.shape_cast %80 : vector<16xf32> to vector<16x1xf32>
    %82 = vector.broadcast %81 : vector<16x1xf32> to vector<16x32xf32>
    %83 = arith.subf %79, %82 : vector<16x32xf32>
    %84 = math.exp %83 : vector<16x32xf32>
    %cst_41 = arith.constant dense<0.000000e+00> : vector<16xf32>
    %85 = vector.multi_reduction <add>, %84, %cst_41 [1] : vector<16x32xf32> to vector<16xf32>
    %86 = vector.shape_cast %85 : vector<16xf32> to vector<16x1xf32>
    %87 = tpu.reciprocal %86 {approx = true} : vector<16x1xf32> -> vector<16x1xf32>
    %88 = vector.broadcast %87 : vector<16x1xf32> to vector<16x32xf32>
    %89 = arith.mulf %84, %88 : vector<16x32xf32>
    %90 = arith.truncf %89 : vector<16x32xf32> to vector<16x32xbf16>
    %c0_42 = arith.constant 0 : index
    %c3 = arith.constant 3 : index
    %c0_43 = arith.constant 0 : index
    %c0_44 = arith.constant 0 : index
    %91 = vector.load %arg18[%c0_42, %c3, %c0_43, %c0_44] : memref<1x4x16x32xbf16, #tpu.memory_space<vmem>>, vector<1x1x16x32xbf16>
    %92 = vector.shape_cast %91 : vector<1x1x16x32xbf16> to vector<16x32xbf16>
    %93 = vector.shape_cast %90 : vector<16x32xbf16> to vector<1x1x16x32xbf16>
    tpu.vector_store %arg18[%c0_42, %c3, %c0_43, %c0_44], %93 {strides = array<i32>} : memref<1x4x16x32xbf16, #tpu.memory_space<vmem>>, vector<1x1x16x32xbf16>,
    %cst_45 = arith.constant dense<0.000000e+00> : vector<16x16xf32>
    %94 = tpu.matmul %90, %78, %cst_45 {dimension_numbers = #tpu.dot_dimension_numbers<[1], [0], [0], [1], [0, 0, 1, 1], [], []>} : vector<16x32xbf16>, vector<32x16xbf16>, vector<16x16xf32> -> vector<16x16xf32>
    %95 = tpu.concatenate %37, %56, %75, %94 in 1 : vector<16x16xf32>, vector<16x16xf32>, vector<16x16xf32>, vector<16x16xf32> -> vector<16x64xf32>
    %96 = arith.truncf %95 : vector<16x64xf32> to vector<16x64xbf16>
    %c0_46 = arith.constant 0 : index
    %c0_47 = arith.constant 0 : index
    %97 = vector.load %arg7[%c0_46, %c0_47] : memref<64x64xbf16, #tpu.memory_space<vmem>>, vector<64x64xbf16>
    %cst_48 = arith.constant dense<0.000000e+00> : vector<16x64xf32>
    %98 = tpu.matmul %96, %97, %cst_48 {dimension_numbers = #tpu.dot_dimension_numbers<[1], [0], [0], [1], [0, 0, 1, 1], [], []>} : vector<16x64xbf16>, vector<64x64xbf16>, vector<16x64xf32> -> vector<16x64xf32>
    %c0_49 = arith.constant 0 : index
    %c0_50 = arith.constant 0 : index
    %99 = vector.load %arg8[%c0_49, %c0_50] : memref<1x64xf32, #tpu.memory_space<vmem>>, vector<1x64xf32>
    %100 = vector.broadcast %99 : vector<1x64xf32> to vector<16x64xf32>
    %101 = arith.addf %98, %100 : vector<16x64xf32>
    %102 = arith.addf %1, %101 : vector<16x64xf32>
    %c0_51 = arith.constant 0 : index
    %c0_52 = arith.constant 0 : index
    %103 = vector.load %arg9[%c0_51, %c0_52] : memref<1x64xf32, #tpu.memory_space<vmem>>, vector<1x64xf32>
    %c0_53 = arith.constant 0 : index
    %c0_54 = arith.constant 0 : index
    %104 = vector.load %arg10[%c0_53, %c0_54] : memref<1x64xf32, #tpu.memory_space<vmem>>, vector<1x64xf32>
    %cst_55 = arith.constant dense<0.000000e+00> : vector<16xf32>
    %105 = vector.multi_reduction <add>, %102, %cst_55 [1] : vector<16x64xf32> to vector<16xf32>
    %106 = vector.shape_cast %105 : vector<16xf32> to vector<16x1xf32>
    %cst_56 = arith.constant 6.400000e+01 : f32
    %107 = vector.broadcast %cst_56 : f32 to vector<16x1xf32>
    %108 = arith.divf %106, %107 : vector<16x1xf32>
    %109 = vector.broadcast %108 : vector<16x1xf32> to vector<16x64xf32>
    %110 = arith.subf %102, %109 : vector<16x64xf32>
    %111 = arith.mulf %110, %110 : vector<16x64xf32>
    %cst_57 = arith.constant dense<0.000000e+00> : vector<16xf32>
    %112 = vector.multi_reduction <add>, %111, %cst_57 [1] : vector<16x64xf32> to vector<16xf32>
    %113 = vector.shape_cast %112 : vector<16xf32> to vector<16x1xf32>
    %cst_58 = arith.constant 6.400000e+01 : f32
    %114 = vector.broadcast %cst_58 : f32 to vector<16x1xf32>
    %115 = arith.divf %113, %114 : vector<16x1xf32>
    %cst_59 = arith.constant 9.99999974E-6 : f32
    %116 = vector.broadcast %cst_59 : f32 to vector<16x1xf32>
    %117 = arith.addf %115, %116 : vector<16x1xf32>
    %118 = math.rsqrt %117 : vector<16x1xf32>
    %119 = vector.broadcast %118 : vector<16x1xf32> to vector<16x64xf32>
    %120 = arith.mulf %110, %119 : vector<16x64xf32>
    %121 = vector.broadcast %103 : vector<1x64xf32> to vector<16x64xf32>
    %122 = arith.mulf %120, %121 : vector<16x64xf32>
    %123 = vector.broadcast %104 : vector<1x64xf32> to vector<16x64xf32>
    %124 = arith.addf %122, %123 : vector<16x64xf32>
    %125 = arith.truncf %124 : vector<16x64xf32> to vector<16x64xbf16>
    %c0_60 = arith.constant 0 : index
    %c0_61 = arith.constant 0 : index
    %126 = vector.load %arg11[%c0_60, %c0_61] : memref<64x128xbf16, #tpu.memory_space<vmem>>, vector<64x128xbf16>
    %cst_62 = arith.constant dense<0.000000e+00> : vector<16x128xf32>
    %127 = tpu.matmul %125, %126, %cst_62 {dimension_numbers = #tpu.dot_dimension_numbers<[1], [0], [0], [1], [0, 0, 1, 1], [], []>} : vector<16x64xbf16>, vector<64x128xbf16>, vector<16x128xf32> -> vector<16x128xf32>
    %c0_63 = arith.constant 0 : index
    %c0_64 = arith.constant 0 : index
    %128 = vector.load %arg12[%c0_63, %c0_64] : memref<1x128xf32, #tpu.memory_space<vmem>>, vector<1x128xf32>
    %129 = vector.broadcast %128 : vector<1x128xf32> to vector<16x128xf32>
    %130 = arith.addf %127, %129 : vector<16x128xf32>
    %cst_65 = arith.constant 0.000000e+00 : f32
    %131 = vector.broadcast %cst_65 : f32 to vector<16x128xf32>
    %132 = arith.maximumf %130, %131 : vector<16x128xf32>
    %133 = arith.truncf %132 : vector<16x128xf32> to vector<16x128xbf16>
    %c0_66 = arith.constant 0 : index
    %c0_67 = arith.constant 0 : index
    %134 = vector.load %arg13[%c0_66, %c0_67] : memref<128x64xbf16, #tpu.memory_space<vmem>>, vector<128x64xbf16>
    %cst_68 = arith.constant dense<0.000000e+00> : vector<16x64xf32>
    %135 = tpu.matmul %133, %134, %cst_68 {dimension_numbers = #tpu.dot_dimension_numbers<[1], [0], [0], [1], [0, 0, 1, 1], [], []>} : vector<16x128xbf16>, vector<128x64xbf16>, vector<16x64xf32> -> vector<16x64xf32>
    %c0_69 = arith.constant 0 : index
    %c0_70 = arith.constant 0 : index
    %136 = vector.load %arg14[%c0_69, %c0_70] : memref<1x64xf32, #tpu.memory_space<vmem>>, vector<1x64xf32>
    %137 = vector.broadcast %136 : vector<1x64xf32> to vector<16x64xf32>
    %138 = arith.addf %135, %137 : vector<16x64xf32>
    %139 = arith.addf %124, %138 : vector<16x64xf32>
    %c0_71 = arith.constant 0 : index
    %c0_72 = arith.constant 0 : index
    %140 = vector.load %arg15[%c0_71, %c0_72] : memref<1x64xf32, #tpu.memory_space<vmem>>, vector<1x64xf32>
    %c0_73 = arith.constant 0 : index
    %c0_74 = arith.constant 0 : index
    %141 = vector.load %arg16[%c0_73, %c0_74] : memref<1x64xf32, #tpu.memory_space<vmem>>, vector<1x64xf32>
    %cst_75 = arith.constant dense<0.000000e+00> : vector<16xf32>
    %142 = vector.multi_reduction <add>, %139, %cst_75 [1] : vector<16x64xf32> to vector<16xf32>
    %143 = vector.shape_cast %142 : vector<16xf32> to vector<16x1xf32>
    %cst_76 = arith.constant 6.400000e+01 : f32
    %144 = vector.broadcast %cst_76 : f32 to vector<16x1xf32>
    %145 = arith.divf %143, %144 : vector<16x1xf32>
    %146 = vector.broadcast %145 : vector<16x1xf32> to vector<16x64xf32>
    %147 = arith.subf %139, %146 : vector<16x64xf32>
    %148 = arith.mulf %147, %147 : vector<16x64xf32>
    %cst_77 = arith.constant dense<0.000000e+00> : vector<16xf32>
    %149 = vector.multi_reduction <add>, %148, %cst_77 [1] : vector<16x64xf32> to vector<16xf32>
    %150 = vector.shape_cast %149 : vector<16xf32> to vector<16x1xf32>
    %cst_78 = arith.constant 6.400000e+01 : f32
    %151 = vector.broadcast %cst_78 : f32 to vector<16x1xf32>
    %152 = arith.divf %150, %151 : vector<16x1xf32>
    %cst_79 = arith.constant 9.99999974E-6 : f32
    %153 = vector.broadcast %cst_79 : f32 to vector<16x1xf32>
    %154 = arith.addf %152, %153 : vector<16x1xf32>
    %155 = math.rsqrt %154 : vector<16x1xf32>
    %156 = vector.broadcast %155 : vector<16x1xf32> to vector<16x64xf32>
    %157 = arith.mulf %147, %156 : vector<16x64xf32>
    %158 = vector.broadcast %140 : vector<1x64xf32> to vector<16x64xf32>
    %159 = arith.mulf %157, %158 : vector<16x64xf32>
    %160 = vector.broadcast %141 : vector<1x64xf32> to vector<16x64xf32>
    %161 = arith.addf %159, %160 : vector<16x64xf32>
    %c0_80 = arith.constant 0 : index
    %c0_81 = arith.constant 0 : index
    %c0_82 = arith.constant 0 : index
    %162 = vector.load %arg17[%c0_80, %c0_81, %c0_82] : memref<1x16x64xf32, #tpu.memory_space<vmem>>, vector<1x16x64xf32>
    %163 = vector.shape_cast %162 : vector<1x16x64xf32> to vector<16x64xf32>
    %164 = vector.shape_cast %161 : vector<16x64xf32> to vector<1x16x64xf32>
    tpu.vector_store %arg17[%c0_80, %c0_81, %c0_82], %164 {strides = array<i32>} : memref<1x16x64xf32, #tpu.memory_space<vmem>>, vector<1x16x64xf32>,
    return
  }
  func.func @transform_0(%arg0: i32, %arg1: i32) -> (i32, i32, i32) {
    %c0_i32 = arith.constant 0 : i32
    %c0_i32_0 = arith.constant 0 : i32
    return %arg0, %arg1, %c0_i32 : i32, i32, i32
  }
  func.func @transform_1(%arg0: i32, %arg1: i32) -> (i32, i32, i32) {
    %c0_i32 = arith.constant 0 : i32
    %c0_i32_0 = arith.constant 0 : i32
    %c0_i32_1 = arith.constant 0 : i32
    return %arg0, %c0_i32, %c0_i32_0 : i32, i32, i32
  }
  func.func @transform_2(%arg0: i32, %arg1: i32) -> (i32, i32) {
    %c0_i32 = arith.constant 0 : i32
    %c0_i32_0 = arith.constant 0 : i32
    %c0_i32_1 = arith.constant 0 : i32
    return %c0_i32, %c0_i32_0 : i32, i32
  }
  func.func @transform_3(%arg0: i32, %arg1: i32) -> (i32, i32) {
    %c0_i32 = arith.constant 0 : i32
    %c0_i32_0 = arith.constant 0 : i32
    %c0_i32_1 = arith.constant 0 : i32
    return %c0_i32, %c0_i32_0 : i32, i32
  }
  func.func @transform_4(%arg0: i32, %arg1: i32) -> (i32, i32) {
    %c0_i32 = arith.constant 0 : i32
    %c0_i32_0 = arith.constant 0 : i32
    %c0_i32_1 = arith.constant 0 : i32
    return %c0_i32, %c0_i32_0 : i32, i32
  }
  func.func @transform_5(%arg0: i32, %arg1: i32) -> (i32, i32) {
    %c0_i32 = arith.constant 0 : i32
    %c0_i32_0 = arith.constant 0 : i32
    %c0_i32_1 = arith.constant 0 : i32
    return %c0_i32, %c0_i32_0 : i32, i32
  }
  func.func @transform_6(%arg0: i32, %arg1: i32) -> (i32, i32) {
    %c0_i32 = arith.constant 0 : i32
    %c0_i32_0 = arith.constant 0 : i32
    %c0_i32_1 = arith.constant 0 : i32
    return %c0_i32, %c0_i32_0 : i32, i32
  }
  func.func @transform_7(%arg0: i32, %arg1: i32) -> (i32, i32) {
    %c0_i32 = arith.constant 0 : i32
    %c0_i32_0 = arith.constant 0 : i32
    %c0_i32_1 = arith.constant 0 : i32
    return %c0_i32, %c0_i32_0 : i32, i32
  }
  func.func @transform_8(%arg0: i32, %arg1: i32) -> (i32, i32) {
    %c0_i32 = arith.constant 0 : i32
    %c0_i32_0 = arith.constant 0 : i32
    %c0_i32_1 = arith.constant 0 : i32
    return %c0_i32, %c0_i32_0 : i32, i32
  }
  func.func @transform_9(%arg0: i32, %arg1: i32) -> (i32, i32) {
    %c0_i32 = arith.constant 0 : i32
    %c0_i32_0 = arith.constant 0 : i32
    %c0_i32_1 = arith.constant 0 : i32
    return %c0_i32, %c0_i32_0 : i32, i32
  }
  func.func @transform_10(%arg0: i32, %arg1: i32) -> (i32, i32) {
    %c0_i32 = arith.constant 0 : i32
    %c0_i32_0 = arith.constant 0 : i32
    %c0_i32_1 = arith.constant 0 : i32
    return %c0_i32, %c0_i32_0 : i32, i32
  }
  func.func @transform_11(%arg0: i32, %arg1: i32) -> (i32, i32) {
    %c0_i32 = arith.constant 0 : i32
    %c0_i32_0 = arith.constant 0 : i32
    %c0_i32_1 = arith.constant 0 : i32
    return %c0_i32, %c0_i32_0 : i32, i32
  }
  func.func @transform_12(%arg0: i32, %arg1: i32) -> (i32, i32) {
    %c0_i32 = arith.constant 0 : i32
    %c0_i32_0 = arith.constant 0 : i32
    %c0_i32_1 = arith.constant 0 : i32
    return %c0_i32, %c0_i32_0 : i32, i32
  }
  func.func @transform_13(%arg0: i32, %arg1: i32) -> (i32, i32) {
    %c0_i32 = arith.constant 0 : i32
    %c0_i32_0 = arith.constant 0 : i32
    %c0_i32_1 = arith.constant 0 : i32
    return %c0_i32, %c0_i32_0 : i32, i32
  }
  func.func @transform_14(%arg0: i32, %arg1: i32) -> (i32, i32) {
    %c0_i32 = arith.constant 0 : i32
    %c0_i32_0 = arith.constant 0 : i32
    %c0_i32_1 = arith.constant 0 : i32
    return %c0_i32, %c0_i32_0 : i32, i32
  }
  func.func @transform_15(%arg0: i32, %arg1: i32) -> (i32, i32, i32) {
    %c0_i32 = arith.constant 0 : i32
    %c0_i32_0 = arith.constant 0 : i32
    return %arg0, %arg1, %c0_i32 : i32, i32, i32
  }
  func.func @transform_16(%arg0: i32, %arg1: i32) -> (i32, i32, i32, i32) {
    %c0_i32 = arith.constant 0 : i32
    %c0_i32_0 = arith.constant 0 : i32
    %c0_i32_1 = arith.constant 0 : i32
    return %arg0, %c0_i32, %arg1, %c0_i32_0 : i32, i32, i32, i32
  }
}

module attributes {stable_mosaic.version = 11 : i64} {
  func.func @_transformer_block_kernel(%arg0: i32, %arg1: i32, %arg2: memref<1x16x64xf32, #tpu.memory_space<vmem>>, %arg3: memref<1x32x64xf32, #tpu.memory_space<vmem>>, %arg4: memref<64x64xbf16, #tpu.memory_space<vmem>>, %arg5: memref<64x64xbf16, #tpu.memory_space<vmem>>, %arg6: memref<64x64xbf16, #tpu.memory_space<vmem>>, %arg7: memref<64x64xbf16, #tpu.memory_space<vmem>>, %arg8: memref<1x64xf32, #tpu.memory_space<vmem>>, %arg9: memref<1x64xf32, #tpu.memory_space<vmem>>, %arg10: memref<1x64xf32, #tpu.memory_space<vmem>>, %arg11: memref<64x128xbf16, #tpu.memory_space<vmem>>, %arg12: memref<1x128xf32, #tpu.memory_space<vmem>>, %arg13: memref<128x64xbf16, #tpu.memory_space<vmem>>, %arg14: memref<1x64xf32, #tpu.memory_space<vmem>>, %arg15: memref<1x64xf32, #tpu.memory_space<vmem>>, %arg16: memref<1x64xf32, #tpu.memory_space<vmem>>, %arg17: memref<1x16x64xf32, #tpu.memory_space<vmem>>, %arg18: memref<1x4x16x32xbf16, #tpu.memory_space<vmem>>) attributes {dimension_semantics = [#tpu.dimension_semantics<parallel>, #tpu.dimension_semantics<parallel>], iteration_bounds = array<i64: 2, 2>, scalar_prefetch = 0 : i64, scratch_operands = 0 : i64, tpu.core_type = #tpu.core_type<tc>, window_params = [{transform_indices = @transform_0, window_bounds = array<i64: 1, 16, 64>}, {transform_indices = @transform_1, window_bounds = array<i64: 1, 32, 64>}, {pipeline_mode = #tpu.pipeline_mode<synchronous>, transform_indices = @transform_2, window_bounds = array<i64: 64, 64>}, {pipeline_mode = #tpu.pipeline_mode<synchronous>, transform_indices = @transform_3, window_bounds = array<i64: 64, 64>}, {pipeline_mode = #tpu.pipeline_mode<synchronous>, transform_indices = @transform_4, window_bounds = array<i64: 64, 64>}, {pipeline_mode = #tpu.pipeline_mode<synchronous>, transform_indices = @transform_5, window_bounds = array<i64: 64, 64>}, {pipeline_mode = #tpu.pipeline_mode<synchronous>, transform_indices = @transform_6, window_bounds = array<i64: 1, 64>}, {pipeline_mode = #tpu.pipeline_mode<synchronous>, transform_indices = @transform_7, window_bounds = array<i64: 1, 64>}, {pipeline_mode = #tpu.pipeline_mode<synchronous>, transform_indices = @transform_8, window_bounds = array<i64: 1, 64>}, {pipeline_mode = #tpu.pipeline_mode<synchronous>, transform_indices = @transform_9, window_bounds = array<i64: 64, 128>}, {pipeline_mode = #tpu.pipeline_mode<synchronous>, transform_indices = @transform_10, window_bounds = array<i64: 1, 128>}, {pipeline_mode = #tpu.pipeline_mode<synchronous>, transform_indices = @transform_11, window_bounds = array<i64: 128, 64>}, {pipeline_mode = #tpu.pipeline_mode<synchronous>, transform_indices = @transform_12, window_bounds = array<i64: 1, 64>}, {pipeline_mode = #tpu.pipeline_mode<synchronous>, transform_indices = @transform_13, window_bounds = array<i64: 1, 64>}, {pipeline_mode = #tpu.pipeline_mode<synchronous>, transform_indices = @transform_14, window_bounds = array<i64: 1, 64>}, {transform_indices = @transform_15, window_bounds = array<i64: 1, 16, 64>}, {transform_indices = @transform_16, window_bounds = array<i64: 1, 4, 16, 32>}]} {
    %c0 = arith.constant 0 : index
    %c0_0 = arith.constant 0 : index
    %c0_1 = arith.constant 0 : index
    %0 = vector.load %arg2[%c0, %c0_0, %c0_1] : memref<1x16x64xf32, #tpu.memory_space<vmem>>, vector<1x16x64xf32>
    %1 = vector.shape_cast %0 : vector<1x16x64xf32> to vector<16x64xf32>
    %c0_2 = arith.constant 0 : index
    %c0_3 = arith.constant 0 : index
    %c0_4 = arith.constant 0 : index
    %2 = vector.load %arg2[%c0_2, %c0_3, %c0_4] : memref<1x16x64xf32, #tpu.memory_space<vmem>>, vector<1x16x64xf32>
    %3 = vector.shape_cast %2 : vector<1x16x64xf32> to vector<16x64xf32>
    %4 = arith.truncf %3 : vector<16x64xf32> to vector<16x64xbf16>
    %c0_5 = arith.constant 0 : index
    %c0_6 = arith.constant 0 : index
    %c0_7 = arith.constant 0 : index
    %5 = vector.load %arg3[%c0_5, %c0_6, %c0_7] : memref<1x32x64xf32, #tpu.memory_space<vmem>>, vector<1x32x64xf32>
    %6 = vector.shape_cast %5 : vector<1x32x64xf32> to vector<32x64xf32>
    %7 = arith.truncf %6 : vector<32x64xf32> to vector<32x64xbf16>
    %c0_8 = arith.constant 0 : index
    %c0_9 = arith.constant 0 : index
    %8 = vector.load %arg4[%c0_8, %c0_9] : memref<64x64xbf16, #tpu.memory_space<vmem>>, vector<64x64xbf16>
    %cst = arith.constant dense<0.000000e+00> : vector<16x64xf32>
    %9 = tpu.matmul %4, %8, %cst {dimension_numbers = #tpu.dot_dimension_numbers<[1], [0], [0], [1], [0, 0, 1, 1], [], []>} : vector<16x64xbf16>, vector<64x64xbf16>, vector<16x64xf32> -> vector<16x64xf32>
    %c0_10 = arith.constant 0 : index
    %c0_11 = arith.constant 0 : index
    %10 = vector.load %arg5[%c0_10, %c0_11] : memref<64x64xbf16, #tpu.memory_space<vmem>>, vector<64x64xbf16>
    %cst_12 = arith.constant dense<0.000000e+00> : vector<32x64xf32>
    %11 = tpu.matmul %7, %10, %cst_12 {dimension_numbers = #tpu.dot_dimension_numbers<[1], [0], [0], [1], [0, 0, 1, 1], [], []>} : vector<32x64xbf16>, vector<64x64xbf16>, vector<32x64xf32> -> vector<32x64xf32>
    %c0_13 = arith.constant 0 : index
    %c0_14 = arith.constant 0 : index
    %12 = vector.load %arg6[%c0_13, %c0_14] : memref<64x64xbf16, #tpu.memory_space<vmem>>, vector<64x64xbf16>
    %cst_15 = arith.constant dense<0.000000e+00> : vector<32x64xf32>
    %13 = tpu.matmul %7, %12, %cst_15 {dimension_numbers = #tpu.dot_dimension_numbers<[1], [0], [0], [1], [0, 0, 1, 1], [], []>} : vector<32x64xbf16>, vector<64x64xbf16>, vector<32x64xf32> -> vector<32x64xf32>
    %cst_16 = arith.constant 2.500000e-01 : f32
    %14 = vector.broadcast %cst_16 : f32 to vector<16x64xf32>
    %15 = arith.mulf %9, %14 : vector<16x64xf32>
    %16 = arith.truncf %15 : vector<16x64xf32> to vector<16x64xbf16>
    %17 = arith.truncf %11 : vector<32x64xf32> to vector<32x64xbf16>
    %18 = arith.truncf %13 : vector<32x64xf32> to vector<32x64xbf16>
    %19 = vector.extract_strided_slice %16 {offsets = [0, 0], sizes = [16, 16], strides = [1, 1]} : vector<16x64xbf16> to vector<16x16xbf16>
    %20 = vector.extract_strided_slice %17 {offsets = [0, 0], sizes = [32, 16], strides = [1, 1]} : vector<32x64xbf16> to vector<32x16xbf16>
    %21 = vector.extract_strided_slice %18 {offsets = [0, 0], sizes = [32, 16], strides = [1, 1]} : vector<32x64xbf16> to vector<32x16xbf16>
    %cst_17 = arith.constant dense<0.000000e+00> : vector<16x32xf32>
    %22 = tpu.matmul %19, %20, %cst_17 {dimension_numbers = #tpu.dot_dimension_numbers<[1], [1], [0], [0], [0, 0, 1, 0], [], []>} : vector<16x16xbf16>, vector<32x16xbf16>, vector<16x32xf32> -> vector<16x32xf32>
    %cst_18 = arith.constant dense<0xFF800000> : vector<16xf32>
    %23 = vector.multi_reduction <maximumf>, %22, %cst_18 [1] : vector<16x32xf32> to vector<16xf32>
    %24 = vector.shape_cast %23 : vector<16xf32> to vector<16x1xf32>
    %25 = vector.broadcast %24 : vector<16x1xf32> to vector<16x32xf32>
    %26 = arith.subf %22, %25 : vector<16x32xf32>
    %27 = math.exp %26 : vector<16x32xf32>
    %cst_19 = arith.constant dense<0.000000e+00> : vector<16xf32>
    %28 = vector.multi_reduction <add>, %27, %cst_19 [1] : vector<16x32xf32> to vector<16xf32>
    %29 = vector.shape_cast %28 : vector<16xf32> to vector<16x1xf32>
    %30 = tpu.reciprocal %29 {approx = true} : vector<16x1xf32> -> vector<16x1xf32>
    %31 = vector.broadcast %30 : vector<16x1xf32> to vector<16x32xf32>
    %32 = arith.mulf %27, %31 : vector<16x32xf32>
    %33 = arith.truncf %32 : vector<16x32xf32> to vector<16x32xbf16>
    %c0_20 = arith.constant 0 : index
    %c0_21 = arith.constant 0 : index
    %c0_22 = arith.constant 0 : index
    %c0_23 = arith.constant 0 : index
    %34 = vector.load %arg18[%c0_20, %c0_21, %c0_22, %c0_23] : memref<1x4x16x32xbf16, #tpu.memory_space<vmem>>, vector<1x1x16x32xbf16>
    %35 = vector.shape_cast %34 : vector<1x1x16x32xbf16> to vector<16x32xbf16>
    %36 = vector.shape_cast %33 : vector<16x32xbf16> to vector<1x1x16x32xbf16>
    tpu.vector_store %arg18[%c0_20, %c0_21, %c0_22, %c0_23], %36 {strides = array<i32>} : memref<1x4x16x32xbf16, #tpu.memory_space<vmem>>, vector<1x1x16x32xbf16>,
    %cst_24 = arith.constant dense<0.000000e+00> : vector<16x16xf32>
    %37 = tpu.matmul %33, %21, %cst_24 {dimension_numbers = #tpu.dot_dimension_numbers<[1], [0], [0], [1], [0, 0, 1, 1], [], []>} : vector<16x32xbf16>, vector<32x16xbf16>, vector<16x16xf32> -> vector<16x16xf32>
    %38 = vector.extract_strided_slice %16 {offsets = [0, 16], sizes = [16, 16], strides = [1, 1]} : vector<16x64xbf16> to vector<16x16xbf16>
    %39 = vector.extract_strided_slice %17 {offsets = [0, 16], sizes = [32, 16], strides = [1, 1]} : vector<32x64xbf16> to vector<32x16xbf16>
    %40 = vector.extract_strided_slice %18 {offsets = [0, 16], sizes = [32, 16], strides = [1, 1]} : vector<32x64xbf16> to vector<32x16xbf16>
    %cst_25 = arith.constant dense<0.000000e+00> : vector<16x32xf32>
    %41 = tpu.matmul %38, %39, %cst_25 {dimension_numbers = #tpu.dot_dimension_numbers<[1], [1], [0], [0], [0, 0, 1, 0], [], []>} : vector<16x16xbf16>, vector<32x16xbf16>, vector<16x32xf32> -> vector<16x32xf32>
    %cst_26 = arith.constant dense<0xFF800000> : vector<16xf32>
    %42 = vector.multi_reduction <maximumf>, %41, %cst_26 [1] : vector<16x32xf32> to vector<16xf32>
    %43 = vector.shape_cast %42 : vector<16xf32> to vector<16x1xf32>
    %44 = vector.broadcast %43 : vector<16x1xf32> to vector<16x32xf32>
    %45 = arith.subf %41, %44 : vector<16x32xf32>
    %46 = math.exp %45 : vector<16x32xf32>
    %cst_27 = arith.constant dense<0.000000e+00> : vector<16xf32>
    %47 = vector.multi_reduction <add>, %46, %cst_27 [1] : vector<16x32xf32> to vector<16xf32>
    %48 = vector.shape_cast %47 : vector<16xf32> to vector<16x1xf32>
    %49 = tpu.reciprocal %48 {approx = true} : vector<16x1xf32> -> vector<16x1xf32>
    %50 = vector.broadcast %49 : vector<16x1xf32> to vector<16x32xf32>
    %51 = arith.mulf %46, %50 : vector<16x32xf32>
    %52 = arith.truncf %51 : vector<16x32xf32> to vector<16x32xbf16>
    %c0_28 = arith.constant 0 : index
    %c1 = arith.constant 1 : index
    %c0_29 = arith.constant 0 : index
    %c0_30 = arith.constant 0 : index
    %53 = vector.load %arg18[%c0_28, %c1, %c0_29, %c0_30] : memref<1x4x16x32xbf16, #tpu.memory_space<vmem>>, vector<1x1x16x32xbf16>
    %54 = vector.shape_cast %53 : vector<1x1x16x32xbf16> to vector<16x32xbf16>
    %55 = vector.shape_cast %52 : vector<16x32xbf16> to vector<1x1x16x32xbf16>
    tpu.vector_store %arg18[%c0_28, %c1, %c0_29, %c0_30], %55 {strides = array<i32>} : memref<1x4x16x32xbf16, #tpu.memory_space<vmem>>, vector<1x1x16x32xbf16>,
    %cst_31 = arith.constant dense<0.000000e+00> : vector<16x16xf32>
    %56 = tpu.matmul %52, %40, %cst_31 {dimension_numbers = #tpu.dot_dimension_numbers<[1], [0], [0], [1], [0, 0, 1, 1], [], []>} : vector<16x32xbf16>, vector<32x16xbf16>, vector<16x16xf32> -> vector<16x16xf32>
    %57 = vector.extract_strided_slice %16 {offsets = [0, 32], sizes = [16, 16], strides = [1, 1]} : vector<16x64xbf16> to vector<16x16xbf16>
    %58 = vector.extract_strided_slice %17 {offsets = [0, 32], sizes = [32, 16], strides = [1, 1]} : vector<32x64xbf16> to vector<32x16xbf16>
    %59 = vector.extract_strided_slice %18 {offsets = [0, 32], sizes = [32, 16], strides = [1, 1]} : vector<32x64xbf16> to vector<32x16xbf16>
    %cst_32 = arith.constant dense<0.000000e+00> : vector<16x32xf32>
    %60 = tpu.matmul %57, %58, %cst_32 {dimension_numbers = #tpu.dot_dimension_numbers<[1], [1], [0], [0], [0, 0, 1, 0], [], []>} : vector<16x16xbf16>, vector<32x16xbf16>, vector<16x32xf32> -> vector<16x32xf32>
    %cst_33 = arith.constant dense<0xFF800000> : vector<16xf32>
    %61 = vector.multi_reduction <maximumf>, %60, %cst_33 [1] : vector<16x32xf32> to vector<16xf32>
    %62 = vector.shape_cast %61 : vector<16xf32> to vector<16x1xf32>
    %63 = vector.broadcast %62 : vector<16x1xf32> to vector<16x32xf32>
    %64 = arith.subf %60, %63 : vector<16x32xf32>
    %65 = math.exp %64 : vector<16x32xf32>
    %cst_34 = arith.constant dense<0.000000e+00> : vector<16xf32>
    %66 = vector.multi_reduction <add>, %65, %cst_34 [1] : vector<16x32xf32> to vector<16xf32>
    %67 = vector.shape_cast %66 : vector<16xf32> to vector<16x1xf32>
    %68 = tpu.reciprocal %67 {approx = true} : vector<16x1xf32> -> vector<16x1xf32>
    %69 = vector.broadcast %68 : vector<16x1xf32> to vector<16x32xf32>
    %70 = arith.mulf %65, %69 : vector<16x32xf32>
    %71 = arith.truncf %70 : vector<16x32xf32> to vector<16x32xbf16>
    %c0_35 = arith.constant 0 : index
    %c2 = arith.constant 2 : index
    %c0_36 = arith.constant 0 : index
    %c0_37 = arith.constant 0 : index
    %72 = vector.load %arg18[%c0_35, %c2, %c0_36, %c0_37] : memref<1x4x16x32xbf16, #tpu.memory_space<vmem>>, vector<1x1x16x32xbf16>
    %73 = vector.shape_cast %72 : vector<1x1x16x32xbf16> to vector<16x32xbf16>
    %74 = vector.shape_cast %71 : vector<16x32xbf16> to vector<1x1x16x32xbf16>
    tpu.vector_store %arg18[%c0_35, %c2, %c0_36, %c0_37], %74 {strides = array<i32>} : memref<1x4x16x32xbf16, #tpu.memory_space<vmem>>, vector<1x1x16x32xbf16>,
    %cst_38 = arith.constant dense<0.000000e+00> : vector<16x16xf32>
    %75 = tpu.matmul %71, %59, %cst_38 {dimension_numbers = #tpu.dot_dimension_numbers<[1], [0], [0], [1], [0, 0, 1, 1], [], []>} : vector<16x32xbf16>, vector<32x16xbf16>, vector<16x16xf32> -> vector<16x16xf32>
    %76 = vector.extract_strided_slice %16 {offsets = [0, 48], sizes = [16, 16], strides = [1, 1]} : vector<16x64xbf16> to vector<16x16xbf16>
    %77 = vector.extract_strided_slice %17 {offsets = [0, 48], sizes = [32, 16], strides = [1, 1]} : vector<32x64xbf16> to vector<32x16xbf16>
    %78 = vector.extract_strided_slice %18 {offsets = [0, 48], sizes = [32, 16], strides = [1, 1]} : vector<32x64xbf16> to vector<32x16xbf16>
    %cst_39 = arith.constant dense<0.000000e+00> : vector<16x32xf32>
    %79 = tpu.matmul %76, %77, %cst_39 {dimension_numbers = #tpu.dot_dimension_numbers<[1], [1], [0], [0], [0, 0, 1, 0], [], []>} : vector<16x16xbf16>, vector<32x16xbf16>, vector<16x32xf32> -> vector<16x32xf32>
    %cst_40 = arith.constant dense<0xFF800000> : vector<16xf32>
    %80 = vector.multi_reduction <maximumf>, %79, %cst_40 [1] : vector<16x32xf32> to vector<16xf32>
    %81 = vector.shape_cast %80 : vector<16xf32> to vector<16x1xf32>
    %82 = vector.broadcast %81 : vector<16x1xf32> to vector<16x32xf32>
    %83 = arith.subf %79, %82 : vector<16x32xf32>
    %84 = math.exp %83 : vector<16x32xf32>
    %cst_41 = arith.constant dense<0.000000e+00> : vector<16xf32>
    %85 = vector.multi_reduction <add>, %84, %cst_41 [1] : vector<16x32xf32> to vector<16xf32>
    %86 = vector.shape_cast %85 : vector<16xf32> to vector<16x1xf32>
    %87 = tpu.reciprocal %86 {approx = true} : vector<16x1xf32> -> vector<16x1xf32>
    %88 = vector.broadcast %87 : vector<16x1xf32> to vector<16x32xf32>
    %89 = arith.mulf %84, %88 : vector<16x32xf32>
    %90 = arith.truncf %89 : vector<16x32xf32> to vector<16x32xbf16>
    %c0_42 = arith.constant 0 : index
    %c3 = arith.constant 3 : index
    %c0_43 = arith.constant 0 : index
    %c0_44 = arith.constant 0 : index
    %91 = vector.load %arg18[%c0_42, %c3, %c0_43, %c0_44] : memref<1x4x16x32xbf16, #tpu.memory_space<vmem>>, vector<1x1x16x32xbf16>
    %92 = vector.shape_cast %91 : vector<1x1x16x32xbf16> to vector<16x32xbf16>
    %93 = vector.shape_cast %90 : vector<16x32xbf16> to vector<1x1x16x32xbf16>
    tpu.vector_store %arg18[%c0_42, %c3, %c0_43, %c0_44], %93 {strides = array<i32>} : memref<1x4x16x32xbf16, #tpu.memory_space<vmem>>, vector<1x1x16x32xbf16>,
    %cst_45 = arith.constant dense<0.000000e+00> : vector<16x16xf32>
    %94 = tpu.matmul %90, %78, %cst_45 {dimension_numbers = #tpu.dot_dimension_numbers<[1], [0], [0], [1], [0, 0, 1, 1], [], []>} : vector<16x32xbf16>, vector<32x16xbf16>, vector<16x16xf32> -> vector<16x16xf32>
    %95 = tpu.concatenate %37, %56, %75, %94 in 1 : vector<16x16xf32>, vector<16x16xf32>, vector<16x16xf32>, vector<16x16xf32> -> vector<16x64xf32>
    %96 = arith.truncf %95 : vector<16x64xf32> to vector<16x64xbf16>
    %c0_46 = arith.constant 0 : index
    %c0_47 = arith.constant 0 : index
    %97 = vector.load %arg7[%c0_46, %c0_47] : memref<64x64xbf16, #tpu.memory_space<vmem>>, vector<64x64xbf16>
    %cst_48 = arith.constant dense<0.000000e+00> : vector<16x64xf32>
    %98 = tpu.matmul %96, %97, %cst_48 {dimension_numbers = #tpu.dot_dimension_numbers<[1], [0], [0], [1], [0, 0, 1, 1], [], []>} : vector<16x64xbf16>, vector<64x64xbf16>, vector<16x64xf32> -> vector<16x64xf32>
    %c0_49 = arith.constant 0 : index
    %c0_50 = arith.constant 0 : index
    %99 = vector.load %arg8[%c0_49, %c0_50] : memref<1x64xf32, #tpu.memory_space<vmem>>, vector<1x64xf32>
    %100 = vector.broadcast %99 : vector<1x64xf32> to vector<16x64xf32>
    %101 = arith.addf %98, %100 : vector<16x64xf32>
    %102 = arith.addf %1, %101 : vector<16x64xf32>
    %c0_51 = arith.constant 0 : index
    %c0_52 = arith.constant 0 : index
    %103 = vector.load %arg9[%c0_51, %c0_52] : memref<1x64xf32, #tpu.memory_space<vmem>>, vector<1x64xf32>
    %c0_53 = arith.constant 0 : index
    %c0_54 = arith.constant 0 : index
    %104 = vector.load %arg10[%c0_53, %c0_54] : memref<1x64xf32, #tpu.memory_space<vmem>>, vector<1x64xf32>
    %cst_55 = arith.constant dense<0.000000e+00> : vector<16xf32>
    %105 = vector.multi_reduction <add>, %102, %cst_55 [1] : vector<16x64xf32> to vector<16xf32>
    %106 = vector.shape_cast %105 : vector<16xf32> to vector<16x1xf32>
    %cst_56 = arith.constant 6.400000e+01 : f32
    %107 = vector.broadcast %cst_56 : f32 to vector<16x1xf32>
    %108 = arith.divf %106, %107 : vector<16x1xf32>
    %109 = vector.broadcast %108 : vector<16x1xf32> to vector<16x64xf32>
    %110 = arith.subf %102, %109 : vector<16x64xf32>
    %111 = arith.mulf %110, %110 : vector<16x64xf32>
    %cst_57 = arith.constant dense<0.000000e+00> : vector<16xf32>
    %112 = vector.multi_reduction <add>, %111, %cst_57 [1] : vector<16x64xf32> to vector<16xf32>
    %113 = vector.shape_cast %112 : vector<16xf32> to vector<16x1xf32>
    %cst_58 = arith.constant 6.400000e+01 : f32
    %114 = vector.broadcast %cst_58 : f32 to vector<16x1xf32>
    %115 = arith.divf %113, %114 : vector<16x1xf32>
    %cst_59 = arith.constant 9.99999974E-6 : f32
    %116 = vector.broadcast %cst_59 : f32 to vector<16x1xf32>
    %117 = arith.addf %115, %116 : vector<16x1xf32>
    %118 = math.rsqrt %117 : vector<16x1xf32>
    %119 = vector.broadcast %118 : vector<16x1xf32> to vector<16x64xf32>
    %120 = arith.mulf %110, %119 : vector<16x64xf32>
    %121 = vector.broadcast %103 : vector<1x64xf32> to vector<16x64xf32>
    %122 = arith.mulf %120, %121 : vector<16x64xf32>
    %123 = vector.broadcast %104 : vector<1x64xf32> to vector<16x64xf32>
    %124 = arith.addf %122, %123 : vector<16x64xf32>
    %125 = arith.truncf %124 : vector<16x64xf32> to vector<16x64xbf16>
    %c0_60 = arith.constant 0 : index
    %c0_61 = arith.constant 0 : index
    %126 = vector.load %arg11[%c0_60, %c0_61] : memref<64x128xbf16, #tpu.memory_space<vmem>>, vector<64x128xbf16>
    %cst_62 = arith.constant dense<0.000000e+00> : vector<16x128xf32>
    %127 = tpu.matmul %125, %126, %cst_62 {dimension_numbers = #tpu.dot_dimension_numbers<[1], [0], [0], [1], [0, 0, 1, 1], [], []>} : vector<16x64xbf16>, vector<64x128xbf16>, vector<16x128xf32> -> vector<16x128xf32>
    %c0_63 = arith.constant 0 : index
    %c0_64 = arith.constant 0 : index
    %128 = vector.load %arg12[%c0_63, %c0_64] : memref<1x128xf32, #tpu.memory_space<vmem>>, vector<1x128xf32>
    %129 = vector.broadcast %128 : vector<1x128xf32> to vector<16x128xf32>
    %130 = arith.addf %127, %129 : vector<16x128xf32>
    %cst_65 = arith.constant 0.000000e+00 : f32
    %131 = vector.broadcast %cst_65 : f32 to vector<16x128xf32>
    %132 = arith.maximumf %130, %131 : vector<16x128xf32>
    %133 = arith.truncf %132 : vector<16x128xf32> to vector<16x128xbf16>
    %c0_66 = arith.constant 0 : index
    %c0_67 = arith.constant 0 : index
    %134 = vector.load %arg13[%c0_66, %c0_67] : memref<128x64xbf16, #tpu.memory_space<vmem>>, vector<128x64xbf16>
    %cst_68 = arith.constant dense<0.000000e+00> : vector<16x64xf32>
    %135 = tpu.matmul %133, %134, %cst_68 {dimension_numbers = #tpu.dot_dimension_numbers<[1], [0], [0], [1], [0, 0, 1, 1], [], []>} : vector<16x128xbf16>, vector<128x64xbf16>, vector<16x64xf32> -> vector<16x64xf32>
    %c0_69 = arith.constant 0 : index
    %c0_70 = arith.constant 0 : index
    %136 = vector.load %arg14[%c0_69, %c0_70] : memref<1x64xf32, #tpu.memory_space<vmem>>, vector<1x64xf32>
    %137 = vector.broadcast %136 : vector<1x64xf32> to vector<16x64xf32>
    %138 = arith.addf %135, %137 : vector<16x64xf32>
    %139 = arith.addf %124, %138 : vector<16x64xf32>
    %c0_71 = arith.constant 0 : index
    %c0_72 = arith.constant 0 : index
    %140 = vector.load %arg15[%c0_71, %c0_72] : memref<1x64xf32, #tpu.memory_space<vmem>>, vector<1x64xf32>
    %c0_73 = arith.constant 0 : index
    %c0_74 = arith.constant 0 : index
    %141 = vector.load %arg16[%c0_73, %c0_74] : memref<1x64xf32, #tpu.memory_space<vmem>>, vector<1x64xf32>
    %cst_75 = arith.constant dense<0.000000e+00> : vector<16xf32>
    %142 = vector.multi_reduction <add>, %139, %cst_75 [1] : vector<16x64xf32> to vector<16xf32>
    %143 = vector.shape_cast %142 : vector<16xf32> to vector<16x1xf32>
    %cst_76 = arith.constant 6.400000e+01 : f32
    %144 = vector.broadcast %cst_76 : f32 to vector<16x1xf32>
    %145 = arith.divf %143, %144 : vector<16x1xf32>
    %146 = vector.broadcast %145 : vector<16x1xf32> to vector<16x64xf32>
    %147 = arith.subf %139, %146 : vector<16x64xf32>
    %148 = arith.mulf %147, %147 : vector<16x64xf32>
    %cst_77 = arith.constant dense<0.000000e+00> : vector<16xf32>
    %149 = vector.multi_reduction <add>, %148, %cst_77 [1] : vector<16x64xf32> to vector<16xf32>
    %150 = vector.shape_cast %149 : vector<16xf32> to vector<16x1xf32>
    %cst_78 = arith.constant 6.400000e+01 : f32
    %151 = vector.broadcast %cst_78 : f32 to vector<16x1xf32>
    %152 = arith.divf %150, %151 : vector<16x1xf32>
    %cst_79 = arith.constant 9.99999974E-6 : f32
    %153 = vector.broadcast %cst_79 : f32 to vector<16x1xf32>
    %154 = arith.addf %152, %153 : vector<16x1xf32>
    %155 = math.rsqrt %154 : vector<16x1xf32>
    %156 = vector.broadcast %155 : vector<16x1xf32> to vector<16x64xf32>
    %157 = arith.mulf %147, %156 : vector<16x64xf32>
    %158 = vector.broadcast %140 : vector<1x64xf32> to vector<16x64xf32>
    %159 = arith.mulf %157, %158 : vector<16x64xf32>
    %160 = vector.broadcast %141 : vector<1x64xf32> to vector<16x64xf32>
    %161 = arith.addf %159, %160 : vector<16x64xf32>
    %c0_80 = arith.constant 0 : index
    %c0_81 = arith.constant 0 : index
    %c0_82 = arith.constant 0 : index
    %162 = vector.load %arg17[%c0_80, %c0_81, %c0_82] : memref<1x16x64xf32, #tpu.memory_space<vmem>>, vector<1x16x64xf32>
    %163 = vector.shape_cast %162 : vector<1x16x64xf32> to vector<16x64xf32>
    %164 = vector.shape_cast %161 : vector<16x64xf32> to vector<1x16x64xf32>
    tpu.vector_store %arg17[%c0_80, %c0_81, %c0_82], %164 {strides = array<i32>} : memref<1x16x64xf32, #tpu.memory_space<vmem>>, vector<1x16x64xf32>,
    return
  }
  func.func @transform_0(%arg0: i32, %arg1: i32) -> (i32, i32, i32) {
    %c0_i32 = arith.constant 0 : i32
    %c0_i32_0 = arith.constant 0 : i32
    return %arg0, %arg1, %c0_i32 : i32, i32, i32
  }
  func.func @transform_1(%arg0: i32, %arg1: i32) -> (i32, i32, i32) {
    %c0_i32 = arith.constant 0 : i32
    %c0_i32_0 = arith.constant 0 : i32
    %c0_i32_1 = arith.constant 0 : i32
    return %arg0, %c0_i32, %c0_i32_0 : i32, i32, i32
  }
  func.func @transform_2(%arg0: i32, %arg1: i32) -> (i32, i32) {
    %c0_i32 = arith.constant 0 : i32
    %c0_i32_0 = arith.constant 0 : i32
    %c0_i32_1 = arith.constant 0 : i32
    return %c0_i32, %c0_i32_0 : i32, i32
  }
  func.func @transform_3(%arg0: i32, %arg1: i32) -> (i32, i32) {
    %c0_i32 = arith.constant 0 : i32
    %c0_i32_0 = arith.constant 0 : i32
    %c0_i32_1 = arith.constant 0 : i32
    return %c0_i32, %c0_i32_0 : i32, i32
  }
  func.func @transform_4(%arg0: i32, %arg1: i32) -> (i32, i32) {
    %c0_i32 = arith.constant 0 : i32
    %c0_i32_0 = arith.constant 0 : i32
    %c0_i32_1 = arith.constant 0 : i32
    return %c0_i32, %c0_i32_0 : i32, i32
  }
  func.func @transform_5(%arg0: i32, %arg1: i32) -> (i32, i32) {
    %c0_i32 = arith.constant 0 : i32
    %c0_i32_0 = arith.constant 0 : i32
    %c0_i32_1 = arith.constant 0 : i32
    return %c0_i32, %c0_i32_0 : i32, i32
  }
  func.func @transform_6(%arg0: i32, %arg1: i32) -> (i32, i32) {
    %c0_i32 = arith.constant 0 : i32
    %c0_i32_0 = arith.constant 0 : i32
    %c0_i32_1 = arith.constant 0 : i32
    return %c0_i32, %c0_i32_0 : i32, i32
  }
  func.func @transform_7(%arg0: i32, %arg1: i32) -> (i32, i32) {
    %c0_i32 = arith.constant 0 : i32
    %c0_i32_0 = arith.constant 0 : i32
    %c0_i32_1 = arith.constant 0 : i32
    return %c0_i32, %c0_i32_0 : i32, i32
  }
  func.func @transform_8(%arg0: i32, %arg1: i32) -> (i32, i32) {
    %c0_i32 = arith.constant 0 : i32
    %c0_i32_0 = arith.constant 0 : i32
    %c0_i32_1 = arith.constant 0 : i32
    return %c0_i32, %c0_i32_0 : i32, i32
  }
  func.func @transform_9(%arg0: i32, %arg1: i32) -> (i32, i32) {
    %c0_i32 = arith.constant 0 : i32
    %c0_i32_0 = arith.constant 0 : i32
    %c0_i32_1 = arith.constant 0 : i32
    return %c0_i32, %c0_i32_0 : i32, i32
  }
  func.func @transform_10(%arg0: i32, %arg1: i32) -> (i32, i32) {
    %c0_i32 = arith.constant 0 : i32
    %c0_i32_0 = arith.constant 0 : i32
    %c0_i32_1 = arith.constant 0 : i32
    return %c0_i32, %c0_i32_0 : i32, i32
  }
  func.func @transform_11(%arg0: i32, %arg1: i32) -> (i32, i32) {
    %c0_i32 = arith.constant 0 : i32
    %c0_i32_0 = arith.constant 0 : i32
    %c0_i32_1 = arith.constant 0 : i32
    return %c0_i32, %c0_i32_0 : i32, i32
  }
  func.func @transform_12(%arg0: i32, %arg1: i32) -> (i32, i32) {
    %c0_i32 = arith.constant 0 : i32
    %c0_i32_0 = arith.constant 0 : i32
    %c0_i32_1 = arith.constant 0 : i32
    return %c0_i32, %c0_i32_0 : i32, i32
  }
  func.func @transform_13(%arg0: i32, %arg1: i32) -> (i32, i32) {
    %c0_i32 = arith.constant 0 : i32
    %c0_i32_0 = arith.constant 0 : i32
    %c0_i32_1 = arith.constant 0 : i32
    return %c0_i32, %c0_i32_0 : i32, i32
  }
  func.func @transform_14(%arg0: i32, %arg1: i32) -> (i32, i32) {
    %c0_i32 = arith.constant 0 : i32
    %c0_i32_0 = arith.constant 0 : i32
    %c0_i32_1 = arith.constant 0 : i32
    return %c0_i32, %c0_i32_0 : i32, i32
  }
  func.func @transform_15(%arg0: i32, %arg1: i32) -> (i32, i32, i32) {
    %c0_i32 = arith.constant 0 : i32
    %c0_i32_0 = arith.constant 0 : i32
    return %arg0, %arg1, %c0_i32 : i32, i32, i32
  }
  func.func @transform_16(%arg0: i32, %arg1: i32) -> (i32, i32, i32, i32) {
    %c0_i32 = arith.constant 0 : i32
    %c0_i32_0 = arith.constant 0 : i32
    %c0_i32_1 = arith.constant 0 : i32
    return %arg0, %c0_i32, %arg1, %c0_i32_0 : i32, i32, i32, i32
  }
}

</mosaic_0001>

<bundles_post_ra>
// kernel: tpu_custom_call.1
= control target key start
LH: loop header
LB: loop body
LE: loop exit
PB: predicated region body
PF: predicated region fallthrough
CT: control target
= control target key end

     0   :  { %s3732_s0 = inlined_call_operand.vmem [shape: f32[2,32,64], index: 0, kind: input, shape index: {}]   ;;  %s3733_s1 = inlined_call_operand.hbm [shape: f32[2,32,64], index: 1, kind: input, shape index: {}]   ;;  %s3734_s2 = inlined_call_operand.vmem [shape: bf16[64,64], index: 2, kind: input, shape index: {}]   ;;  %s3735_s3 = inlined_call_operand.hbm [shape: bf16[64,64], index: 3, kind: input, shape index: {}]   ;;  %s3736_s4 = inlined_call_operand.hbm [shape: bf16[64,64], index: 4, kind: input, shape index: {}]   ;;  %s3737_s5 = inlined_call_operand.hbm [shape: bf16[64,64], index: 5, kind: input, shape index: {}]   ;;  %s3738_s6 = inlined_call_operand.vmem [shape: f32[1,64], index: 6, kind: input, shape index: {}]   ;;  %s3739_s7 = inlined_call_operand.vmem [shape: f32[1,64], index: 7, kind: input, shape index: {}]   ;;  %s3740_s8 = inlined_call_operand.vmem [shape: f32[1,64], index: 8, kind: input, shape index: {}]   ;;  %s3741_s9 = inlined_call_operand.hbm [shape: bf16[64,128], index: 9, kind: input, shape index: {}]   ;;  %s3742_s10 = inlined_call_operand.vmem [shape: f32[1,128], index: 10, kind: input, shape index: {}]   ;;  %s3743_s11 = inlined_call_operand.vmem [shape: bf16[128,64], index: 11, kind: input, shape index: {}]   ;;  %s3744_s12 = inlined_call_operand.vmem [shape: f32[1,64], index: 12, kind: input, shape index: {}]   ;;  %s3745_s13 = inlined_call_operand.vmem [shape: f32[1,64], index: 13, kind: input, shape index: {}]   ;;  %s3746_s14 = inlined_call_operand.vmem [shape: f32[1,64], index: 14, kind: input, shape index: {}]   ;;  %s3747_s15 = inlined_call_operand.hbm [shape: f32[2,32,64], index: 15, kind: output, shape index: {0}]   ;;  %s3748_s16 = inlined_call_operand.hbm [shape: bf16[2,4,32,32], index: 16, kind: output, shape index: {1}]  }
   0x1   :  { %3763 = sst [smem:[#allocation26_spill]] %s3732_s0 }
   0x2   :  { %3764 = sst [smem:[#allocation27_spill]] %s3733_s1 }
   0x3   :  { %3765 = sst [smem:[#allocation28_spill]] %s3734_s2 }
   0x4   :  { %3766 = sst [smem:[#allocation29_spill]] %s3735_s3 }
   0x5   :  { %3767 = sst [smem:[#allocation30_spill]] %s3736_s4 }
   0x6   :  { %3768 = sst [smem:[#allocation31_spill]] %s3737_s5 }
   0x7   :  { %3769 = sst [smem:[#allocation32_spill]] %s3738_s6 }
   0x8   :  { %3770 = sst [smem:[#allocation33_spill]] %s3739_s7 }
   0x9   :  { %3771 = sst [smem:[#allocation34_spill]] %s3740_s8 }
   0xa   :  { %3772 = sst [smem:[#allocation35_spill]] %s3741_s9 }
   0xb   :  { %3773 = sst [smem:[#allocation36_spill]] %s3742_s10 }
   0xc   :  { %3774 = sst [smem:[#allocation37_spill]] %s3743_s11 }
   0xd   :  { %3775 = sst [smem:[#allocation38_spill]] %s3744_s12 }
   0xe   :  { %3776 = sst [smem:[#allocation39_spill]] %s3745_s13 }
   0xf   :  { %3777 = sst [smem:[#allocation40_spill]] %s3746_s14 }
  0x10   :  { %3778 = sst [smem:[#allocation41_spill]] %s3747_s15 }
  0x11   :  { %3779 = sst [smem:[#allocation42_spill]] %s3748_s16 }
  0x12   :  { %22 = vsyncpa [#allocation3], 0 }
  0x13   :  { %24 = vsyncpa [#allocation3 + $0x1], 0 }
  0x14   :  { %25 = vsyncpa [#allocation6], 0 }
  0x15   :  { %26 = vsyncpa [#allocation9], 0 }
  0x16   :  { %27 = vsyncpa [#allocation4], 0 }
  0x17   :  { %29 = vsyncpa [#allocation4 + $0x1], 0 }
  0x18   :  { %30 = vsyncpa [#allocation13], 0 }
  0x19   :  { %32 = vsyncpa [#allocation13 + $0x1], 0  ;;  %s3088_s21 = smov 0   ;;  %s3090_s22 = smov 0  }
  0x1a   :  { %s3092_s23 = smov 0   ;;  %s3094_s24 = smov 0  }
  0x1b   :  { %s3096_s25 = smov 0   ;;  %s3098_s26 = smov 0  }
  0x1c   :  { %s3100_s27 = smov 0   ;;  %s3102_s28 = smov 0  }
  0x1d   :  { %s3104_s29 = smov 0   ;;  %s3106_s30 = smov 0  }
  0x1e   :  { %s3108_s0 = smov 0  }
  0x1f LB: > { %3780 = sst [smem:[#allocation21_spill]] %s2934_s21  ;;  %s2131_s17 = sadd.s32 4294967295, %s2974_s0   ;;  %s2974_s0 = sphi %s3108_s0, %s38_s0   ;;  %s2970_s30 = sphi %s3106_s30, %s3834_s30   ;;  %s2966_s29 = sphi %s3104_s29, %s3833_s29   ;;  %s2962_s28 = sphi %s3102_s28, %s3832_s28   ;;  %s2958_s27 = sphi %s3100_s27, %s3831_s27   ;;  %s2954_s26 = sphi %s3098_s26, %s3830_s26   ;;  %s2950_s25 = sphi %s3096_s25, %s3829_s25   ;;  %s2946_s24 = sphi %s3094_s24, %s3828_s24   ;;  %s2942_s23 = sphi %s3092_s23, %s3827_s23   ;;  %s2938_s22 = sphi %s3090_s22, %s3826_s22   ;;  %s2934_s21 = sphi %s3088_s21, %s3825_s21  }
  0x20   : > { %3781 = sst [smem:[#allocation22_spill]] %s2938_s22  ;;  %s2132_s18 = sadd.s32 4294967294, %s2974_s0  }
  0x21   : > { %3782 = sst [smem:[#allocation23_spill]] %s2962_s28  ;;  %p98_p0 = scmp.ne.s32.totalorder %s2950_s25, %s2946_s24 }
  0x22   : > { %p3144_p1 = scmp.eq.s32.totalorder %s2131_s17, 0  ;;  %p396_p2 = scmp.ne.s32.totalorder %s2942_s23, %s2938_s22 }
  0x23   : > { %p397_p3 = scmp.eq.s32.totalorder %s2131_s17, 3  ;;  %p402_p5 = scmp.ne.s32.totalorder %s2938_s22, %s2934_s21 }
  0x24   : > { %s3783_s19 = scalar_select %p3144_p1, 1, 0 }
  0x25   : > { %p3152_p4 = por %p3144_p1, %p98_p0  ;;  %p3158_p6 = por %p397_p3, %p396_p2 }
  0x26   : > { %p403_p7 = scmp.eq.s32.totalorder %s2132_s18, 3  ;;  %p2133_p8 = scmp.ge.s32.totalorder %s2974_s0, 1 }
  0x27   : > { %s3784_s20 = scalar_select %p3152_p4, 1, 0 }
  0x28   : > { %s3785_s16 = scalar_select %p3158_p6, 1, 0 }
  0x29   : > { %p438_p9 = scmp.lt.s32.totalorder %s2974_s0, 5  ;;  %p3164_p10 = por %p403_p7, %p402_p5 }
  0x2a   : > { %3786 = sst [smem:[#allocation24_spill]] %s3785_s16  ;;  %s2976_s17 = smov [#allocation5]  }
  0x2b   : > { %s3787_s24 = scalar_select %p3164_p10, 1, 0 }
  0x2c   : > { %p3168_p11 = pnand %p2133_p8, %p438_p9  ;;  %s453_s14 = sshll.u32 %s2976_s17, 4  ;;  %s454_s14 = int_to_ptr.vmem [resolvable:$true] %s453_s14 }
  0x2d   : > { %3788 = sst [smem:[#allocation25_spill]] %s3787_s24  ;;  %s2977_s18 = smov [#allocation8]  }
  0x2e   : > { %s3789_s15 = scalar_select %p3168_p11, 1, 0 }
  0x2f   : > { %p2468_p12 = pneg %p3168_p11  ;;  %s479_s16 = sshll.u32 %s2977_s18, 4  ;;  %s3180_s16 = int_to_ptr.vmem [resolvable:$true] %s479_s16 }
  0x30   : > { %s3791_s3 = sld [smem:[#allocation29_spill]] }
  0x31   : > { %p3176_p13 = pnand %p2468_p12, %p3144_p1 }
  0x33   : > { %p3190_p2 = pneg %p3176_p13 }
  0x36   : > { %s2698_s12 = scalar_lea.hbm %s3791_s3, 512 }
  0x37   : > { %p2699_p0 = scmp.ne.s32.totalorder %s3791_s3, %s2698_s12  ;;  %p2705_p7 = scmp.lt.u32.totalorder %s2698_s12, %s3791_s3 }
  0x39   : > { %p2701_p3 = pnand %p3190_p2, %p2699_p0 }
  0x3b   : > { %p2702_p5 = pneg %p2701_p3 }
  0x3d   : > { %p2707_p8 = pnand %p2705_p7, %p2702_p5 }
  0x3f   : > { %2710 = shalt.err (!%p2707_p8)
}
  0x40   : > { %s2711_s13 = scalar_lea.vmem %s454_s14, 512  ;;  %p2719_p6 = scmp.lt.s32.totalorder %s454_s14, %s454_s14 }
  0x41   : > { %p2712_p9 = scmp.ne.s32.totalorder %s454_s14, %s2711_s13  ;;  %p2720_p1 = scmp.lt.s32.totalorder %s2711_s13, %s2711_s13 }
  0x43   : > { %p2714_p12 = pnand %p2712_p9, %p3190_p2  ;;  %p2721_p4 = por %p2720_p1, %p2719_p6 }
  0x45   : > { %p2715_p10 = pneg %p2714_p12 }
  0x47   : > { %p2722_p11 = pnand %p2721_p4, %p2715_p10 }
  0x49   : > { %2725 = shalt.err (!%p2722_p11)
}
  0x4a   : > { %s2978_s8 = smov 64   ;;  %s2979_s10 = smov 4  }
  0x4b   : > { %2471 = dma.hbm_to_vmem [thread:$0]  (!%p3176_p13), %s3791_s3, 512, %s454_s14, [#allocation6], %s2978_s8, %s2978_s8, %s2979_s10  }
  0x4c   : > { %s3793_s5 = sld [smem:[#allocation31_spill]] }
  0x52   : > { %s2726_s11 = scalar_lea.hbm %s3793_s5, 512 }
  0x53   : > { %p2727_p1 = scmp.ne.s32.totalorder %s3793_s5, %s2726_s11  ;;  %p2733_p10 = scmp.lt.u32.totalorder %s2726_s11, %s3793_s5 }
  0x55   : > { %p2729_p4 = pnand %p2727_p1, %p3190_p2 }
  0x57   : > { %p2730_p6 = pneg %p2729_p4 }
  0x59   : > { %p2735_p11 = pnand %p2733_p10, %p2730_p6 }
  0x5b   : > { %2738 = shalt.err (!%p2735_p11)
}
  0x5c   : > { %s2739_s14 = scalar_lea.vmem %s3180_s16, 512  ;;  %p2747_p7 = scmp.lt.s32.totalorder %s3180_s16, %s3180_s16 }
  0x5d   : > { %p2740_p0 = scmp.ne.s32.totalorder %s3180_s16, %s2739_s14  ;;  %p2748_p8 = scmp.lt.s32.totalorder %s2739_s14, %s2739_s14 }
  0x5f   : > { %p2742_p3 = pnand %p2740_p0, %p3190_p2  ;;  %p2749_p9 = por %p2748_p8, %p2747_p7 }
  0x61   : > { %p2743_p5 = pneg %p2742_p3 }
  0x63   : > { %p2750_p12 = pnand %p2749_p9, %p2743_p5 }
  0x65   : > { %2753 = shalt.err (!%p2750_p12)
}
  0x66   : > { %2477 = dma.hbm_to_vmem [thread:$0]  (!%p3176_p13), %s3793_s5, 512, %s3180_s16, [#allocation9], %s2978_s8, %s2978_s8, %s2979_s10  }
  0x67   : > { %s2980_s11 = smov [#allocation7]   ;;  %s2981_s7 = smov [#allocation10]  }
  0x68   : > { %s466_s22 = sshll.u32 %s2980_s11, 4  ;;  %s501_s12 = sshll.u32 %s2981_s7, 4  ;;  %s467_s22 = int_to_ptr.vmem [resolvable:$true] %s466_s22  ;;  %s502_s12 = int_to_ptr.vmem [resolvable:$true] %s501_s12 }
  0x69   : > { %s3794_s4 = sld [smem:[#allocation30_spill]] }
  0x6f   : > { %s2754_s13 = scalar_lea.hbm %s3794_s4, 512 }
  0x70   : > { %p2755_p1 = scmp.ne.s32.totalorder %s3794_s4, %s2754_s13  ;;  %p2761_p10 = scmp.lt.u32.totalorder %s2754_s13, %s3794_s4 }
  0x72   : > { %p2757_p4 = pnand %p2755_p1, %p3190_p2 }
  0x74   : > { %p2758_p6 = pneg %p2757_p4 }
  0x76   : > { %p2763_p11 = pnand %p2761_p10, %p2758_p6 }
  0x78   : > { %2766 = shalt.err (!%p2763_p11)
}
  0x79   : > { %s2767_s16 = scalar_lea.vmem %s467_s22, 512  ;;  %p2775_p7 = scmp.lt.s32.totalorder %s467_s22, %s467_s22 }
  0x7a   : > { %p2768_p0 = scmp.ne.s32.totalorder %s467_s22, %s2767_s16  ;;  %p2776_p8 = scmp.lt.s32.totalorder %s2767_s16, %s2767_s16 }
  0x7c   : > { %p2770_p3 = pnand %p2768_p0, %p3190_p2  ;;  %p2777_p9 = por %p2776_p8, %p2775_p7 }
  0x7e   : > { %p2771_p5 = pneg %p2770_p3 }
  0x80   : > { %p2778_p12 = pnand %p2777_p9, %p2771_p5 }
  0x82   : > { %2781 = shalt.err (!%p2778_p12)
}
  0x83   : > { %2474 = dma.hbm_to_vmem [thread:$0]  (!%p3176_p13), %s3794_s4, 512, %s467_s22, [#allocation6], %s2978_s8, %s2978_s8, %s2979_s10  }
  0x84   : > { %s3795_s9 = sld [smem:[#allocation35_spill]] }
  0x8a   : > { %s2782_s7 = scalar_lea.hbm %s3795_s9, 512 }
  0x8b   : > { %p2783_p1 = scmp.ne.s32.totalorder %s3795_s9, %s2782_s7  ;;  %p2789_p10 = scmp.lt.u32.totalorder %s2782_s7, %s3795_s9 }
  0x8d   : > { %p2785_p4 = pnand %p2783_p1, %p3190_p2 }
  0x8f   : > { %p2786_p6 = pneg %p2785_p4 }
  0x91   : > { %p2791_p11 = pnand %p2789_p10, %p2786_p6 }
  0x93   : > { %2794 = shalt.err (!%p2791_p11)
}
  0x94   : > { %s2795_s2 = scalar_lea.vmem %s502_s12, 512  ;;  %p2803_p7 = scmp.lt.s32.totalorder %s502_s12, %s502_s12 }
  0x95   : > { %p2796_p0 = scmp.ne.s32.totalorder %s502_s12, %s2795_s2  ;;  %p2804_p8 = scmp.lt.s32.totalorder %s2795_s2, %s2795_s2 }
  0x97   : > { %p2798_p3 = pnand %p2796_p0, %p3190_p2  ;;  %p2805_p9 = por %p2804_p8, %p2803_p7 }
  0x99   : > { %p2799_p5 = pneg %p2798_p3 }
  0x9b   : > { %p2806_p12 = pnand %p2805_p9, %p2799_p5 }
  0x9d   : > { %2809 = shalt.err (!%p2806_p12)
}
  0x9e   : > { %2480 = dma.hbm_to_vmem [thread:$0]  (!%p3176_p13), %s3795_s9, 512, %s502_s12, [#allocation9], %s2978_s8, %s2978_s8, %s2979_s10  }
  0x9f   : > { %s47_s21 = sadd.s32 1, %s2966_s29  ;;  %s50_s17 = sadd.s32 1, %s2970_s30 }
  0xa0   : > { %p48_p2 = scmp.ge.s32.totalorder %s47_s21, 2  ;;  %s85_s3 = sadd.s32 1, %s2954_s26 }
  0xa1   : > { %p92_p1 = scmp.ne.s32.totalorder %s2954_s26, %s2950_s25  ;;  %p93_p4 = scmp.eq.s32.totalorder %s2974_s0, 0 }
  0xa2   : > { %s3836_s21 = smov (%p48_p2, %s47_s21), 0  ;;  %s3838_s17 = smov (!%p48_p2, %s50_s17), %s2970_s30 }
  0xa3   : > { %s382_s28 = ssub.s32 %s2966_s29, %s3836_s21  ;;  %p52_p6 = scmp.ge.s32.totalorder %s3838_s17, 2 }
  0xa4   : > { %s386_s6 = sadd.s32 1, %s2942_s23  ;;  %p3289_p10 = por %p93_p4, %p92_p1 }
  0xa5   : > { %p2496_p13 = scmp.lt.s32.totalorder %s2974_s0, 4  ;;  %s3840_s17 = smov (%p52_p6, %s3838_s17), 0 }
  0xa6   : > { %s543_s10 = sand.u32 1, %s2954_s26   ;;  %s2227_s12 = sshll.u32 %s2970_s30, 9 }
  0xa7   : > { %s82_s11 = ssub.s32 %s2970_s30, %s3840_s17  ;;  %s2139_s24 = sshll.u32 %s543_s10, 5 }
  0xa8   : > { %p83_p11 = scmp.eq.s32.totalorder %s82_s11, 0  ;;  %s383_s7 = sor.u32 %s382_s28, %s82_s11 }
  0xa9   : > { %p384_p0 = scmp.eq.s32.totalorder %s383_s7, 0  ;;  %s3797_s1 = sld [smem:[#allocation27_spill]] }
  0xaa   : > { %s3301_s18 = scalar_select %p83_p11, %s2954_s26, %s85_s3  }
  0xab   : > { %s3304_s13 = scalar_select %p384_p0, %s2942_s23, %s386_s6  }
  0xac   : > { %s547_s16 = scalar_lea.vmem [#allocation2], %s2139_s24  ;;  %p3315_p3 = pnand %p2496_p13, %p3289_p10 }
  0xad   : > { %s554_s4 = sshll.u32 %s547_s16, 4  ;;  %s3321_s3 = scalar_lea.sflag [#allocation3], %s543_s10  ;;  %s3319_s4 = int_to_ptr.vmem [resolvable:$true] %s554_s4 }
  0xae   : > { %p2812_p7 = pneg %p3315_p3 }
  0xaf   : > { %s3309_s22 = scalar_lea.hbm %s3797_s1, %s2227_s12  ;;  %s2815_s11 = scalar_lea.hbm %s3797_s1, 1024 }
  0xb0   : > { %s2810_s6 = scalar_lea.hbm %s3309_s22, 512  ;;  %p2816_p12 = scmp.lt.u32.totalorder %s3309_s22, %s3797_s1 }
  0xb1   : > { %p2811_p5 = scmp.ne.s32.totalorder %s3309_s22, %s2810_s6  ;;  %p2817_p2 = scmp.lt.u32.totalorder %s2815_s11, %s2810_s6 }
  0xb2   : > { %p2819_p4 = scmp.lt.u32.totalorder %s2810_s6, %s3309_s22 }
  0xb3   : > { %p2813_p8 = pnand %p2812_p7, %p2811_p5  ;;  %p2818_p1 = por %p2817_p2, %p2816_p12 }
  0xb5   : > { %p2814_p9 = pneg %p2813_p8  ;;  %p2820_p6 = por %p2819_p4, %p2818_p1 }
  0xb7   : > { %p2821_p10 = pnand %p2820_p6, %p2814_p9 }
  0xb9   : > { %2824 = shalt.err (!%p2821_p10)
}
  0xba   : > { %s2825_s10 = scalar_lea.vmem %s3319_s4, 512  ;;  %s2982_s14 = smov [#allocation2]  }
  0xbb   : > { %p2826_p13 = scmp.ne.s32.totalorder %s3319_s4, %s2825_s10  ;;  %s2830_s2 = sshll.u32 %s2982_s14, 4  ;;  %s2831_s2 = int_to_ptr.vmem [resolvable:$false] %s2830_s2 }
  0xbc   : > { %s2832_s16 = scalar_lea.vmem %s2831_s2, 1024  ;;  %p2833_p5 = scmp.lt.s32.totalorder %s3319_s4, %s2831_s2 }
  0xbd   : > { %p2828_p11 = pnand %p2826_p13, %p2812_p7  ;;  %p2834_p8 = scmp.lt.s32.totalorder %s2832_s16, %s2825_s10 }
  0xbf   : > { %p2829_p0 = pneg %p2828_p11  ;;  %p2835_p12 = por %p2834_p8, %p2833_p5 }
  0xc1   : > { %p2836_p2 = pnand %p2835_p12, %p2829_p0 }
  0xc3   : > { %2839 = shalt.err (!%p2836_p2)
}
  0xc4   : > { %s2983_s6 = smov 128   ;;  %s2984_s8 = smov 8  }
  0xc5   : > { %2484 = dma.hbm_to_vmem [thread:$0]  (!%p3315_p3), %s3309_s22, 512, %s3319_s4, %s3321_s3, %s2983_s6, %s2983_s6, %s2984_s8  }
  0xc6   : > { %p3799_p7 = scmp.ne.s32.totalorder %s3789_s15, 0 }
  0xc7   : > { %s568_s12 = sand.u32 (!%p3799_p7), 1, %s2950_s25   ;;  %p3800_p9 = scmp.ne.s32.totalorder (!%p3799_p7), %s3784_s20, 0 }
  0xc8   : > { %566 = sbr.rel (%p3799_p7) target bundleno = 3873 (0xf21), region = 80  ;;  %s2143_s11 = sshll.u32 (!%p3799_p7), %s568_s12, 5 }
  0xc9   : > { %s569_s7 = scalar_lea.sflag (!%p3799_p7), [#allocation3], %s568_s12  ;;  %s3352_s24 = scalar_lea.vmem (!%p3799_p7), [#allocation2], %s2143_s11 }
  0xcf   : > { %2913 = dma.done.wait (%p3800_p9), %s569_s7, 512  }
  0xd0   : > { %2915 = vsyncadd (%p3800_p9), %s569_s7, 4294966784  ;;  %p3801_p1 = scmp.ne.s32.totalorder %s3783_s19, 0 }
  0xd2   : > { %2917 = dma.done.wait (%p3801_p1), [#allocation6], 1024  }
  0xd3   : > { %2919 = vsyncadd (%p3801_p1), [#allocation6], 4294966272 }
  0xd4   : > { %2921 = dma.done.wait (%p3801_p1), [#allocation9], 1024  }
  0xd5   : > { %2923 = vsyncadd (%p3801_p1), [#allocation9], 4294966272  ;;  %s3802_s4 = sld [smem:[#allocation23_spill]]  ;;  %s3367_s15 = sshll.u32 %s2958_s27, 1  ;;  %v2985_v0 = vmov 0.0   ;;  %vm2986_vm0 = vmmov 0  }
  0xd6   : > { %2296 = vmatprep.subr.bf16.mxu1 %v2985_v0  ;;  %2304 = vmatprep.mubr.msk.bf16.mxu1 %vm2986_vm0, %v2985_v0  ;;  %p654_p4 = scmp.lt.s32.totalorder %s3367_s15, 3  ;;  %s3803_s27 = sld [smem:[#allocation28_spill]]  ;;  %v667_v6 = vld [vmem:[%s3352_s24] sm:$0xff]  ;;  %vm705_vm1 = vcmask 523264   ;;  %v668_v9 = vld [vmem:[%s3352_s24 + $0x8] sm:$0xff]  ;;  %v2636_v13 = vld [vmem:[#allocation5 + $0x10] sm:$0xff]  }
  0xd7   : > { %s3805_s11 = sld [smem:[#allocation26_spill]]  ;;  %v2634_v8 = vld [vmem:[#allocation5] sm:$0xff]   ;;  %v671_v10 = vpack.c.bf16 %v668_v9, %v667_v6  ;;  %v2635_v12 = vld [vmem:[#allocation5 + $0x8] sm:$0xff]   ;;  %v2637_v14 = vld [vmem:[#allocation5 + $0x18] sm:$0xff]   ;;  %vm925_vm2 = vcmask 130048   ;;  %vm976_vm3 = vcmask 261120  }
  0xd8   : > { %s655_s19 = scalar_select %p654_p4, %s3367_s15, 3  ;;  %v669_v15 = vld [vmem:[%s3352_s24 + $0x10] sm:$0xff]  ;;  %v670_v16 = vld [vmem:[%s3352_s24 + $0x18] sm:$0xff]  ;;  %v2638_v33 = vld [vmem:[#allocation7] sm:$0xff]   ;;  %vm1007_vm4 = vcmask 257024   ;;  %vm1504_vm5 = vcmask 392192  }
  0xd9   : > { %2328 = vmatprep.mubr.msk.bf16.mxu0 %vm705_vm1, %v671_v10  ;;  %v672_v17 = vpack.c.bf16 %v670_v16, %v669_v15  ;;  %2320 = vmatprep.subr.bf16.mxu0 %v2638_v33  ;;  %v2639_v34 = vld [vmem:[#allocation7 + $0x8] sm:$0xff]   ;;  %v2640_v35 = vld [vmem:[#allocation7 + $0x10] sm:$0xff]   ;;  %v2641_v36 = vld [vmem:[#allocation7 + $0x18] sm:$0xff]   ;;  %s3806_s24 = sld [smem:[#allocation22_spill]]  ;;  %s2988_s10 = smov 96  }
  0xda   : > { %2321 = vmatpush3.bf16.msra.mxu0 %v2638_v33  ;;  %s2990_s8 = smov 16   ;;  %s2991_s12 = smov 32  }
  0xdb   : > { %p652_p3 = scmp.lt.s32.totalorder %s3802_s4, 1  ;;  %2322 = vmatprep.subr.bf16.mxu0 %v2639_v34  ;;  %s3812_s3 = sld [smem:[#allocation36_spill]] }
  0xdc   : > { %s3804_s14 = smov %s3803_s27  ;;  %v2630_v1 = vld [vmem:[%s3803_s27] sm:$0xff]  }
  0xdd   : > { %s653_s20 = scalar_select %p652_p3, %s3802_s4, 1  ;;  %2297 = vmatpush3.bf16.msra.mxu1 %v2630_v1  ;;  %v2631_v2 = vld [vmem:[%s3804_s14 + $0x8] sm:$0xff]   ;;  %v2632_v3 = vld [vmem:[%s3804_s14 + $0x10] sm:$0xff]   ;;  %v2633_v4 = vld [vmem:[%s3804_s14 + $0x18] sm:$0xff]  }
  0xde   : > { %2298 = vmatprep.subr.bf16.mxu1 %v2985_v0  ;;  %2323 = vmatpush3.bf16.msra.mxu0 %v2639_v34 }
  0xdf   : > { %s2151_s22 = sshll.u32 %s653_s20, 2  ;;  %2324 = vmatprep.subr.bf16.mxu0 %v2640_v35  ;;  %s3471_s27 = sand.u32 1, %s3806_s24  }
  0xe0   : > { %s657_s28 = sadd.s32 %s2151_s22, %s655_s19  ;;  %s2149_s2 = sshll.u32 %s3471_s27, 5 }
  0xe1   : > { %s2152_s6 = sshll.u32 %s657_s28, 3  ;;  %2299 = vmatpush3.bf16.msra.mxu1 %v2631_v2  ;;  %s2987_s28 = smov 112  }
  0xe2   : > { %s659_s7 = scalar_lea.vmem %s3805_s11, %s2152_s6  ;;  %2300 = vmatprep.subr.bf16.mxu1 %v2985_v0  ;;  %2325 = vmatpush3.bf16.msra.mxu0 %v2640_v35  ;;  %s3474_s16 = scalar_lea.vmem [#allocation12], %s2149_s2 }
  0xe3   : > { %v3393_v5 = vld [vmem:[%s659_s7] sm:$0xff]  ;;  %v3396_v7 = vld [vmem:[%s659_s7 + $0x8] sm:$0xff]  ;;  %2326 = vmatprep.subr.bf16.mxu0 %v2641_v36  ;;  %s2989_s6 = smov 80   ;;  %s2992_s11 = smov 48  }
  0xe4   : > { %v666_v11 = vpack.c.bf16 %v3396_v7, %v3393_v5  ;;  %s3807_s19 = sld [smem:[#allocation32_spill]]  ;;  %s3810_s24 = sld [smem:[#allocation33_spill]] }
  0xe5   : > { %2301 = vmatpush3.bf16.msra.mxu1 %v2632_v3  ;;  %s3813_s2 = sld [smem:[#allocation38_spill]]  ;;  %s3814_s7 = sld [smem:[#allocation39_spill]] }
  0xe6   : > { %2302 = vmatprep.subr.bf16.mxu1 %v2985_v0  ;;  %2327 = vmatpush3.bf16.msra.mxu0 %v2641_v36 }
  0xe7   : > { %2340 = vmatprep.subr.bf16.mxu0 %v2985_v0 }
  0xe9   : > { %2303 = vmatpush3.bf16.msra.mxu1 %v2633_v4  ;;  %2329 = vmatmul.mubr.msk.bf16.vlgmr.msra.gmra.mrb[0].mxu0 %vm705_vm1, %v672_v17 }
  0xea   : > { %2308 = vmatprep.subr.bf16.mxu1 %v2634_v8  ;;  %2344 = vmatprep.mubr.msk.bf16.mxu0 %vm2986_vm0, %v2985_v0 }
  0xec   : > { %2305 = vmatmul.mubr.msk.bf16.vlgmr.msra.gmra.mrb[0].mxu1 %vm705_vm1, %v666_v11 }
  0xed   : > { %2309 = vmatpush3.bf16.msra.mxu1 %v2634_v8  ;;  %2316 = vmatprep.mubr.msk.bf16.mxu1 %vm705_vm1, %v671_v10 }
  0xee   : > { %2310 = vmatprep.subr.bf16.mxu1 %v2635_v12 }
  0xf1   : > { %2311 = vmatpush3.bf16.msra.mxu1 %v2635_v12 }
  0xf2   : > { %2312 = vmatprep.subr.bf16.mxu1 %v2636_v13 }
  0xf5   : > { %2313 = vmatpush3.bf16.msra.mxu1 %v2636_v13 }
  0xf6   : > { %2314 = vmatprep.subr.bf16.mxu1 %v2637_v14 }
  0xf9   : > { %2315 = vmatpush3.bf16.msra.mxu1 %v2637_v14 }
  0xfa   : > { %2332 = vmatprep.subr.bf16.mxu1 %v2985_v0 }
  0xfc   : > { %2317 = vmatmul.mubr.msk.bf16.vlgmr.msra.gmra.mrb[4].mxu1 %vm705_vm1, %v672_v17 }
  0xfd   : > { %2336 = vmatprep.mubr.msk.bf16.mxu1 %vm2986_vm0, %v2985_v0 }
 0x1bc   : > { %v2330_v48 = vpop.f32.mrb[0].mxu0 }
 0x1bd   : > { %v903_v49 = vpop.f32.mrb[1].mxu0 }
 0x1be   : > { %v2331_v50 = vpop.f32.mrb[2].mxu0 }
 0x1bf   : > { %v743_v18 = vpop.f32.mrb[0].mxu1  ;;  %v3446_v51 = vpack.c.bf16 %v2331_v50, %v2330_v48  ;;  %v906_v52 = vpop.f32.mrb[3].mxu0 }
 0x1c0   : > { %v918_v19 = vmul.f32 0.25, %v743_v18  ;;  %v2306_v20 = vpop.f32.mrb[1].mxu1  ;;  %v3448_v53 = vpack.c.bf16 %v906_v52, %v903_v49 }
 0x1c1   : > { %v746_v21 = vpop.f32.mrb[2].mxu1 }
 0x1c2   : > { %v919_v22 = vmul.f32 0.25, %v746_v21  ;;  %v2307_v23 = vpop.f32.mrb[3].mxu1  ;;  %2341 = vmatpush3.bf16.msra.mxu0 %v3448_v53 }
 0x1c3   : > { %2342 = vmatprep.subr.bf16.mxu0 %v2985_v0 }
 0x1c4   : > { %v3411_v24 = vpack.c.bf16 %v919_v22, %v918_v19 }
 0x1c6   : > { %1055 = vrot.lane.b32.xlu1 %v3411_v24, %s2987_s28  ;;  %2343 = vmatpush3.bf16.msra.mxu0 %v3446_v51 }
 0x1c7   : > { %2356 = vmatprep.subr.bf16.mxu0 %v2985_v0 }
 0x1cf   : > { %v2318_v25 = vpop.f32.mrb[4].mxu1 }
 0x1d0   : > { %v822_v26 = vpop.f32.mrb[5].mxu1 }
 0x1d1   : > { %v2319_v27 = vpop.f32.mrb[6].mxu1 }
 0x1d2   : > { %v3415_v28 = vpack.c.bf16 %v2319_v27, %v2318_v25  ;;  %v825_v29 = vpop.f32.mrb[7].mxu1 }
 0x1d3   : > { %v3417_v30 = vpack.c.bf16 %v825_v29, %v822_v26 }
 0x1d4   : > { %v933_v32 = vsel %vm925_vm2, %v3415_v28, 0 }
 0x1d5   : > { %1059 = vrot.lane.b32.xlu0 %v3417_v30, %s2987_s28  ;;  %v930_v31 = vsel %vm925_vm2, %v3417_v30, 0 }
 0x1d6   : > { %2333 = vmatpush3.bf16.xpose.msra.mxu1 %v930_v31 }
 0x1d7   : > { %2334 = vmatprep.subr.bf16.mxu1 %v2985_v0 }
 0x1d9   : > { %1061 = vrot.lane.b32.xlu0 %v3415_v28, %s2987_s28 }
 0x1de   : > { %2335 = vmatpush3.bf16.xpose.msra.mxu1 %v933_v32 }
 0x1df   : > { %2348 = vmatprep.subr.bf16.mxu1 %v2985_v0 }
 0x1e5   : > { %2337 = vmatmul.mubr.msk.bf16.vlgmr.msra.gmra.mrb[8].mxu1 %vm925_vm2, %v3411_v24 }
 0x1e6   : > { %2352 = vmatprep.mubr.msk.bf16.mxu1 %vm2986_vm0, %v2985_v0 }
 0x238   : > { %v1056_v41 = vpop.permute.xlu1 %1055 }
 0x247   : > { %v1060_v37 = vpop.permute.xlu0 %1059 }
 0x248   : > { %v1067_v38 = vsel %vm925_vm2, %v1060_v37, 0 }
 0x249   : > { %2349 = vmatpush3.bf16.xpose.msra.mxu1 %v1067_v38 }
 0x24a   : > { %2350 = vmatprep.subr.bf16.mxu1 %v2985_v0 }
 0x24b   : > { %v1062_v39 = vpop.permute.xlu0 %1061 }
 0x24c   : > { %v1070_v40 = vsel %vm925_vm2, %v1062_v39, 0 }
 0x251   : > { %2351 = vmatpush3.bf16.xpose.msra.mxu1 %v1070_v40 }
 0x252   : > { %2372 = vmatprep.subr.bf16.mxu1 %v2985_v0 }
 0x258   : > { %2353 = vmatmul.mubr.msk.bf16.vlgmr.msra.gmra.mrb[12].mxu1 %vm925_vm2, %v1056_v41 }
 0x259   : > { %2376 = vmatprep.mubr.msk.bf16.mxu1 %vm2986_vm0, %v2985_v0 }
 0x2b8   : > { %v969_v42 = vpop.f32.mrb[8].mxu1 }
 0x2b9   : > { %v2338_v43 = vpop.f32.mrb[9].mxu1  ;;  %v977_v44 = vsel %vm976_vm3, %v969_v42, -inf }
 0x2ba   : > { %978 = vmax.xlane.f32.xlu1 %v977_v44  ;;  %v972_v45 = vpop.f32.mrb[10].mxu1 }
 0x2bb   : > { %v2339_v46 = vpop.f32.mrb[11].mxu1  ;;  %v980_v47 = vsel %vm976_vm3, %v972_v45, -inf }
 0x2bc   : > { %981 = vmax.xlane.f32.xlu0 %v980_v47 }
 0x32b   : > { %v1106_v54 = vpop.f32.mrb[12].mxu1 }
 0x32c   : > { %v2354_v55 = vpop.f32.mrb[13].mxu1  ;;  %v1113_v56 = vsel %vm976_vm3, %v1106_v54, -inf }
 0x32d   : > { %1114 = vmax.xlane.f32.xlu0 %v1113_v56  ;;  %v1109_v57 = vpop.f32.mrb[14].mxu1 }
 0x32e   : > { %v2355_v58 = vpop.f32.mrb[15].mxu1  ;;  %v1116_v59 = vsel %vm976_vm3, %v1109_v57, -inf }
 0x32f   : > { %1117 = vmax.xlane.f32.xlu1 %v1116_v59 }
 0x347   : > { %v979_v60 = vpop.xlane.xlu1 %978 }
 0x348   : > { %v983_v61 = vsub.f32 %v969_v42, %v979_v60 }
 0x349   : > { %v982_v62 = vpop.xlane.xlu0 %981 }
 0x34a   : > { %v985_v63 = vmul.f32 1.442695, %v983_v61  ;;  %v984_v1 = vsub.f32 %v972_v45, %v982_v62 }
 0x34c   : > { %2658 = vpow2.f32 %v985_v63  ;;  %v987_v2 = vmul.f32 1.442695, %v984_v1 }
 0x34e   : > { %2660 = vpow2.f32 %v987_v2 }
 0x356   : > { %v2659_v3 = vpop.eup %2658 }
 0x357   : > { %v989_v4 = vsel %vm976_vm3, %v2659_v3, 0.0 }
 0x358   : > { %v2661_v6 = vpop.eup %2660  ;;  %990 = vadd.xlane.f32.xlu0 %v989_v4 }
 0x359   : > { %v992_v8 = vsel %vm976_vm3, %v2661_v6, 0.0 }
 0x35a   : > { %993 = vadd.xlane.f32.xlu1 %v992_v8 }
 0x36b   : > { %1150 = vrot.lane.b32.xlu1 %v3446_v51, %s2987_s28 }
 0x3ba   : > { %v1115_v9 = vpop.xlane.xlu0 %1114 }
 0x3bb   : > { %v1119_v10 = vsub.f32 %v1106_v54, %v1115_v9 }
 0x3bc   : > { %v1118_v11 = vpop.xlane.xlu1 %1117 }
 0x3bd   : > { %v1121_v12 = vmul.f32 1.442695, %v1119_v10  ;;  %v1120_v13 = vsub.f32 %v1109_v57, %v1118_v11 }
 0x3bf   : > { %2662 = vpow2.f32 %v1121_v12  ;;  %v1123_v14 = vmul.f32 1.442695, %v1120_v13 }
 0x3c1   : > { %2664 = vpow2.f32 %v1123_v14 }
 0x3c9   : > { %v2663_v15 = vpop.eup %2662 }
 0x3ca   : > { %v1125_v16 = vsel %vm976_vm3, %v2663_v15, 0.0 }
 0x3cb   : > { %v2665_v17 = vpop.eup %2664  ;;  %1126 = vadd.xlane.f32.xlu0 %v1125_v16 }
 0x3cc   : > { %v1128_v18 = vsel %vm976_vm3, %v2665_v17, 0.0 }
 0x3cd   : > { %1129 = vadd.xlane.f32.xlu1 %v1128_v18 }
 0x3de   : > { %1200 = vrot.lane.b32.xlu1 %v3417_v30, %s2988_s10 }
 0x3e1   : > { %1148 = vrot.lane.b32.xlu0 %v3448_v53, %s2987_s28  ;;  %s3808_s28 = sld [smem:[#allocation37_spill]] }
 0x3e2   : > { %1198 = vrot.lane.b32.xlu1 %v3411_v24, %s2988_s10 }
 0x3e5   : > { %1202 = vrot.lane.b32.xlu0 %v3415_v28, %s2988_s10  ;;  %v991_v19 = vpop.xlane.xlu0 %990 }
 0x3e6   : > { %2666 = vrcp.f32 %v991_v19 }
 0x3e7   : > { %v994_v20 = vpop.xlane.xlu1 %993 }
 0x3e8   : > { %2668 = vrcp.f32 %v994_v20 }
 0x3eb   : > { %v1151_v31 = vpop.permute.xlu1 %1150 }
 0x3f0   : > { %v2667_v21 = vpop.eup %2666 }
 0x3f1   : > { %v997_v22 = vmul.f32 %v2667_v21, %v2659_v3 }
 0x3f2   : > { %v2669_v23 = vpop.eup %2668 }
 0x3f3   : > { %v2228_v25 = vpack.c.bf16 %v997_v22, %v997_v22  ;;  %v998_v26 = vmul.f32 %v2669_v23, %v2661_v6 }
 0x3f5   : > { %v2229_v27 = vpack.c.bf16 %v998_v26, %v998_v26  ;;  %v999_v29 = vpack.c.bf16 %v998_v26, %v997_v22  ;;  %1008 = vst.msk [vmem:[%s3474_s16] sm:$0xf] %vm1007_vm4, %v2228_v25 }
 0x3f7   : > { %2345 = vmatmul.mubr.msk.bf16.vlgmr.msra.gmra.mrb[4].mxu0 %vm976_vm3, %v999_v29  ;;  %1009 = vst.msk [vmem:[%s3474_s16 + $0x4] sm:$0xf] %vm1007_vm4, %v2229_v27 }
 0x3f8   : > { %2360 = vmatprep.mubr.msk.bf16.mxu0 %vm2986_vm0, %v2985_v0 }
 0x458   : > { %v1127_v32 = vpop.xlane.xlu0 %1126 }
 0x459   : > { %2670 = vrcp.f32 %v1127_v32 }
 0x45a   : > { %v1130_v33 = vpop.xlane.xlu1 %1129 }
 0x45b   : > { %2672 = vrcp.f32 %v1130_v33 }
 0x45c   : > { %v1149_v34 = vpop.permute.xlu0 %1148 }
 0x45d   : > { %2357 = vmatpush3.bf16.msra.mxu0 %v1149_v34 }
 0x45e   : > { %2358 = vmatprep.subr.bf16.mxu0 %v2985_v0  ;;  %v1201_v40 = vpop.permute.xlu1 %1200 }
 0x45f   : > { %v1208_v43 = vsel %vm925_vm2, %v1201_v40, 0 }
 0x460   : > { %v1203_v44 = vpop.permute.xlu0 %1202 }
 0x461   : > { %2359 = vmatpush3.bf16.msra.mxu0 %v1151_v31  ;;  %v1211_v45 = vsel %vm925_vm2, %v1203_v44, 0 }
 0x462   : > { %2364 = vmatprep.subr.bf16.mxu0 %v2985_v0  ;;  %v1199_v46 = vpop.permute.xlu1 %1198 }
 0x463   : > { %v2671_v35 = vpop.eup %2670 }
 0x464   : > { %v1133_v36 = vmul.f32 %v2671_v35, %v2663_v15 }
 0x465   : > { %v2673_v37 = vpop.eup %2672 }
 0x466   : > { %v2230_v38 = vpack.c.bf16 %v1133_v36, %v1133_v36  ;;  %v1134_v39 = vmul.f32 %v2673_v37, %v2665_v17 }
 0x468   : > { %v2231_v41 = vpack.c.bf16 %v1134_v39, %v1134_v39  ;;  %v1135_v42 = vpack.c.bf16 %v1134_v39, %v1133_v36  ;;  %2177 = vst.msk [vmem:[%s3474_s16 + $0x8] sm:$0xf] %vm1007_vm4, %v2230_v38 }
 0x46a   : > { %2361 = vmatmul.mubr.msk.bf16.vlgmr.msra.gmra.mrb[8].mxu0 %vm976_vm3, %v1135_v42  ;;  %2178 = vst.msk [vmem:[%s3474_s16 + $0xc] sm:$0xf] %vm1007_vm4, %v2231_v41 }
 0x46b   : > { %2365 = vmatpush3.bf16.xpose.msra.mxu0 %v1208_v43  ;;  %2368 = vmatprep.mubr.msk.bf16.mxu0 %vm2986_vm0, %v2985_v0 }
 0x46c   : > { %2366 = vmatprep.subr.bf16.mxu0 %v2985_v0 }
 0x473   : > { %2367 = vmatpush3.bf16.xpose.msra.mxu0 %v1211_v45 }
 0x474   : > { %2388 = vmatprep.subr.bf16.mxu0 %v2985_v0 }
 0x47a   : > { %2369 = vmatmul.mubr.msk.bf16.vlgmr.msra.gmra.mrb[12].mxu0 %vm925_vm2, %v1199_v46 }
 0x47b   : > { %2392 = vmatprep.mubr.msk.bf16.mxu0 %vm2986_vm0, %v2985_v0 }
 0x4ca   : > { %v3499_v47 = vpop.f32.mrb[4].mxu0 }
 0x4cb   : > { %v2346_v48 = vpop.f32.mrb[5].mxu0 }
 0x4cc   : > { %v3501_v49 = vpop.f32.mrb[6].mxu0 }
 0x4cd   : > { %v2347_v50 = vpop.f32.mrb[7].mxu0 }
 0x53d   : > { %v3503_v52 = vpop.f32.mrb[8].mxu0 }
 0x53e   : > { %v2362_v54 = vpop.f32.mrb[9].mxu0 }
 0x53f   : > { %v3505_v55 = vpop.f32.mrb[10].mxu0 }
 0x540   : > { %v2615_v56 = vpack.i.bf16 %v3505_v55, %v3503_v52  ;;  %v2363_v57 = vpop.f32.mrb[11].mxu0 }
 0x54d   : > { %v1247_v58 = vpop.f32.mrb[12].mxu0 }
 0x54e   : > { %v2370_v59 = vpop.f32.mrb[13].mxu0  ;;  %v1254_v60 = vsel %vm976_vm3, %v1247_v58, -inf }
 0x54f   : > { %1255 = vmax.xlane.f32.xlu0 %v1254_v60  ;;  %v1250_v61 = vpop.f32.mrb[14].mxu0 }
 0x550   : > { %v2371_v62 = vpop.f32.mrb[15].mxu0  ;;  %v1257_v63 = vsel %vm976_vm3, %v1250_v61, -inf }
 0x551   : > { %1258 = vmax.xlane.f32.xlu1 %v1257_v63  ;;  %v2642_v63 = vld [vmem:[#allocation8] sm:$0xff]  }
 0x562   : > { %1287 = vrot.lane.b32.xlu1 %v3448_v53, %s2988_s10 }
 0x566   : > { %1339 = vrot.lane.b32.xlu1 %v3417_v30, %s2989_s6 }
 0x56a   : > { %1341 = vrot.lane.b32.xlu1 %v3415_v28, %s2989_s6 }
 0x5dc   : > { %v1256_v1 = vpop.xlane.xlu0 %1255 }
 0x5dd   : > { %v1260_v2 = vsub.f32 %v1247_v58, %v1256_v1  ;;  %v2643_v1 = vld [vmem:[#allocation8 + $0x8] sm:$0xff]  }
 0x5de   : > { %v1259_v3 = vpop.xlane.xlu1 %1258 }
 0x5df   : > { %v1262_v4 = vmul.f32 1.442695, %v1260_v2  ;;  %v1261_v6 = vsub.f32 %v1250_v61, %v1259_v3  ;;  %v2644_v2 = vld [vmem:[#allocation8 + $0x10] sm:$0xff]   ;;  %v2645_v3 = vld [vmem:[#allocation8 + $0x18] sm:$0xff]  }
 0x5e1   : > { %2674 = vpow2.f32 %v1262_v4  ;;  %v1264_v8 = vmul.f32 1.442695, %v1261_v6 }
 0x5e2   : > { %v1288_v9 = vpop.permute.xlu1 %1287 }
 0x5e3   : > { %2676 = vpow2.f32 %v1264_v8  ;;  %2373 = vmatpush3.bf16.msra.mxu1 %v1288_v9 }
 0x5e4   : > { %2374 = vmatprep.subr.bf16.mxu1 %v2985_v0 }
 0x5e6   : > { %v1340_v20 = vpop.permute.xlu1 %1339 }
 0x5ea   : > { %v1342_v23 = vpop.permute.xlu1 %1341 }
 0x5eb   : > { %v2675_v10 = vpop.eup %2674  ;;  %v1350_v25 = vsel %vm925_vm2, %v1342_v23, 0 }
 0x5ec   : > { %v1266_v11 = vsel %vm976_vm3, %v2675_v10, 0.0 }
 0x5ed   : > { %v2677_v12 = vpop.eup %2676  ;;  %1267 = vadd.xlane.f32.xlu0 %v1266_v11 }
 0x5ee   : > { %v1269_v30 = vsel %vm976_vm3, %v2677_v12, 0.0 }
 0x5f1   : > { %1270 = vadd.xlane.f32.xlu0 %v1269_v30 }
 0x607   : > { %1289 = vrot.lane.b32.xlu0 %v3446_v51, %s2988_s10  ;;  %s3809_s10 = smov %s3808_s28 }
 0x60b   : > { %1337 = vrot.lane.b32.xlu0 %v3411_v24, %s2989_s6  ;;  %v1347_v24 = vsel %vm925_vm2, %v1340_v20, 0 }
 0x67a   : > { %v1268_v28 = vpop.xlane.xlu0 %1267 }
 0x67b   : > { %2678 = vrcp.f32 %v1268_v28 }
 0x67e   : > { %v1271_v13 = vpop.xlane.xlu0 %1270 }
 0x67f   : > { %2680 = vrcp.f32 %v1271_v13 }
 0x682   : > { %v1290_v14 = vpop.permute.xlu0 %1289 }
 0x683   : > { %2375 = vmatpush3.bf16.msra.mxu1 %v1290_v14 }
 0x684   : > { %2380 = vmatprep.subr.bf16.mxu1 %v2985_v0 }
 0x685   : > { %v2679_v15 = vpop.eup %2678 }
 0x686   : > { %v1274_v16 = vmul.f32 %v2679_v15, %v2675_v10  ;;  %v1338_v26 = vpop.permute.xlu0 %1337 }
 0x688   : > { %v2232_v17 = vpack.c.bf16 %v1274_v16, %v1274_v16 }
 0x689   : > { %v2681_v18 = vpop.eup %2680 }
 0x68a   : > { %v1275_v19 = vmul.f32 %v2681_v18, %v2677_v12  ;;  %2183 = vst.msk [vmem:[%s3474_s16 + $0x10] sm:$0xf] %vm1007_vm4, %v2232_v17 }
 0x68c   : > { %v2233_v21 = vpack.c.bf16 %v1275_v19, %v1275_v19  ;;  %v1276_v22 = vpack.c.bf16 %v1275_v19, %v1274_v16 }
 0x68e   : > { %2377 = vmatmul.mubr.msk.bf16.vlgmr.msra.gmra.mrb[16].mxu1 %vm976_vm3, %v1276_v22  ;;  %2184 = vst.msk [vmem:[%s3474_s16 + $0x14] sm:$0xf] %vm1007_vm4, %v2233_v21 }
 0x68f   : > { %2381 = vmatpush3.bf16.xpose.msra.mxu1 %v1347_v24  ;;  %2384 = vmatprep.mubr.msk.bf16.mxu1 %vm2986_vm0, %v2985_v0 }
 0x690   : > { %2382 = vmatprep.subr.bf16.mxu1 %v2985_v0 }
 0x697   : > { %2383 = vmatpush3.bf16.xpose.msra.mxu1 %v1350_v25 }
 0x698   : > { %2408 = vmatprep.subr.bf16.mxu1 %v2985_v0 }
 0x69e   : > { %2385 = vmatmul.mubr.msk.bf16.vlgmr.msra.gmra.mrb[20].mxu1 %vm925_vm2, %v1338_v26 }
 0x69f   : > { %2416 = vmatprep.mubr.msk.bf16.mxu1 %vm2986_vm0, %v2985_v0 }
 0x761   : > { %v1330_v27 = vpop.f32.mrb[16].mxu1 }
 0x762   : > { %v2378_v29 = vpop.f32.mrb[17].mxu1 }
 0x763   : > { %v1333_v31 = vpop.f32.mrb[18].mxu1 }
 0x764   : > { %v2620_v32 = vpack.i.bf16 %v1333_v31, %v1330_v27  ;;  %v2379_v33 = vpop.f32.mrb[19].mxu1 }
 0x771   : > { %v1386_v34 = vpop.f32.mrb[20].mxu1 }
 0x772   : > { %v2386_v35 = vpop.f32.mrb[21].mxu1  ;;  %v1393_v36 = vsel %vm976_vm3, %v1386_v34, -inf }
 0x773   : > { %1394 = vmax.xlane.f32.xlu1 %v1393_v36  ;;  %v1389_v37 = vpop.f32.mrb[22].mxu1 }
 0x774   : > { %v2387_v38 = vpop.f32.mrb[23].mxu1  ;;  %v1396_v39 = vsel %vm976_vm3, %v1389_v37, -inf }
 0x775   : > { %1397 = vmax.xlane.f32.xlu0 %v1396_v39 }
 0x800   : > { %v1395_v40 = vpop.xlane.xlu1 %1394 }
 0x801   : > { %v1399_v41 = vsub.f32 %v1386_v34, %v1395_v40 }
 0x802   : > { %v1398_v42 = vpop.xlane.xlu0 %1397 }
 0x803   : > { %v1401_v43 = vmul.f32 1.442695, %v1399_v41  ;;  %v1400_v44 = vsub.f32 %v1389_v37, %v1398_v42 }
 0x805   : > { %2682 = vpow2.f32 %v1401_v43  ;;  %v1403_v45 = vmul.f32 1.442695, %v1400_v44 }
 0x807   : > { %2684 = vpow2.f32 %v1403_v45  ;;  %v2646_v45 = vld [vmem:[#allocation10] sm:$0xff]  }
 0x808   : > { %2409 = vmatpush3.bf16.msra.mxu1 %v2646_v45 }
 0x809   : > { %2410 = vmatprep.subr.bf16.mxu1 %v2985_v0 }
 0x80f   : > { %v2683_v46 = vpop.eup %2682 }
 0x810   : > { %v1405_v48 = vsel %vm976_vm3, %v2683_v46, 0.0 }
 0x811   : > { %v2685_v50 = vpop.eup %2684  ;;  %1406 = vadd.xlane.f32.xlu0 %v1405_v48  ;;  %v2649_v48 = vld [vmem:[#allocation10 + $0x18] sm:$0xff]  }
 0x812   : > { %v1408_v54 = vsel %vm976_vm3, %v2685_v50, 0.0 }
 0x813   : > { %1409 = vadd.xlane.f32.xlu1 %v1408_v54  ;;  %v2651_v54 = vld [vmem:[%s3809_s10 + $0x8] sm:$0xff]  }
 0x824   : > { %1428 = vrot.lane.b32.xlu1 %v3446_v51, %s2989_s6 }
 0x827   : > { %1426 = vrot.lane.b32.xlu0 %v3448_v53, %s2989_s6  ;;  %s2148_s6 = sshll.u32 %s3471_s27, 4 }
 0x828   : > { %2616 = vrot.lane.b32.xlu1 %v2615_v56, %s2990_s8  ;;  %s3811_s8 = sld [smem:[#allocation34_spill]] }
 0x82b   : > { %2621 = vrot.lane.b32.xlu0 %v2620_v32, %s2991_s12  ;;  %s3817_s12 = sld [smem:[#allocation41_spill]] }
 0x89e   : > { %v1407_v57 = vpop.xlane.xlu0 %1406 }
 0x89f   : > { %2686 = vrcp.f32 %v1407_v57  ;;  %v2652_v57 = vld [vmem:[%s3809_s10 + $0x10] sm:$0xff]  }
 0x8a0   : > { %v1410_v58 = vpop.xlane.xlu1 %1409 }
 0x8a1   : > { %2688 = vrcp.f32 %v1410_v58  ;;  %v2653_v58 = vld [vmem:[%s3809_s10 + $0x18] sm:$0xff]  }
 0x8a2   : > { %v1427_v59 = vpop.permute.xlu0 %1426 }
 0x8a3   : > { %2389 = vmatpush3.bf16.msra.mxu0 %v1427_v59  ;;  %v2654_v59 = vld [vmem:[%s3809_s10 + $0x20] sm:$0xff]  }
 0x8a4   : > { %2390 = vmatprep.subr.bf16.mxu0 %v2985_v0  ;;  %v1429_v51 = vpop.permute.xlu1 %1428 }
 0x8a6   : > { %v2622_v28 = vpop.permute.xlu0 %2621 }
 0x8a7   : > { %2391 = vmatpush3.bf16.msra.mxu0 %v1429_v51  ;;  %v2624_v15 = vunpack.i.h.bf16 %v2622_v28  ;;  %v2623_v16 = vunpack.i.l.bf16 %v2622_v28  ;;  %v2655_v51 = vld [vmem:[%s3809_s10 + $0x28] sm:$0xff]   ;;  %v2200_v28 = vld [vmem:[%s3812_s3] ss:$0 sm:$0xff]  ;;  %s3815_s3 = sld [smem:[#allocation40_spill]] }
 0x8a8   : > { %2396 = vmatprep.subr.bf16.mxu0 %v2985_v0  ;;  %v2617_v11 = vpop.permute.xlu1 %2616 }
 0x8a9   : > { %v2687_v53 = vpop.eup %2686  ;;  %v2619_v12 = vunpack.i.h.bf16 %v2617_v11  ;;  %v2618_v30 = vunpack.i.l.bf16 %v2617_v11 }
 0x8aa   : > { %v1413_v60 = vmul.f32 %v2687_v53, %v2683_v46  ;;  %v2648_v46 = vld [vmem:[#allocation10 + $0x10] sm:$0xff]  }
 0x8ab   : > { %v2689_v52 = vpop.eup %2688  ;;  %v1501_v13 = vsel %vm925_vm2, %v3501_v49, %v2619_v12  ;;  %v1500_v14 = vsel %vm925_vm2, %v3499_v47, %v2618_v30  ;;  %v2192_v47 = vld [vmem:[%s3807_s19] ss:$0 sm:$0xff]  ;;  %v2656_v12 = vld [vmem:[%s3809_s10 + $0x30] sm:$0xff]   ;;  %v2657_v30 = vld [vmem:[%s3809_s10 + $0x38] sm:$0xff]  }
 0x8ac   : > { %v2234_v55 = vpack.c.bf16 %v1413_v60, %v1413_v60  ;;  %v1414_v56 = vmul.f32 %v2689_v52, %v2685_v50  ;;  %v1502_v20 = vsel %vm976_vm3, %v1500_v14, %v2623_v16  ;;  %v1503_v21 = vsel %vm976_vm3, %v1501_v13, %v2624_v15  ;;  %v2650_v50 = vld [vmem:[%s3808_s28] sm:$0xff]   ;;  %s3816_s28 = sld [smem:[#allocation24_spill]] }
 0x8ae   : > { %v2235_v61 = vpack.c.bf16 %v1414_v56, %v1414_v56  ;;  %v1415_v62 = vpack.c.bf16 %v1414_v56, %v1413_v60  ;;  %2189 = vst.msk [vmem:[%s3474_s16 + $0x18] sm:$0xf] %vm1007_vm4, %v2234_v55 }
 0x8b0   : > { %2393 = vmatmul.mubr.msk.bf16.vlgmr.msra.gmra.mrb[16].mxu0 %vm976_vm3, %v1415_v62  ;;  %2190 = vst.msk [vmem:[%s3474_s16 + $0x1c] sm:$0xf] %vm1007_vm4, %v2235_v61 }
 0x8b1   : > { %2404 = vmatprep.mubr.msk.bf16.mxu0 %vm2986_vm0, %v2985_v0  ;;  %2397 = vmatpush3.bf16.msra.mxu0 %v2642_v63 }
 0x8b2   : > { %2398 = vmatprep.subr.bf16.mxu0 %v2985_v0  ;;  %p3818_p10 = scmp.ne.s32.totalorder %s3816_s28, 0 }
 0x8b5   : > { %2399 = vmatpush3.bf16.msra.mxu0 %v2643_v1  ;;  %v2198_v1 = vld [vmem:[%s3810_s24] ss:$0 sm:$0xff] }
 0x8b6   : > { %2400 = vmatprep.subr.bf16.mxu0 %v2985_v0 }
 0x8b9   : > { %2401 = vmatpush3.bf16.msra.mxu0 %v2644_v2 }
 0x8ba   : > { %2402 = vmatprep.subr.bf16.mxu0 %v2985_v0 }
 0x8bd   : > { %2403 = vmatpush3.bf16.msra.mxu0 %v2645_v3 }
 0x8be   : > { %2420 = vmatprep.subr.bf16.mxu0 %v2985_v0 }
 0x983   : > { %v1469_v4 = vpop.f32.mrb[16].mxu0 }
 0x984   : > { %v2394_v6 = vpop.f32.mrb[17].mxu0 }
 0x985   : > { %v1472_v8 = vpop.f32.mrb[18].mxu0  ;;  %v2199_v6 = vld [vmem:[%s3811_s8] ss:$0 sm:$0xff]  ;;  %s2220_s8 = sshll.u32 %s3802_s4, 2 }
 0x986   : > { %v2625_v9 = vpack.i.bf16 %v1472_v8, %v1469_v4  ;;  %v2395_v10 = vpop.f32.mrb[19].mxu0  ;;  %s1903_s20 = sadd.s32 %s2220_s8, %s3367_s15  ;;  %s1886_s8 = scalar_lea.sflag [#allocation4], %s3471_s27 }
 0x987   : > { %s2221_s24 = sshll.u32 %s1903_s20, 7 }
 0x988   : > { %2626 = vrot.lane.b32.xlu1 %v2625_v9, %s2992_s11  ;;  %s3644_s11 = scalar_lea.hbm %s3817_s12, %s2221_s24 }
 0x9fa   : > { %v2627_v17 = vpop.permute.xlu1 %2626 }
 0x9fb   : > { %v2629_v18 = vunpack.i.h.bf16 %v2627_v17  ;;  %v2628_v19 = vunpack.i.l.bf16 %v2627_v17 }
 0x9fd   : > { %v1505_v22 = vsel %vm1504_vm5, %v1502_v20, %v2628_v19  ;;  %v1506_v24 = vsel %vm1504_vm5, %v1503_v21, %v2629_v18 }
 0x9fe   : > { %v1507_v23 = vpack.c.bf16 %v1506_v24, %v1505_v22 }
 0xa00   : > { %2405 = vmatmul.mubr.msk.bf16.vlgmr.msra.gmra.mrb[20].mxu0 %vm705_vm1, %v1507_v23 }
 0xa01   : > { %2436 = vmatprep.mubr.msk.bf16.mxu0 %vm2986_vm0, %v2985_v0  ;;  %2421 = vmatpush3.bf16.msra.mxu0 %v2650_v50 }
 0xa02   : > { %2422 = vmatprep.subr.bf16.mxu0 %v2985_v0 }
 0xa05   : > { %2423 = vmatpush3.bf16.msra.mxu0 %v2651_v54 }
 0xa06   : > { %2424 = vmatprep.subr.bf16.mxu0 %v2985_v0 }
 0xa09   : > { %2425 = vmatpush3.bf16.msra.mxu0 %v2652_v57  ;;  %v2216_v57 = vld [vmem:[%s3815_s3] ss:$0 sm:$0xff] }
 0xa0a   : > { %2426 = vmatprep.subr.bf16.mxu0 %v2985_v0 }
 0xa0d   : > { %2427 = vmatpush3.bf16.msra.mxu0 %v2653_v58 }
 0xa0e   : > { %2428 = vmatprep.subr.bf16.mxu0 %v2985_v0 }
 0xa11   : > { %2429 = vmatpush3.bf16.msra.mxu0 %v2654_v59 }
 0xa12   : > { %2430 = vmatprep.subr.bf16.mxu0 %v2985_v0 }
 0xa15   : > { %2431 = vmatpush3.bf16.msra.mxu0 %v2655_v51 }
 0xa16   : > { %2432 = vmatprep.subr.bf16.mxu0 %v2985_v0 }
 0xa19   : > { %2433 = vmatpush3.bf16.msra.mxu0 %v2656_v12 }
 0xa1a   : > { %2434 = vmatprep.subr.bf16.mxu0 %v2985_v0 }
 0xa1d   : > { %2435 = vmatpush3.bf16.msra.mxu0 %v2657_v30 }
 0xad3   : > { %v1584_v49 = vpop.f32.mrb[20].mxu0 }
 0xad4   : > { %v1585_v25 = vadd.f32 %v2192_v47, %v1584_v49  ;;  %v2406_v26 = vpop.f32.mrb[21].mxu0 }
 0xad5   : > { %v1587_v27 = vpop.f32.mrb[22].mxu0 }
 0xad6   : > { %v1588_v29 = vadd.f32 %v2192_v47, %v1587_v27  ;;  %v2407_v31 = vpop.f32.mrb[23].mxu0  ;;  %v1591_v32 = vadd.f32 %v1585_v25, %v3393_v5 }
 0xad8   : > { %v1595_v33 = vsel %vm705_vm1, %v1591_v32, 0.0  ;;  %v1592_v34 = vadd.f32 %v1588_v29, %v3396_v7  ;;  %v2647_v7 = vld [vmem:[#allocation10 + $0x8] sm:$0xff]  }
 0xad9   : > { %1596 = vadd.xlane.f32.xlu0 %v1595_v33  ;;  %2411 = vmatpush3.bf16.msra.mxu1 %v2647_v7 }
 0xada   : > { %v1598_v35 = vsel %vm705_vm1, %v1592_v34, 0.0  ;;  %2412 = vmatprep.subr.bf16.mxu1 %v2985_v0 }
 0xadb   : > { %1599 = vadd.xlane.f32.xlu1 %v1598_v35 }
 0xadd   : > { %2413 = vmatpush3.bf16.msra.mxu1 %v2648_v46 }
 0xade   : > { %2414 = vmatprep.subr.bf16.mxu1 %v2985_v0  ;;  %v2206_v0 = vld [vmem:[%s3813_s2] ss:$0 sm:$0xff]  ;;  %s643_s2 = scalar_lea.vmem [#allocation11], %s2148_s6 }
 0xadf   : > { %s1906_s1 = sshll.u32 %s643_s2, 4  ;;  %s3646_s1 = int_to_ptr.vmem [resolvable:$true] %s1906_s1 }
 0xae0   : > { %s2840_s6 = scalar_lea.vmem %s3646_s1, 256 }
 0xae1   : > { %2415 = vmatpush3.bf16.msra.mxu1 %v2649_v48  ;;  %v2215_v48 = vld [vmem:[%s3814_s7] ss:$0 sm:$0xff]  ;;  %p2841_p6 = scmp.ne.s32.totalorder %s3646_s1, %s2840_s6  ;;  %s2993_s7 = smov [#allocation11]  }
 0xae2   : > { %s2844_s5 = sshll.u32 %s2993_s7, 4  ;;  %s2845_s5 = int_to_ptr.vmem [resolvable:$false] %s2844_s5 }
 0xae3   : > { %p2842_p13 = pnand %p2841_p6, %p3818_p10  ;;  %s2846_s9 = scalar_lea.vmem %s2845_s5, 512 }
 0xae4   : > { %p2847_p0 = scmp.lt.s32.totalorder %s3646_s1, %s2845_s5  ;;  %p2848_p5 = scmp.lt.s32.totalorder %s2846_s9, %s2840_s6 }
 0xae5   : > { %p2843_p11 = pneg %p2842_p13 }
 0xae6   : > { %p2849_p8 = por %p2848_p5, %p2847_p0 }
 0xae8   : > { %p2850_p12 = pnand %p2849_p8, %p2843_p11 }
 0xb66   : > { %v1597_v36 = vpop.xlane.xlu0 %1596 }
 0xb67   : > { %v1602_v37 = vmul.f32 0.015625, %v1597_v36 }
 0xb68   : > { %v1600_v38 = vpop.xlane.xlu1 %1599 }
 0xb69   : > { %v1604_v39 = vsub.f32 %v1591_v32, %v1602_v37  ;;  %v1603_v40 = vmul.f32 0.015625, %v1600_v38 }
 0xb6b   : > { %v1605_v41 = vsub.f32 %v1592_v34, %v1603_v40  ;;  %v1606_v42 = vmul.f32 %v1604_v39, %v1604_v39 }
 0xb6d   : > { %v1608_v43 = vsel %vm705_vm1, %v1606_v42, 0.0  ;;  %v1607_v44 = vmul.f32 %v1605_v41, %v1605_v41 }
 0xb6e   : > { %1609 = vadd.xlane.f32.xlu0 %v1608_v43 }
 0xb6f   : > { %v1611_v5 = vsel %vm705_vm1, %v1607_v44, 0.0 }
 0xb72   : > { %1612 = vadd.xlane.f32.xlu0 %v1611_v5 }
 0xbfb   : > { %v1610_v53 = vpop.xlane.xlu0 %1609 }
 0xbfc   : > { %v1614_v60 = vmul.f32 0.015625, %v1610_v53 }
 0xbfe   : > { %v1616_v52 = vadd.f32 1e-05, %v1614_v60 }
 0xbff   : > { %v1613_v55 = vpop.xlane.xlu0 %1612 }
 0xc00   : > { %2690 = vrsqrt.f32 %v1616_v52  ;;  %v1615_v56 = vmul.f32 0.015625, %v1613_v55 }
 0xc02   : > { %v1617_v61 = vadd.f32 1e-05, %v1615_v56 }
 0xc04   : > { %2692 = vrsqrt.f32 %v1617_v61 }
 0xc0a   : > { %v2691_v62 = vpop.eup %2690 }
 0xc0b   : > { %v1620_v63 = vmul.f32 %v2691_v62, %v1604_v39 }
 0xc0d   : > { %v1628_v3 = vmul.f32 %v2198_v1, %v1620_v63 }
 0xc0e   : > { %v2693_v2 = vpop.eup %2692 }
 0xc0f   : > { %v1621_v4 = vmul.f32 %v2693_v2, %v1605_v41  ;;  %v1636_v9 = vadd.f32 %v2199_v6, %v1628_v3 }
 0xc11   : > { %v1629_v8 = vmul.f32 %v2198_v1, %v1621_v4 }
 0xc13   : > { %v1637_v10 = vadd.f32 %v2199_v6, %v1629_v8 }
 0xc15   : > { %v1638_v11 = vpack.c.bf16 %v1637_v10, %v1636_v9 }
 0xc17   : > { %2417 = vmatmul.mubr.msk.bf16.vlgmr.msra.gmra.mrb[24].mxu1 %vm705_vm1, %v1638_v11 }
 0xcea   : > { %v1715_v13 = vpop.f32.mrb[24].mxu1 }
 0xceb   : > { %v1716_v14 = vadd.f32 %v2200_v28, %v1715_v13  ;;  %v2418_v15 = vpop.f32.mrb[25].mxu1 }
 0xcec   : > { %v1718_v16 = vpop.f32.mrb[26].mxu1 }
 0xced   : > { %v1719_v17 = vadd.f32 %v2200_v28, %v1718_v16  ;;  %v2419_v18 = vpop.f32.mrb[27].mxu1  ;;  %v1722_v19 = vmax.f32 %v1716_v14, 0.0 }
 0xcef   : > { %v1723_v20 = vmax.f32 %v1719_v17, 0.0 }
 0xcf1   : > { %v1724_v21 = vpack.c.bf16 %v1723_v20, %v1722_v19 }
 0xcf3   : > { %2437 = vmatmul.mubr.bf16.vlgmr.msra.gmra.mrb[24].mxu0 %v1724_v21 }
 0xdc6   : > { %v1830_v22 = vpop.f32.mrb[24].mxu0 }
 0xdc7   : > { %v1831_v24 = vadd.f32 %v2206_v0, %v1830_v22  ;;  %v2438_v23 = vpop.f32.mrb[25].mxu0 }
 0xdc8   : > { %v1833_v47 = vpop.f32.mrb[26].mxu0 }
 0xdc9   : > { %v1834_v49 = vadd.f32 %v2206_v0, %v1833_v47  ;;  %v2439_v25 = vpop.f32.mrb[27].mxu0  ;;  %v1837_v26 = vadd.f32 %v1831_v24, %v1636_v9 }
 0xdcb   : > { %v1841_v27 = vsel %vm705_vm1, %v1837_v26, 0.0  ;;  %v1838_v29 = vadd.f32 %v1834_v49, %v1637_v10 }
 0xdcc   : > { %1842 = vadd.xlane.f32.xlu1 %v1841_v27 }
 0xdcd   : > { %v1844_v31 = vsel %vm705_vm1, %v1838_v29, 0.0 }
 0xdce   : > { %1845 = vadd.xlane.f32.xlu0 %v1844_v31 }
 0xe59   : > { %v1843_v32 = vpop.xlane.xlu1 %1842 }
 0xe5a   : > { %v1847_v33 = vmul.f32 0.015625, %v1843_v32 }
 0xe5b   : > { %v1846_v34 = vpop.xlane.xlu0 %1845 }
 0xe5c   : > { %v1849_v35 = vsub.f32 %v1837_v26, %v1847_v33  ;;  %v1848_v36 = vmul.f32 0.015625, %v1846_v34 }
 0xe5e   : > { %v1850_v37 = vsub.f32 %v1838_v29, %v1848_v36  ;;  %v1851_v38 = vmul.f32 %v1849_v35, %v1849_v35 }
 0xe60   : > { %v1853_v39 = vsel %vm705_vm1, %v1851_v38, 0.0  ;;  %v1852_v40 = vmul.f32 %v1850_v37, %v1850_v37 }
 0xe61   : > { %1854 = vadd.xlane.f32.xlu1 %v1853_v39 }
 0xe62   : > { %v1856_v41 = vsel %vm705_vm1, %v1852_v40, 0.0 }
 0xe63   : > { %1857 = vadd.xlane.f32.xlu0 %v1856_v41 }
 0xeee   : > { %v1855_v42 = vpop.xlane.xlu1 %1854 }
 0xeef   : > { %v1859_v43 = vmul.f32 0.015625, %v1855_v42 }
 0xef0   : > { %v1858_v44 = vpop.xlane.xlu0 %1857 }
 0xef1   : > { %v1861_v5 = vadd.f32 1e-05, %v1859_v43  ;;  %v1860_v45 = vmul.f32 0.015625, %v1858_v44 }
 0xef3   : > { %2694 = vrsqrt.f32 %v1861_v5  ;;  %v1862_v7 = vadd.f32 1e-05, %v1860_v45 }
 0xef5   : > { %2696 = vrsqrt.f32 %v1862_v7 }
 0xefd   : > { %v2695_v46 = vpop.eup %2694 }
 0xefe   : > { %v1865_v50 = vmul.f32 %v2695_v46, %v1849_v35 }
 0xeff   : > { %v2697_v54 = vpop.eup %2696 }
 0xf00   : > { %v1873_v58 = vmul.f32 %v2215_v48, %v1865_v50  ;;  %v1866_v59 = vmul.f32 %v2697_v54, %v1850_v37 }
 0xf02   : > { %v1881_v51 = vadd.f32 %v2216_v57, %v1873_v58  ;;  %v1874_v53 = vmul.f32 %v2215_v48, %v1866_v59 }
 0xf04   : > { %v1882_v60 = vadd.f32 %v2216_v57, %v1874_v53  ;;  %1883 = vst.msk [vmem:[%s643_s2] sm:$0xff] %vm705_vm1, %v1881_v51 }
 0xf06   : > { %1884 = vst.msk [vmem:[%s643_s2 + $0x8] sm:$0xff] %vm705_vm1, %v1882_v60 }
 0xf07   : > { %2853 = shalt.err (!%p2850_p12)
}
 0xf08   : > { %s2854_s20 = scalar_lea.hbm %s3644_s11, 256  ;;  %s2858_s3 = scalar_lea.hbm %s3817_s12, 1024 }
 0xf09   : > { %p2855_p2 = scmp.ne.s32.totalorder %s3644_s11, %s2854_s20  ;;  %p2859_p1 = scmp.lt.u32.totalorder %s3644_s11, %s3817_s12 }
 0xf0a   : > { %p2860_p3 = scmp.lt.u32.totalorder %s2858_s3, %s2854_s20  ;;  %p2862_p6 = scmp.lt.u32.totalorder %s2854_s20, %s3644_s11 }
 0xf0b   : > { %p2856_p7 = pnand %p2855_p2, %p3818_p10 }
 0xf0c   : > { %p2861_p4 = por %p2860_p3, %p2859_p1 }
 0xf0d   : > { %p2857_p9 = pneg %p2856_p7 }
 0xf0e   : > { %p2863_p13 = por %p2862_p6, %p2861_p4 }
 0xf10   : > { %p2864_p11 = pnand %p2863_p13, %p2857_p9 }
 0xf12   : > { %2867 = shalt.err (!%p2864_p11)
}
 0xf13   : > { %s2994_s6 = smov 128   ;;  %s2995_s7 = smov 8  }
 0xf14   : > { %2458 = dma.vmem_to_hbm [thread:$0]  (%p3818_p10), %s3646_s1, 256, %s3644_s11, %s1886_s8, %s2994_s6, %s2994_s6, %s2995_s7  }
 0xf15   : > { %s1891_s5 = scalar_lea.sflag [#allocation13], %s3471_s27 }
 0xf16   : > { %s2223_s9 = sshll.u32 %s3802_s4, 4  ;;  %s1940_s20 = sshll.u32 %s3474_s16, 4  ;;  %s1941_s20 = int_to_ptr.vmem [resolvable:$true] %s1940_s20 }
 0xf17   : > { %s1921_s19 = sadd.s32 %s2223_s9, %s3367_s15  ;;  %s3819_s2 = sld [smem:[#allocation42_spill]] }
 0xf18   : > { %s2224_s22 = sshll.u32 %s1921_s19, 6  ;;  %s2996_s27 = smov 128  }
 0xf19   : > { %2459 = sst [smem:[#allocation15]] (%p3818_p10), %s2996_s27  ;;  %s2997_s11 = smov 256  }
 0xf1a   : > { %2460 = sst [smem:[#allocation15 + $0x1]] (%p3818_p10), %s2997_s11  ;;  %s2998_s8 = smov 2  }
 0xf1b   : > { %2461 = sst [smem:[#allocation15 + $0x2]] (%p3818_p10), %s2998_s8  ;;  %s2999_s4 = smov 64  }
 0xf1c   : > { %2462 = sst [smem:[#allocation15 + $0x3]] (%p3818_p10), %s2999_s4  ;;  %s3000_s15 = smov 4  }
 0xf1d   : > { %s1923_s1 = scalar_lea.hbm %s3819_s2, %s2224_s22  ;;  %2463 = sst [smem:[#allocation15 + $0x4]] (%p3818_p10), %s2999_s4 }
 0xf1e   : > { %2464 = sst [smem:[#allocation15 + $0x5]] (%p3818_p10), %s3000_s15  ;;  %s3001_s16 = smov [#allocation14]  }
 0xf1f   : > { %s3002_s6 = smov 0  }
 0xf20   : > { %2465 = dma.general (%p3818_p10), %s1941_s20, 512, %s1923_s1, %s1891_s5, %s3001_s16, [#allocation15], %s3002_s6, 0  }
 0xf21 PF: > { %s3820_s7 = sld [smem:[#allocation21_spill]]  ;;  %s3821_s9 = sld [smem:[#allocation25_spill]] }
 0xf22   : > { %p2501_p0 = scmp.ge.s32.totalorder %s2974_s0, 2 }
 0xf27   : > { %s1968_s19 = sand.u32 1, %s3820_s7   ;;  %p3822_p5 = scmp.ne.s32.totalorder %s3821_s9, 0 }
 0xf28   : > { %s1969_s22 = scalar_lea.sflag [#allocation4], %s1968_s19 }
 0xf29   : > { %p2486_p8 = pnand %p2501_p0, %p3822_p5 }
 0xf2b   : > { %2925 = dma.done.wait (!%p2486_p8), %s1969_s22, 256  }
 0xf2c   : > { %2927 = vsyncadd (!%p2486_p8), %s1969_s22, 4294967040  ;;  %s1978_s3 = scalar_lea.sflag [#allocation13], %s1968_s19 }
 0xf2d   : > { %2929 = dma.done.wait (!%p2486_p8), %s1978_s3, 512  }
 0xf2e   : > { %2931 = vsyncadd (!%p2486_p8), %s1978_s3, 4294966784  ;;  %s38_s0 = sadd.s32 1, %s2974_s0   ;;  %s3823_s24 = sld [smem:[#allocation22_spill]] }
 0xf2f   : > { %p35_p12 = scmp.ge.s32.totalorder %s38_s0, 6   ;;  %s3824_s5 = smov %s3836_s21 }
 0xf30   : > { %s3826_s22 = smov %s2942_s23  ;;  %s3827_s23 = smov %s3304_s13 }
 0xf31   : > { %s3831_s27 = smov %s2966_s29  ;;  %s3832_s28 = smov %s2970_s30 }
 0xf32   : > { %s3833_s29 = smov %s3824_s5  ;;  %s3834_s30 = smov %s3840_s17 }
 0xf33   :  { %37 = sbr.rel (!%p35_p12) target bundleno = 31 (0x1f), region = 169 }
 0xf34   : > { %s3825_s21 = smov %s3823_s24  ;;  %s3828_s24 = smov %s2950_s25 }
 0xf35   : > { %s3829_s25 = smov %s2954_s26  ;;  %s3830_s26 = smov %s3301_s18 }
 0xf3a   :  { %1983 = vsyncpa [#allocation3], 1 }
 0xf3b   :  { %1985 = vsyncpa [#allocation3 + $0x1], 1 }
 0xf3c   :  { %1986 = vsyncpa [#allocation6], 1 }
 0xf3d   :  { %1987 = vsyncpa [#allocation9], 1 }
 0xf3e   :  { %1988 = vsyncpa [#allocation4], 1 }
 0xf3f   :  { %1990 = vsyncpa [#allocation4 + $0x1], 1 }
 0xf40   :  { %1991 = vsyncpa [#allocation13], 1 }
 0xf41   :  { %1993 = vsyncpa [#allocation13 + $0x1], 1 }

// kernel: tpu_custom_call.1
= control target key start
LH: loop header
LB: loop body
LE: loop exit
PB: predicated region body
PF: predicated region fallthrough
CT: control target
= control target key end

     0   :  { %s3732_s0 = inlined_call_operand.vmem [shape: f32[2,32,64], index: 0, kind: input, shape index: {}]   ;;  %s3733_s1 = inlined_call_operand.hbm [shape: f32[2,32,64], index: 1, kind: input, shape index: {}]   ;;  %s3734_s2 = inlined_call_operand.vmem [shape: bf16[64,64], index: 2, kind: input, shape index: {}]   ;;  %s3735_s3 = inlined_call_operand.hbm [shape: bf16[64,64], index: 3, kind: input, shape index: {}]   ;;  %s3736_s4 = inlined_call_operand.hbm [shape: bf16[64,64], index: 4, kind: input, shape index: {}]   ;;  %s3737_s5 = inlined_call_operand.hbm [shape: bf16[64,64], index: 5, kind: input, shape index: {}]   ;;  %s3738_s6 = inlined_call_operand.vmem [shape: f32[1,64], index: 6, kind: input, shape index: {}]   ;;  %s3739_s7 = inlined_call_operand.vmem [shape: f32[1,64], index: 7, kind: input, shape index: {}]   ;;  %s3740_s8 = inlined_call_operand.vmem [shape: f32[1,64], index: 8, kind: input, shape index: {}]   ;;  %s3741_s9 = inlined_call_operand.hbm [shape: bf16[64,128], index: 9, kind: input, shape index: {}]   ;;  %s3742_s10 = inlined_call_operand.vmem [shape: f32[1,128], index: 10, kind: input, shape index: {}]   ;;  %s3743_s11 = inlined_call_operand.vmem [shape: bf16[128,64], index: 11, kind: input, shape index: {}]   ;;  %s3744_s12 = inlined_call_operand.vmem [shape: f32[1,64], index: 12, kind: input, shape index: {}]   ;;  %s3745_s13 = inlined_call_operand.vmem [shape: f32[1,64], index: 13, kind: input, shape index: {}]   ;;  %s3746_s14 = inlined_call_operand.vmem [shape: f32[1,64], index: 14, kind: input, shape index: {}]   ;;  %s3747_s15 = inlined_call_operand.hbm [shape: f32[2,32,64], index: 15, kind: output, shape index: {0}]   ;;  %s3748_s16 = inlined_call_operand.hbm [shape: bf16[2,4,32,32], index: 16, kind: output, shape index: {1}]  }
   0x1   :  { %3763 = sst [smem:[#allocation26_spill]] %s3732_s0 }
   0x2   :  { %3764 = sst [smem:[#allocation27_spill]] %s3733_s1 }
   0x3   :  { %3765 = sst [smem:[#allocation28_spill]] %s3734_s2 }
   0x4   :  { %3766 = sst [smem:[#allocation29_spill]] %s3735_s3 }
   0x5   :  { %3767 = sst [smem:[#allocation30_spill]] %s3736_s4 }
   0x6   :  { %3768 = sst [smem:[#allocation31_spill]] %s3737_s5 }
   0x7   :  { %3769 = sst [smem:[#allocation32_spill]] %s3738_s6 }
   0x8   :  { %3770 = sst [smem:[#allocation33_spill]] %s3739_s7 }
   0x9   :  { %3771 = sst [smem:[#allocation34_spill]] %s3740_s8 }
   0xa   :  { %3772 = sst [smem:[#allocation35_spill]] %s3741_s9 }
   0xb   :  { %3773 = sst [smem:[#allocation36_spill]] %s3742_s10 }
   0xc   :  { %3774 = sst [smem:[#allocation37_spill]] %s3743_s11 }
   0xd   :  { %3775 = sst [smem:[#allocation38_spill]] %s3744_s12 }
   0xe   :  { %3776 = sst [smem:[#allocation39_spill]] %s3745_s13 }
   0xf   :  { %3777 = sst [smem:[#allocation40_spill]] %s3746_s14 }
  0x10   :  { %3778 = sst [smem:[#allocation41_spill]] %s3747_s15 }
  0x11   :  { %3779 = sst [smem:[#allocation42_spill]] %s3748_s16 }
  0x12   :  { %22 = vsyncpa [#allocation3], 0 }
  0x13   :  { %24 = vsyncpa [#allocation3 + $0x1], 0 }
  0x14   :  { %25 = vsyncpa [#allocation6], 0 }
  0x15   :  { %26 = vsyncpa [#allocation9], 0 }
  0x16   :  { %27 = vsyncpa [#allocation4], 0 }
  0x17   :  { %29 = vsyncpa [#allocation4 + $0x1], 0 }
  0x18   :  { %30 = vsyncpa [#allocation13], 0 }
  0x19   :  { %32 = vsyncpa [#allocation13 + $0x1], 0  ;;  %s3088_s21 = smov 0   ;;  %s3090_s22 = smov 0  }
  0x1a   :  { %s3092_s23 = smov 0   ;;  %s3094_s24 = smov 0  }
  0x1b   :  { %s3096_s25 = smov 0   ;;  %s3098_s26 = smov 0  }
  0x1c   :  { %s3100_s27 = smov 0   ;;  %s3102_s28 = smov 0  }
  0x1d   :  { %s3104_s29 = smov 0   ;;  %s3106_s30 = smov 0  }
  0x1e   :  { %s3108_s0 = smov 0  }
  0x1f LB: > { %3780 = sst [smem:[#allocation21_spill]] %s2934_s21  ;;  %s2131_s17 = sadd.s32 4294967295, %s2974_s0   ;;  %s2974_s0 = sphi %s3108_s0, %s38_s0   ;;  %s2970_s30 = sphi %s3106_s30, %s3834_s30   ;;  %s2966_s29 = sphi %s3104_s29, %s3833_s29   ;;  %s2962_s28 = sphi %s3102_s28, %s3832_s28   ;;  %s2958_s27 = sphi %s3100_s27, %s3831_s27   ;;  %s2954_s26 = sphi %s3098_s26, %s3830_s26   ;;  %s2950_s25 = sphi %s3096_s25, %s3829_s25   ;;  %s2946_s24 = sphi %s3094_s24, %s3828_s24   ;;  %s2942_s23 = sphi %s3092_s23, %s3827_s23   ;;  %s2938_s22 = sphi %s3090_s22, %s3826_s22   ;;  %s2934_s21 = sphi %s3088_s21, %s3825_s21  }
  0x20   : > { %3781 = sst [smem:[#allocation22_spill]] %s2938_s22  ;;  %s2132_s18 = sadd.s32 4294967294, %s2974_s0  }
  0x21   : > { %3782 = sst [smem:[#allocation23_spill]] %s2962_s28  ;;  %p98_p0 = scmp.ne.s32.totalorder %s2950_s25, %s2946_s24 }
  0x22   : > { %p3144_p1 = scmp.eq.s32.totalorder %s2131_s17, 0  ;;  %p396_p2 = scmp.ne.s32.totalorder %s2942_s23, %s2938_s22 }
  0x23   : > { %p397_p3 = scmp.eq.s32.totalorder %s2131_s17, 3  ;;  %p402_p5 = scmp.ne.s32.totalorder %s2938_s22, %s2934_s21 }
  0x24   : > { %s3783_s19 = scalar_select %p3144_p1, 1, 0 }
  0x25   : > { %p3152_p4 = por %p3144_p1, %p98_p0  ;;  %p3158_p6 = por %p397_p3, %p396_p2 }
  0x26   : > { %p403_p7 = scmp.eq.s32.totalorder %s2132_s18, 3  ;;  %p2133_p8 = scmp.ge.s32.totalorder %s2974_s0, 1 }
  0x27   : > { %s3784_s20 = scalar_select %p3152_p4, 1, 0 }
  0x28   : > { %s3785_s16 = scalar_select %p3158_p6, 1, 0 }
  0x29   : > { %p438_p9 = scmp.lt.s32.totalorder %s2974_s0, 5  ;;  %p3164_p10 = por %p403_p7, %p402_p5 }
  0x2a   : > { %3786 = sst [smem:[#allocation24_spill]] %s3785_s16  ;;  %s2976_s17 = smov [#allocation5]  }
  0x2b   : > { %s3787_s24 = scalar_select %p3164_p10, 1, 0 }
  0x2c   : > { %p3168_p11 = pnand %p2133_p8, %p438_p9  ;;  %s453_s14 = sshll.u32 %s2976_s17, 4  ;;  %s454_s14 = int_to_ptr.vmem [resolvable:$true] %s453_s14 }
  0x2d   : > { %3788 = sst [smem:[#allocation25_spill]] %s3787_s24  ;;  %s2977_s18 = smov [#allocation8]  }
  0x2e   : > { %s3789_s15 = scalar_select %p3168_p11, 1, 0 }
  0x2f   : > { %p2468_p12 = pneg %p3168_p11  ;;  %s479_s16 = sshll.u32 %s2977_s18, 4  ;;  %s3180_s16 = int_to_ptr.vmem [resolvable:$true] %s479_s16 }
  0x30   : > { %s3791_s3 = sld [smem:[#allocation29_spill]] }
  0x31   : > { %p3176_p13 = pnand %p2468_p12, %p3144_p1 }
  0x33   : > { %p3190_p2 = pneg %p3176_p13 }
  0x36   : > { %s2698_s12 = scalar_lea.hbm %s3791_s3, 512 }
  0x37   : > { %p2699_p0 = scmp.ne.s32.totalorder %s3791_s3, %s2698_s12  ;;  %p2705_p7 = scmp.lt.u32.totalorder %s2698_s12, %s3791_s3 }
  0x39   : > { %p2701_p3 = pnand %p3190_p2, %p2699_p0 }
  0x3b   : > { %p2702_p5 = pneg %p2701_p3 }
  0x3d   : > { %p2707_p8 = pnand %p2705_p7, %p2702_p5 }
  0x3f   : > { %2710 = shalt.err (!%p2707_p8)
}
  0x40   : > { %s2711_s13 = scalar_lea.vmem %s454_s14, 512  ;;  %p2719_p6 = scmp.lt.s32.totalorder %s454_s14, %s454_s14 }
  0x41   : > { %p2712_p9 = scmp.ne.s32.totalorder %s454_s14, %s2711_s13  ;;  %p2720_p1 = scmp.lt.s32.totalorder %s2711_s13, %s2711_s13 }
  0x43   : > { %p2714_p12 = pnand %p2712_p9, %p3190_p2  ;;  %p2721_p4 = por %p2720_p1, %p2719_p6 }
  0x45   : > { %p2715_p10 = pneg %p2714_p12 }
  0x47   : > { %p2722_p11 = pnand %p2721_p4, %p2715_p10 }
  0x49   : > { %2725 = shalt.err (!%p2722_p11)
}
  0x4a   : > { %s2978_s8 = smov 64   ;;  %s2979_s10 = smov 4  }
  0x4b   : > { %2471 = dma.hbm_to_vmem [thread:$0]  (!%p3176_p13), %s3791_s3, 512, %s454_s14, [#allocation6], %s2978_s8, %s2978_s8, %s2979_s10  }
  0x4c   : > { %s3793_s5 = sld [smem:[#allocation31_spill]] }
  0x52   : > { %s2726_s11 = scalar_lea.hbm %s3793_s5, 512 }
  0x53   : > { %p2727_p1 = scmp.ne.s32.totalorder %s3793_s5, %s2726_s11  ;;  %p2733_p10 = scmp.lt.u32.totalorder %s2726_s11, %s3793_s5 }
  0x55   : > { %p2729_p4 = pnand %p2727_p1, %p3190_p2 }
  0x57   : > { %p2730_p6 = pneg %p2729_p4 }
  0x59   : > { %p2735_p11 = pnand %p2733_p10, %p2730_p6 }
  0x5b   : > { %2738 = shalt.err (!%p2735_p11)
}
  0x5c   : > { %s2739_s14 = scalar_lea.vmem %s3180_s16, 512  ;;  %p2747_p7 = scmp.lt.s32.totalorder %s3180_s16, %s3180_s16 }
  0x5d   : > { %p2740_p0 = scmp.ne.s32.totalorder %s3180_s16, %s2739_s14  ;;  %p2748_p8 = scmp.lt.s32.totalorder %s2739_s14, %s2739_s14 }
  0x5f   : > { %p2742_p3 = pnand %p2740_p0, %p3190_p2  ;;  %p2749_p9 = por %p2748_p8, %p2747_p7 }
  0x61   : > { %p2743_p5 = pneg %p2742_p3 }
  0x63   : > { %p2750_p12 = pnand %p2749_p9, %p2743_p5 }
  0x65   : > { %2753 = shalt.err (!%p2750_p12)
}
  0x66   : > { %2477 = dma.hbm_to_vmem [thread:$0]  (!%p3176_p13), %s3793_s5, 512, %s3180_s16, [#allocation9], %s2978_s8, %s2978_s8, %s2979_s10  }
  0x67   : > { %s2980_s11 = smov [#allocation7]   ;;  %s2981_s7 = smov [#allocation10]  }
  0x68   : > { %s466_s22 = sshll.u32 %s2980_s11, 4  ;;  %s501_s12 = sshll.u32 %s2981_s7, 4  ;;  %s467_s22 = int_to_ptr.vmem [resolvable:$true] %s466_s22  ;;  %s502_s12 = int_to_ptr.vmem [resolvable:$true] %s501_s12 }
  0x69   : > { %s3794_s4 = sld [smem:[#allocation30_spill]] }
  0x6f   : > { %s2754_s13 = scalar_lea.hbm %s3794_s4, 512 }
  0x70   : > { %p2755_p1 = scmp.ne.s32.totalorder %s3794_s4, %s2754_s13  ;;  %p2761_p10 = scmp.lt.u32.totalorder %s2754_s13, %s3794_s4 }
  0x72   : > { %p2757_p4 = pnand %p2755_p1, %p3190_p2 }
  0x74   : > { %p2758_p6 = pneg %p2757_p4 }
  0x76   : > { %p2763_p11 = pnand %p2761_p10, %p2758_p6 }
  0x78   : > { %2766 = shalt.err (!%p2763_p11)
}
  0x79   : > { %s2767_s16 = scalar_lea.vmem %s467_s22, 512  ;;  %p2775_p7 = scmp.lt.s32.totalorder %s467_s22, %s467_s22 }
  0x7a   : > { %p2768_p0 = scmp.ne.s32.totalorder %s467_s22, %s2767_s16  ;;  %p2776_p8 = scmp.lt.s32.totalorder %s2767_s16, %s2767_s16 }
  0x7c   : > { %p2770_p3 = pnand %p2768_p0, %p3190_p2  ;;  %p2777_p9 = por %p2776_p8, %p2775_p7 }
  0x7e   : > { %p2771_p5 = pneg %p2770_p3 }
  0x80   : > { %p2778_p12 = pnand %p2777_p9, %p2771_p5 }
  0x82   : > { %2781 = shalt.err (!%p2778_p12)
}
  0x83   : > { %2474 = dma.hbm_to_vmem [thread:$0]  (!%p3176_p13), %s3794_s4, 512, %s467_s22, [#allocation6], %s2978_s8, %s2978_s8, %s2979_s10  }
  0x84   : > { %s3795_s9 = sld [smem:[#allocation35_spill]] }
  0x8a   : > { %s2782_s7 = scalar_lea.hbm %s3795_s9, 512 }
  0x8b   : > { %p2783_p1 = scmp.ne.s32.totalorder %s3795_s9, %s2782_s7  ;;  %p2789_p10 = scmp.lt.u32.totalorder %s2782_s7, %s3795_s9 }
  0x8d   : > { %p2785_p4 = pnand %p2783_p1, %p3190_p2 }
  0x8f   : > { %p2786_p6 = pneg %p2785_p4 }
  0x91   : > { %p2791_p11 = pnand %p2789_p10, %p2786_p6 }
  0x93   : > { %2794 = shalt.err (!%p2791_p11)
}
  0x94   : > { %s2795_s2 = scalar_lea.vmem %s502_s12, 512  ;;  %p2803_p7 = scmp.lt.s32.totalorder %s502_s12, %s502_s12 }
  0x95   : > { %p2796_p0 = scmp.ne.s32.totalorder %s502_s12, %s2795_s2  ;;  %p2804_p8 = scmp.lt.s32.totalorder %s2795_s2, %s2795_s2 }
  0x97   : > { %p2798_p3 = pnand %p2796_p0, %p3190_p2  ;;  %p2805_p9 = por %p2804_p8, %p2803_p7 }
  0x99   : > { %p2799_p5 = pneg %p2798_p3 }
  0x9b   : > { %p2806_p12 = pnand %p2805_p9, %p2799_p5 }
  0x9d   : > { %2809 = shalt.err (!%p2806_p12)
}
  0x9e   : > { %2480 = dma.hbm_to_vmem [thread:$0]  (!%p3176_p13), %s3795_s9, 512, %s502_s12, [#allocation9], %s2978_s8, %s2978_s8, %s2979_s10  }
  0x9f   : > { %s47_s21 = sadd.s32 1, %s2966_s29  ;;  %s50_s17 = sadd.s32 1, %s2970_s30 }
  0xa0   : > { %p48_p2 = scmp.ge.s32.totalorder %s47_s21, 2  ;;  %s85_s3 = sadd.s32 1, %s2954_s26 }
  0xa1   : > { %p92_p1 = scmp.ne.s32.totalorder %s2954_s26, %s2950_s25  ;;  %p93_p4 = scmp.eq.s32.totalorder %s2974_s0, 0 }
  0xa2   : > { %s3836_s21 = smov (%p48_p2, %s47_s21), 0  ;;  %s3838_s17 = smov (!%p48_p2, %s50_s17), %s2970_s30 }
  0xa3   : > { %s382_s28 = ssub.s32 %s2966_s29, %s3836_s21  ;;  %p52_p6 = scmp.ge.s32.totalorder %s3838_s17, 2 }
  0xa4   : > { %s386_s6 = sadd.s32 1, %s2942_s23  ;;  %p3289_p10 = por %p93_p4, %p92_p1 }
  0xa5   : > { %p2496_p13 = scmp.lt.s32.totalorder %s2974_s0, 4  ;;  %s3840_s17 = smov (%p52_p6, %s3838_s17), 0 }
  0xa6   : > { %s543_s10 = sand.u32 1, %s2954_s26   ;;  %s2227_s12 = sshll.u32 %s2970_s30, 9 }
  0xa7   : > { %s82_s11 = ssub.s32 %s2970_s30, %s3840_s17  ;;  %s2139_s24 = sshll.u32 %s543_s10, 5 }
  0xa8   : > { %p83_p11 = scmp.eq.s32.totalorder %s82_s11, 0  ;;  %s383_s7 = sor.u32 %s382_s28, %s82_s11 }
  0xa9   : > { %p384_p0 = scmp.eq.s32.totalorder %s383_s7, 0  ;;  %s3797_s1 = sld [smem:[#allocation27_spill]] }
  0xaa   : > { %s3301_s18 = scalar_select %p83_p11, %s2954_s26, %s85_s3  }
  0xab   : > { %s3304_s13 = scalar_select %p384_p0, %s2942_s23, %s386_s6  }
  0xac   : > { %s547_s16 = scalar_lea.vmem [#allocation2], %s2139_s24  ;;  %p3315_p3 = pnand %p2496_p13, %p3289_p10 }
  0xad   : > { %s554_s4 = sshll.u32 %s547_s16, 4  ;;  %s3321_s3 = scalar_lea.sflag [#allocation3], %s543_s10  ;;  %s3319_s4 = int_to_ptr.vmem [resolvable:$true] %s554_s4 }
  0xae   : > { %p2812_p7 = pneg %p3315_p3 }
  0xaf   : > { %s3309_s22 = scalar_lea.hbm %s3797_s1, %s2227_s12  ;;  %s2815_s11 = scalar_lea.hbm %s3797_s1, 1024 }
  0xb0   : > { %s2810_s6 = scalar_lea.hbm %s3309_s22, 512  ;;  %p2816_p12 = scmp.lt.u32.totalorder %s3309_s22, %s3797_s1 }
  0xb1   : > { %p2811_p5 = scmp.ne.s32.totalorder %s3309_s22, %s2810_s6  ;;  %p2817_p2 = scmp.lt.u32.totalorder %s2815_s11, %s2810_s6 }
  0xb2   : > { %p2819_p4 = scmp.lt.u32.totalorder %s2810_s6, %s3309_s22 }
  0xb3   : > { %p2813_p8 = pnand %p2812_p7, %p2811_p5  ;;  %p2818_p1 = por %p2817_p2, %p2816_p12 }
  0xb5   : > { %p2814_p9 = pneg %p2813_p8  ;;  %p2820_p6 = por %p2819_p4, %p2818_p1 }
  0xb7   : > { %p2821_p10 = pnand %p2820_p6, %p2814_p9 }
  0xb9   : > { %2824 = shalt.err (!%p2821_p10)
}
  0xba   : > { %s2825_s10 = scalar_lea.vmem %s3319_s4, 512  ;;  %s2982_s14 = smov [#allocation2]  }
  0xbb   : > { %p2826_p13 = scmp.ne.s32.totalorder %s3319_s4, %s2825_s10  ;;  %s2830_s2 = sshll.u32 %s2982_s14, 4  ;;  %s2831_s2 = int_to_ptr.vmem [resolvable:$false] %s2830_s2 }
  0xbc   : > { %s2832_s16 = scalar_lea.vmem %s2831_s2, 1024  ;;  %p2833_p5 = scmp.lt.s32.totalorder %s3319_s4, %s2831_s2 }
  0xbd   : > { %p2828_p11 = pnand %p2826_p13, %p2812_p7  ;;  %p2834_p8 = scmp.lt.s32.totalorder %s2832_s16, %s2825_s10 }
  0xbf   : > { %p2829_p0 = pneg %p2828_p11  ;;  %p2835_p12 = por %p2834_p8, %p2833_p5 }
  0xc1   : > { %p2836_p2 = pnand %p2835_p12, %p2829_p0 }
  0xc3   : > { %2839 = shalt.err (!%p2836_p2)
}
  0xc4   : > { %s2983_s6 = smov 128   ;;  %s2984_s8 = smov 8  }
  0xc5   : > { %2484 = dma.hbm_to_vmem [thread:$0]  (!%p3315_p3), %s3309_s22, 512, %s3319_s4, %s3321_s3, %s2983_s6, %s2983_s6, %s2984_s8  }
  0xc6   : > { %p3799_p7 = scmp.ne.s32.totalorder %s3789_s15, 0 }
  0xc7   : > { %s568_s12 = sand.u32 (!%p3799_p7), 1, %s2950_s25   ;;  %p3800_p9 = scmp.ne.s32.totalorder (!%p3799_p7), %s3784_s20, 0 }
  0xc8   : > { %566 = sbr.rel (%p3799_p7) target bundleno = 3873 (0xf21), region = 80  ;;  %s2143_s11 = sshll.u32 (!%p3799_p7), %s568_s12, 5 }
  0xc9   : > { %s569_s7 = scalar_lea.sflag (!%p3799_p7), [#allocation3], %s568_s12  ;;  %s3352_s24 = scalar_lea.vmem (!%p3799_p7), [#allocation2], %s2143_s11 }
  0xcf   : > { %2913 = dma.done.wait (%p3800_p9), %s569_s7, 512  }
  0xd0   : > { %2915 = vsyncadd (%p3800_p9), %s569_s7, 4294966784  ;;  %p3801_p1 = scmp.ne.s32.totalorder %s3783_s19, 0 }
  0xd2   : > { %2917 = dma.done.wait (%p3801_p1), [#allocation6], 1024  }
  0xd3   : > { %2919 = vsyncadd (%p3801_p1), [#allocation6], 4294966272 }
  0xd4   : > { %2921 = dma.done.wait (%p3801_p1), [#allocation9], 1024  }
  0xd5   : > { %2923 = vsyncadd (%p3801_p1), [#allocation9], 4294966272  ;;  %s3802_s4 = sld [smem:[#allocation23_spill]]  ;;  %s3367_s15 = sshll.u32 %s2958_s27, 1  ;;  %v2985_v0 = vmov 0.0   ;;  %vm2986_vm0 = vmmov 0  }
  0xd6   : > { %2296 = vmatprep.subr.bf16.mxu1 %v2985_v0  ;;  %2304 = vmatprep.mubr.msk.bf16.mxu1 %vm2986_vm0, %v2985_v0  ;;  %p654_p4 = scmp.lt.s32.totalorder %s3367_s15, 3  ;;  %s3803_s27 = sld [smem:[#allocation28_spill]]  ;;  %v667_v6 = vld [vmem:[%s3352_s24] sm:$0xff]  ;;  %vm705_vm1 = vcmask 523264   ;;  %v668_v9 = vld [vmem:[%s3352_s24 + $0x8] sm:$0xff]  ;;  %v2636_v13 = vld [vmem:[#allocation5 + $0x10] sm:$0xff]  }
  0xd7   : > { %s3805_s11 = sld [smem:[#allocation26_spill]]  ;;  %v2634_v8 = vld [vmem:[#allocation5] sm:$0xff]   ;;  %v671_v10 = vpack.c.bf16 %v668_v9, %v667_v6  ;;  %v2635_v12 = vld [vmem:[#allocation5 + $0x8] sm:$0xff]   ;;  %v2637_v14 = vld [vmem:[#allocation5 + $0x18] sm:$0xff]   ;;  %vm925_vm2 = vcmask 130048   ;;  %vm976_vm3 = vcmask 261120  }
  0xd8   : > { %s655_s19 = scalar_select %p654_p4, %s3367_s15, 3  ;;  %v669_v15 = vld [vmem:[%s3352_s24 + $0x10] sm:$0xff]  ;;  %v670_v16 = vld [vmem:[%s3352_s24 + $0x18] sm:$0xff]  ;;  %v2638_v33 = vld [vmem:[#allocation7] sm:$0xff]   ;;  %vm1007_vm4 = vcmask 257024   ;;  %vm1504_vm5 = vcmask 392192  }
  0xd9   : > { %2328 = vmatprep.mubr.msk.bf16.mxu0 %vm705_vm1, %v671_v10  ;;  %v672_v17 = vpack.c.bf16 %v670_v16, %v669_v15  ;;  %2320 = vmatprep.subr.bf16.mxu0 %v2638_v33  ;;  %v2639_v34 = vld [vmem:[#allocation7 + $0x8] sm:$0xff]   ;;  %v2640_v35 = vld [vmem:[#allocation7 + $0x10] sm:$0xff]   ;;  %v2641_v36 = vld [vmem:[#allocation7 + $0x18] sm:$0xff]   ;;  %s3806_s24 = sld [smem:[#allocation22_spill]]  ;;  %s2988_s10 = smov 96  }
  0xda   : > { %2321 = vmatpush3.bf16.msra.mxu0 %v2638_v33  ;;  %s2990_s8 = smov 16   ;;  %s2991_s12 = smov 32  }
  0xdb   : > { %p652_p3 = scmp.lt.s32.totalorder %s3802_s4, 1  ;;  %2322 = vmatprep.subr.bf16.mxu0 %v2639_v34  ;;  %s3812_s3 = sld [smem:[#allocation36_spill]] }
  0xdc   : > { %s3804_s14 = smov %s3803_s27  ;;  %v2630_v1 = vld [vmem:[%s3803_s27] sm:$0xff]  }
  0xdd   : > { %s653_s20 = scalar_select %p652_p3, %s3802_s4, 1  ;;  %2297 = vmatpush3.bf16.msra.mxu1 %v2630_v1  ;;  %v2631_v2 = vld [vmem:[%s3804_s14 + $0x8] sm:$0xff]   ;;  %v2632_v3 = vld [vmem:[%s3804_s14 + $0x10] sm:$0xff]   ;;  %v2633_v4 = vld [vmem:[%s3804_s14 + $0x18] sm:$0xff]  }
  0xde   : > { %2298 = vmatprep.subr.bf16.mxu1 %v2985_v0  ;;  %2323 = vmatpush3.bf16.msra.mxu0 %v2639_v34 }
  0xdf   : > { %s2151_s22 = sshll.u32 %s653_s20, 2  ;;  %2324 = vmatprep.subr.bf16.mxu0 %v2640_v35  ;;  %s3471_s27 = sand.u32 1, %s3806_s24  }
  0xe0   : > { %s657_s28 = sadd.s32 %s2151_s22, %s655_s19  ;;  %s2149_s2 = sshll.u32 %s3471_s27, 5 }
  0xe1   : > { %s2152_s6 = sshll.u32 %s657_s28, 3  ;;  %2299 = vmatpush3.bf16.msra.mxu1 %v2631_v2  ;;  %s2987_s28 = smov 112  }
  0xe2   : > { %s659_s7 = scalar_lea.vmem %s3805_s11, %s2152_s6  ;;  %2300 = vmatprep.subr.bf16.mxu1 %v2985_v0  ;;  %2325 = vmatpush3.bf16.msra.mxu0 %v2640_v35  ;;  %s3474_s16 = scalar_lea.vmem [#allocation12], %s2149_s2 }
  0xe3   : > { %v3393_v5 = vld [vmem:[%s659_s7] sm:$0xff]  ;;  %v3396_v7 = vld [vmem:[%s659_s7 + $0x8] sm:$0xff]  ;;  %2326 = vmatprep.subr.bf16.mxu0 %v2641_v36  ;;  %s2989_s6 = smov 80   ;;  %s2992_s11 = smov 48  }
  0xe4   : > { %v666_v11 = vpack.c.bf16 %v3396_v7, %v3393_v5  ;;  %s3807_s19 = sld [smem:[#allocation32_spill]]  ;;  %s3810_s24 = sld [smem:[#allocation33_spill]] }
  0xe5   : > { %2301 = vmatpush3.bf16.msra.mxu1 %v2632_v3  ;;  %s3813_s2 = sld [smem:[#allocation38_spill]]  ;;  %s3814_s7 = sld [smem:[#allocation39_spill]] }
  0xe6   : > { %2302 = vmatprep.subr.bf16.mxu1 %v2985_v0  ;;  %2327 = vmatpush3.bf16.msra.mxu0 %v2641_v36 }
  0xe7   : > { %2340 = vmatprep.subr.bf16.mxu0 %v2985_v0 }
  0xe9   : > { %2303 = vmatpush3.bf16.msra.mxu1 %v2633_v4  ;;  %2329 = vmatmul.mubr.msk.bf16.vlgmr.msra.gmra.mrb[0].mxu0 %vm705_vm1, %v672_v17 }
  0xea   : > { %2308 = vmatprep.subr.bf16.mxu1 %v2634_v8  ;;  %2344 = vmatprep.mubr.msk.bf16.mxu0 %vm2986_vm0, %v2985_v0 }
  0xec   : > { %2305 = vmatmul.mubr.msk.bf16.vlgmr.msra.gmra.mrb[0].mxu1 %vm705_vm1, %v666_v11 }
  0xed   : > { %2309 = vmatpush3.bf16.msra.mxu1 %v2634_v8  ;;  %2316 = vmatprep.mubr.msk.bf16.mxu1 %vm705_vm1, %v671_v10 }
  0xee   : > { %2310 = vmatprep.subr.bf16.mxu1 %v2635_v12 }
  0xf1   : > { %2311 = vmatpush3.bf16.msra.mxu1 %v2635_v12 }
  0xf2   : > { %2312 = vmatprep.subr.bf16.mxu1 %v2636_v13 }
  0xf5   : > { %2313 = vmatpush3.bf16.msra.mxu1 %v2636_v13 }
  0xf6   : > { %2314 = vmatprep.subr.bf16.mxu1 %v2637_v14 }
  0xf9   : > { %2315 = vmatpush3.bf16.msra.mxu1 %v2637_v14 }
  0xfa   : > { %2332 = vmatprep.subr.bf16.mxu1 %v2985_v0 }
  0xfc   : > { %2317 = vmatmul.mubr.msk.bf16.vlgmr.msra.gmra.mrb[4].mxu1 %vm705_vm1, %v672_v17 }
  0xfd   : > { %2336 = vmatprep.mubr.msk.bf16.mxu1 %vm2986_vm0, %v2985_v0 }
 0x1bc   : > { %v2330_v48 = vpop.f32.mrb[0].mxu0 }
 0x1bd   : > { %v903_v49 = vpop.f32.mrb[1].mxu0 }
 0x1be   : > { %v2331_v50 = vpop.f32.mrb[2].mxu0 }
 0x1bf   : > { %v743_v18 = vpop.f32.mrb[0].mxu1  ;;  %v3446_v51 = vpack.c.bf16 %v2331_v50, %v2330_v48  ;;  %v906_v52 = vpop.f32.mrb[3].mxu0 }
 0x1c0   : > { %v918_v19 = vmul.f32 0.25, %v743_v18  ;;  %v2306_v20 = vpop.f32.mrb[1].mxu1  ;;  %v3448_v53 = vpack.c.bf16 %v906_v52, %v903_v49 }
 0x1c1   : > { %v746_v21 = vpop.f32.mrb[2].mxu1 }
 0x1c2   : > { %v919_v22 = vmul.f32 0.25, %v746_v21  ;;  %v2307_v23 = vpop.f32.mrb[3].mxu1  ;;  %2341 = vmatpush3.bf16.msra.mxu0 %v3448_v53 }
 0x1c3   : > { %2342 = vmatprep.subr.bf16.mxu0 %v2985_v0 }
 0x1c4   : > { %v3411_v24 = vpack.c.bf16 %v919_v22, %v918_v19 }
 0x1c6   : > { %1055 = vrot.lane.b32.xlu1 %v3411_v24, %s2987_s28  ;;  %2343 = vmatpush3.bf16.msra.mxu0 %v3446_v51 }
 0x1c7   : > { %2356 = vmatprep.subr.bf16.mxu0 %v2985_v0 }
 0x1cf   : > { %v2318_v25 = vpop.f32.mrb[4].mxu1 }
 0x1d0   : > { %v822_v26 = vpop.f32.mrb[5].mxu1 }
 0x1d1   : > { %v2319_v27 = vpop.f32.mrb[6].mxu1 }
 0x1d2   : > { %v3415_v28 = vpack.c.bf16 %v2319_v27, %v2318_v25  ;;  %v825_v29 = vpop.f32.mrb[7].mxu1 }
 0x1d3   : > { %v3417_v30 = vpack.c.bf16 %v825_v29, %v822_v26 }
 0x1d4   : > { %v933_v32 = vsel %vm925_vm2, %v3415_v28, 0 }
 0x1d5   : > { %1059 = vrot.lane.b32.xlu0 %v3417_v30, %s2987_s28  ;;  %v930_v31 = vsel %vm925_vm2, %v3417_v30, 0 }
 0x1d6   : > { %2333 = vmatpush3.bf16.xpose.msra.mxu1 %v930_v31 }
 0x1d7   : > { %2334 = vmatprep.subr.bf16.mxu1 %v2985_v0 }
 0x1d9   : > { %1061 = vrot.lane.b32.xlu0 %v3415_v28, %s2987_s28 }
 0x1de   : > { %2335 = vmatpush3.bf16.xpose.msra.mxu1 %v933_v32 }
 0x1df   : > { %2348 = vmatprep.subr.bf16.mxu1 %v2985_v0 }
 0x1e5   : > { %2337 = vmatmul.mubr.msk.bf16.vlgmr.msra.gmra.mrb[8].mxu1 %vm925_vm2, %v3411_v24 }
 0x1e6   : > { %2352 = vmatprep.mubr.msk.bf16.mxu1 %vm2986_vm0, %v2985_v0 }
 0x238   : > { %v1056_v41 = vpop.permute.xlu1 %1055 }
 0x247   : > { %v1060_v37 = vpop.permute.xlu0 %1059 }
 0x248   : > { %v1067_v38 = vsel %vm925_vm2, %v1060_v37, 0 }
 0x249   : > { %2349 = vmatpush3.bf16.xpose.msra.mxu1 %v1067_v38 }
 0x24a   : > { %2350 = vmatprep.subr.bf16.mxu1 %v2985_v0 }
 0x24b   : > { %v1062_v39 = vpop.permute.xlu0 %1061 }
 0x24c   : > { %v1070_v40 = vsel %vm925_vm2, %v1062_v39, 0 }
 0x251   : > { %2351 = vmatpush3.bf16.xpose.msra.mxu1 %v1070_v40 }
 0x252   : > { %2372 = vmatprep.subr.bf16.mxu1 %v2985_v0 }
 0x258   : > { %2353 = vmatmul.mubr.msk.bf16.vlgmr.msra.gmra.mrb[12].mxu1 %vm925_vm2, %v1056_v41 }
 0x259   : > { %2376 = vmatprep.mubr.msk.bf16.mxu1 %vm2986_vm0, %v2985_v0 }
 0x2b8   : > { %v969_v42 = vpop.f32.mrb[8].mxu1 }
 0x2b9   : > { %v2338_v43 = vpop.f32.mrb[9].mxu1  ;;  %v977_v44 = vsel %vm976_vm3, %v969_v42, -inf }
 0x2ba   : > { %978 = vmax.xlane.f32.xlu1 %v977_v44  ;;  %v972_v45 = vpop.f32.mrb[10].mxu1 }
 0x2bb   : > { %v2339_v46 = vpop.f32.mrb[11].mxu1  ;;  %v980_v47 = vsel %vm976_vm3, %v972_v45, -inf }
 0x2bc   : > { %981 = vmax.xlane.f32.xlu0 %v980_v47 }
 0x32b   : > { %v1106_v54 = vpop.f32.mrb[12].mxu1 }
 0x32c   : > { %v2354_v55 = vpop.f32.mrb[13].mxu1  ;;  %v1113_v56 = vsel %vm976_vm3, %v1106_v54, -inf }
 0x32d   : > { %1114 = vmax.xlane.f32.xlu0 %v1113_v56  ;;  %v1109_v57 = vpop.f32.mrb[14].mxu1 }
 0x32e   : > { %v2355_v58 = vpop.f32.mrb[15].mxu1  ;;  %v1116_v59 = vsel %vm976_vm3, %v1109_v57, -inf }
 0x32f   : > { %1117 = vmax.xlane.f32.xlu1 %v1116_v59 }
 0x347   : > { %v979_v60 = vpop.xlane.xlu1 %978 }
 0x348   : > { %v983_v61 = vsub.f32 %v969_v42, %v979_v60 }
 0x349   : > { %v982_v62 = vpop.xlane.xlu0 %981 }
 0x34a   : > { %v985_v63 = vmul.f32 1.442695, %v983_v61  ;;  %v984_v1 = vsub.f32 %v972_v45, %v982_v62 }
 0x34c   : > { %2658 = vpow2.f32 %v985_v63  ;;  %v987_v2 = vmul.f32 1.442695, %v984_v1 }
 0x34e   : > { %2660 = vpow2.f32 %v987_v2 }
 0x356   : > { %v2659_v3 = vpop.eup %2658 }
 0x357   : > { %v989_v4 = vsel %vm976_vm3, %v2659_v3, 0.0 }
 0x358   : > { %v2661_v6 = vpop.eup %2660  ;;  %990 = vadd.xlane.f32.xlu0 %v989_v4 }
 0x359   : > { %v992_v8 = vsel %vm976_vm3, %v2661_v6, 0.0 }
 0x35a   : > { %993 = vadd.xlane.f32.xlu1 %v992_v8 }
 0x36b   : > { %1150 = vrot.lane.b32.xlu1 %v3446_v51, %s2987_s28 }
 0x3ba   : > { %v1115_v9 = vpop.xlane.xlu0 %1114 }
 0x3bb   : > { %v1119_v10 = vsub.f32 %v1106_v54, %v1115_v9 }
 0x3bc   : > { %v1118_v11 = vpop.xlane.xlu1 %1117 }
 0x3bd   : > { %v1121_v12 = vmul.f32 1.442695, %v1119_v10  ;;  %v1120_v13 = vsub.f32 %v1109_v57, %v1118_v11 }
 0x3bf   : > { %2662 = vpow2.f32 %v1121_v12  ;;  %v1123_v14 = vmul.f32 1.442695, %v1120_v13 }
 0x3c1   : > { %2664 = vpow2.f32 %v1123_v14 }
 0x3c9   : > { %v2663_v15 = vpop.eup %2662 }
 0x3ca   : > { %v1125_v16 = vsel %vm976_vm3, %v2663_v15, 0.0 }
 0x3cb   : > { %v2665_v17 = vpop.eup %2664  ;;  %1126 = vadd.xlane.f32.xlu0 %v1125_v16 }
 0x3cc   : > { %v1128_v18 = vsel %vm976_vm3, %v2665_v17, 0.0 }
 0x3cd   : > { %1129 = vadd.xlane.f32.xlu1 %v1128_v18 }
 0x3de   : > { %1200 = vrot.lane.b32.xlu1 %v3417_v30, %s2988_s10 }
 0x3e1   : > { %1148 = vrot.lane.b32.xlu0 %v3448_v53, %s2987_s28  ;;  %s3808_s28 = sld [smem:[#allocation37_spill]] }
 0x3e2   : > { %1198 = vrot.lane.b32.xlu1 %v3411_v24, %s2988_s10 }
 0x3e5   : > { %1202 = vrot.lane.b32.xlu0 %v3415_v28, %s2988_s10  ;;  %v991_v19 = vpop.xlane.xlu0 %990 }
 0x3e6   : > { %2666 = vrcp.f32 %v991_v19 }
 0x3e7   : > { %v994_v20 = vpop.xlane.xlu1 %993 }
 0x3e8   : > { %2668 = vrcp.f32 %v994_v20 }
 0x3eb   : > { %v1151_v31 = vpop.permute.xlu1 %1150 }
 0x3f0   : > { %v2667_v21 = vpop.eup %2666 }
 0x3f1   : > { %v997_v22 = vmul.f32 %v2667_v21, %v2659_v3 }
 0x3f2   : > { %v2669_v23 = vpop.eup %2668 }
 0x3f3   : > { %v2228_v25 = vpack.c.bf16 %v997_v22, %v997_v22  ;;  %v998_v26 = vmul.f32 %v2669_v23, %v2661_v6 }
 0x3f5   : > { %v2229_v27 = vpack.c.bf16 %v998_v26, %v998_v26  ;;  %v999_v29 = vpack.c.bf16 %v998_v26, %v997_v22  ;;  %1008 = vst.msk [vmem:[%s3474_s16] sm:$0xf] %vm1007_vm4, %v2228_v25 }
 0x3f7   : > { %2345 = vmatmul.mubr.msk.bf16.vlgmr.msra.gmra.mrb[4].mxu0 %vm976_vm3, %v999_v29  ;;  %1009 = vst.msk [vmem:[%s3474_s16 + $0x4] sm:$0xf] %vm1007_vm4, %v2229_v27 }
 0x3f8   : > { %2360 = vmatprep.mubr.msk.bf16.mxu0 %vm2986_vm0, %v2985_v0 }
 0x458   : > { %v1127_v32 = vpop.xlane.xlu0 %1126 }
 0x459   : > { %2670 = vrcp.f32 %v1127_v32 }
 0x45a   : > { %v1130_v33 = vpop.xlane.xlu1 %1129 }
 0x45b   : > { %2672 = vrcp.f32 %v1130_v33 }
 0x45c   : > { %v1149_v34 = vpop.permute.xlu0 %1148 }
 0x45d   : > { %2357 = vmatpush3.bf16.msra.mxu0 %v1149_v34 }
 0x45e   : > { %2358 = vmatprep.subr.bf16.mxu0 %v2985_v0  ;;  %v1201_v40 = vpop.permute.xlu1 %1200 }
 0x45f   : > { %v1208_v43 = vsel %vm925_vm2, %v1201_v40, 0 }
 0x460   : > { %v1203_v44 = vpop.permute.xlu0 %1202 }
 0x461   : > { %2359 = vmatpush3.bf16.msra.mxu0 %v1151_v31  ;;  %v1211_v45 = vsel %vm925_vm2, %v1203_v44, 0 }
 0x462   : > { %2364 = vmatprep.subr.bf16.mxu0 %v2985_v0  ;;  %v1199_v46 = vpop.permute.xlu1 %1198 }
 0x463   : > { %v2671_v35 = vpop.eup %2670 }
 0x464   : > { %v1133_v36 = vmul.f32 %v2671_v35, %v2663_v15 }
 0x465   : > { %v2673_v37 = vpop.eup %2672 }
 0x466   : > { %v2230_v38 = vpack.c.bf16 %v1133_v36, %v1133_v36  ;;  %v1134_v39 = vmul.f32 %v2673_v37, %v2665_v17 }
 0x468   : > { %v2231_v41 = vpack.c.bf16 %v1134_v39, %v1134_v39  ;;  %v1135_v42 = vpack.c.bf16 %v1134_v39, %v1133_v36  ;;  %2177 = vst.msk [vmem:[%s3474_s16 + $0x8] sm:$0xf] %vm1007_vm4, %v2230_v38 }
 0x46a   : > { %2361 = vmatmul.mubr.msk.bf16.vlgmr.msra.gmra.mrb[8].mxu0 %vm976_vm3, %v1135_v42  ;;  %2178 = vst.msk [vmem:[%s3474_s16 + $0xc] sm:$0xf] %vm1007_vm4, %v2231_v41 }
 0x46b   : > { %2365 = vmatpush3.bf16.xpose.msra.mxu0 %v1208_v43  ;;  %2368 = vmatprep.mubr.msk.bf16.mxu0 %vm2986_vm0, %v2985_v0 }
 0x46c   : > { %2366 = vmatprep.subr.bf16.mxu0 %v2985_v0 }
 0x473   : > { %2367 = vmatpush3.bf16.xpose.msra.mxu0 %v1211_v45 }
 0x474   : > { %2388 = vmatprep.subr.bf16.mxu0 %v2985_v0 }
 0x47a   : > { %2369 = vmatmul.mubr.msk.bf16.vlgmr.msra.gmra.mrb[12].mxu0 %vm925_vm2, %v1199_v46 }
 0x47b   : > { %2392 = vmatprep.mubr.msk.bf16.mxu0 %vm2986_vm0, %v2985_v0 }
 0x4ca   : > { %v3499_v47 = vpop.f32.mrb[4].mxu0 }
 0x4cb   : > { %v2346_v48 = vpop.f32.mrb[5].mxu0 }
 0x4cc   : > { %v3501_v49 = vpop.f32.mrb[6].mxu0 }
 0x4cd   : > { %v2347_v50 = vpop.f32.mrb[7].mxu0 }
 0x53d   : > { %v3503_v52 = vpop.f32.mrb[8].mxu0 }
 0x53e   : > { %v2362_v54 = vpop.f32.mrb[9].mxu0 }
 0x53f   : > { %v3505_v55 = vpop.f32.mrb[10].mxu0 }
 0x540   : > { %v2615_v56 = vpack.i.bf16 %v3505_v55, %v3503_v52  ;;  %v2363_v57 = vpop.f32.mrb[11].mxu0 }
 0x54d   : > { %v1247_v58 = vpop.f32.mrb[12].mxu0 }
 0x54e   : > { %v2370_v59 = vpop.f32.mrb[13].mxu0  ;;  %v1254_v60 = vsel %vm976_vm3, %v1247_v58, -inf }
 0x54f   : > { %1255 = vmax.xlane.f32.xlu0 %v1254_v60  ;;  %v1250_v61 = vpop.f32.mrb[14].mxu0 }
 0x550   : > { %v2371_v62 = vpop.f32.mrb[15].mxu0  ;;  %v1257_v63 = vsel %vm976_vm3, %v1250_v61, -inf }
 0x551   : > { %1258 = vmax.xlane.f32.xlu1 %v1257_v63  ;;  %v2642_v63 = vld [vmem:[#allocation8] sm:$0xff]  }
 0x562   : > { %1287 = vrot.lane.b32.xlu1 %v3448_v53, %s2988_s10 }
 0x566   : > { %1339 = vrot.lane.b32.xlu1 %v3417_v30, %s2989_s6 }
 0x56a   : > { %1341 = vrot.lane.b32.xlu1 %v3415_v28, %s2989_s6 }
 0x5dc   : > { %v1256_v1 = vpop.xlane.xlu0 %1255 }
 0x5dd   : > { %v1260_v2 = vsub.f32 %v1247_v58, %v1256_v1  ;;  %v2643_v1 = vld [vmem:[#allocation8 + $0x8] sm:$0xff]  }
 0x5de   : > { %v1259_v3 = vpop.xlane.xlu1 %1258 }
 0x5df   : > { %v1262_v4 = vmul.f32 1.442695, %v1260_v2  ;;  %v1261_v6 = vsub.f32 %v1250_v61, %v1259_v3  ;;  %v2644_v2 = vld [vmem:[#allocation8 + $0x10] sm:$0xff]   ;;  %v2645_v3 = vld [vmem:[#allocation8 + $0x18] sm:$0xff]  }
 0x5e1   : > { %2674 = vpow2.f32 %v1262_v4  ;;  %v1264_v8 = vmul.f32 1.442695, %v1261_v6 }
 0x5e2   : > { %v1288_v9 = vpop.permute.xlu1 %1287 }
 0x5e3   : > { %2676 = vpow2.f32 %v1264_v8  ;;  %2373 = vmatpush3.bf16.msra.mxu1 %v1288_v9 }
 0x5e4   : > { %2374 = vmatprep.subr.bf16.mxu1 %v2985_v0 }
 0x5e6   : > { %v1340_v20 = vpop.permute.xlu1 %1339 }
 0x5ea   : > { %v1342_v23 = vpop.permute.xlu1 %1341 }
 0x5eb   : > { %v2675_v10 = vpop.eup %2674  ;;  %v1350_v25 = vsel %vm925_vm2, %v1342_v23, 0 }
 0x5ec   : > { %v1266_v11 = vsel %vm976_vm3, %v2675_v10, 0.0 }
 0x5ed   : > { %v2677_v12 = vpop.eup %2676  ;;  %1267 = vadd.xlane.f32.xlu0 %v1266_v11 }
 0x5ee   : > { %v1269_v30 = vsel %vm976_vm3, %v2677_v12, 0.0 }
 0x5f1   : > { %1270 = vadd.xlane.f32.xlu0 %v1269_v30 }
 0x607   : > { %1289 = vrot.lane.b32.xlu0 %v3446_v51, %s2988_s10  ;;  %s3809_s10 = smov %s3808_s28 }
 0x60b   : > { %1337 = vrot.lane.b32.xlu0 %v3411_v24, %s2989_s6  ;;  %v1347_v24 = vsel %vm925_vm2, %v1340_v20, 0 }
 0x67a   : > { %v1268_v28 = vpop.xlane.xlu0 %1267 }
 0x67b   : > { %2678 = vrcp.f32 %v1268_v28 }
 0x67e   : > { %v1271_v13 = vpop.xlane.xlu0 %1270 }
 0x67f   : > { %2680 = vrcp.f32 %v1271_v13 }
 0x682   : > { %v1290_v14 = vpop.permute.xlu0 %1289 }
 0x683   : > { %2375 = vmatpush3.bf16.msra.mxu1 %v1290_v14 }
 0x684   : > { %2380 = vmatprep.subr.bf16.mxu1 %v2985_v0 }
 0x685   : > { %v2679_v15 = vpop.eup %2678 }
 0x686   : > { %v1274_v16 = vmul.f32 %v2679_v15, %v2675_v10  ;;  %v1338_v26 = vpop.permute.xlu0 %1337 }
 0x688   : > { %v2232_v17 = vpack.c.bf16 %v1274_v16, %v1274_v16 }
 0x689   : > { %v2681_v18 = vpop.eup %2680 }
 0x68a   : > { %v1275_v19 = vmul.f32 %v2681_v18, %v2677_v12  ;;  %2183 = vst.msk [vmem:[%s3474_s16 + $0x10] sm:$0xf] %vm1007_vm4, %v2232_v17 }
 0x68c   : > { %v2233_v21 = vpack.c.bf16 %v1275_v19, %v1275_v19  ;;  %v1276_v22 = vpack.c.bf16 %v1275_v19, %v1274_v16 }
 0x68e   : > { %2377 = vmatmul.mubr.msk.bf16.vlgmr.msra.gmra.mrb[16].mxu1 %vm976_vm3, %v1276_v22  ;;  %2184 = vst.msk [vmem:[%s3474_s16 + $0x14] sm:$0xf] %vm1007_vm4, %v2233_v21 }
 0x68f   : > { %2381 = vmatpush3.bf16.xpose.msra.mxu1 %v1347_v24  ;;  %2384 = vmatprep.mubr.msk.bf16.mxu1 %vm2986_vm0, %v2985_v0 }
 0x690   : > { %2382 = vmatprep.subr.bf16.mxu1 %v2985_v0 }
 0x697   : > { %2383 = vmatpush3.bf16.xpose.msra.mxu1 %v1350_v25 }
 0x698   : > { %2408 = vmatprep.subr.bf16.mxu1 %v2985_v0 }
 0x69e   : > { %2385 = vmatmul.mubr.msk.bf16.vlgmr.msra.gmra.mrb[20].mxu1 %vm925_vm2, %v1338_v26 }
 0x69f   : > { %2416 = vmatprep.mubr.msk.bf16.mxu1 %vm2986_vm0, %v2985_v0 }
 0x761   : > { %v1330_v27 = vpop.f32.mrb[16].mxu1 }
 0x762   : > { %v2378_v29 = vpop.f32.mrb[17].mxu1 }
 0x763   : > { %v1333_v31 = vpop.f32.mrb[18].mxu1 }
 0x764   : > { %v2620_v32 = vpack.i.bf16 %v1333_v31, %v1330_v27  ;;  %v2379_v33 = vpop.f32.mrb[19].mxu1 }
 0x771   : > { %v1386_v34 = vpop.f32.mrb[20].mxu1 }
 0x772   : > { %v2386_v35 = vpop.f32.mrb[21].mxu1  ;;  %v1393_v36 = vsel %vm976_vm3, %v1386_v34, -inf }
 0x773   : > { %1394 = vmax.xlane.f32.xlu1 %v1393_v36  ;;  %v1389_v37 = vpop.f32.mrb[22].mxu1 }
 0x774   : > { %v2387_v38 = vpop.f32.mrb[23].mxu1  ;;  %v1396_v39 = vsel %vm976_vm3, %v1389_v37, -inf }
 0x775   : > { %1397 = vmax.xlane.f32.xlu0 %v1396_v39 }
 0x800   : > { %v1395_v40 = vpop.xlane.xlu1 %1394 }
 0x801   : > { %v1399_v41 = vsub.f32 %v1386_v34, %v1395_v40 }
 0x802   : > { %v1398_v42 = vpop.xlane.xlu0 %1397 }
 0x803   : > { %v1401_v43 = vmul.f32 1.442695, %v1399_v41  ;;  %v1400_v44 = vsub.f32 %v1389_v37, %v1398_v42 }
 0x805   : > { %2682 = vpow2.f32 %v1401_v43  ;;  %v1403_v45 = vmul.f32 1.442695, %v1400_v44 }
 0x807   : > { %2684 = vpow2.f32 %v1403_v45  ;;  %v2646_v45 = vld [vmem:[#allocation10] sm:$0xff]  }
 0x808   : > { %2409 = vmatpush3.bf16.msra.mxu1 %v2646_v45 }
 0x809   : > { %2410 = vmatprep.subr.bf16.mxu1 %v2985_v0 }
 0x80f   : > { %v2683_v46 = vpop.eup %2682 }
 0x810   : > { %v1405_v48 = vsel %vm976_vm3, %v2683_v46, 0.0 }
 0x811   : > { %v2685_v50 = vpop.eup %2684  ;;  %1406 = vadd.xlane.f32.xlu0 %v1405_v48  ;;  %v2649_v48 = vld [vmem:[#allocation10 + $0x18] sm:$0xff]  }
 0x812   : > { %v1408_v54 = vsel %vm976_vm3, %v2685_v50, 0.0 }
 0x813   : > { %1409 = vadd.xlane.f32.xlu1 %v1408_v54  ;;  %v2651_v54 = vld [vmem:[%s3809_s10 + $0x8] sm:$0xff]  }
 0x824   : > { %1428 = vrot.lane.b32.xlu1 %v3446_v51, %s2989_s6 }
 0x827   : > { %1426 = vrot.lane.b32.xlu0 %v3448_v53, %s2989_s6  ;;  %s2148_s6 = sshll.u32 %s3471_s27, 4 }
 0x828   : > { %2616 = vrot.lane.b32.xlu1 %v2615_v56, %s2990_s8  ;;  %s3811_s8 = sld [smem:[#allocation34_spill]] }
 0x82b   : > { %2621 = vrot.lane.b32.xlu0 %v2620_v32, %s2991_s12  ;;  %s3817_s12 = sld [smem:[#allocation41_spill]] }
 0x89e   : > { %v1407_v57 = vpop.xlane.xlu0 %1406 }
 0x89f   : > { %2686 = vrcp.f32 %v1407_v57  ;;  %v2652_v57 = vld [vmem:[%s3809_s10 + $0x10] sm:$0xff]  }
 0x8a0   : > { %v1410_v58 = vpop.xlane.xlu1 %1409 }
 0x8a1   : > { %2688 = vrcp.f32 %v1410_v58  ;;  %v2653_v58 = vld [vmem:[%s3809_s10 + $0x18] sm:$0xff]  }
 0x8a2   : > { %v1427_v59 = vpop.permute.xlu0 %1426 }
 0x8a3   : > { %2389 = vmatpush3.bf16.msra.mxu0 %v1427_v59  ;;  %v2654_v59 = vld [vmem:[%s3809_s10 + $0x20] sm:$0xff]  }
 0x8a4   : > { %2390 = vmatprep.subr.bf16.mxu0 %v2985_v0  ;;  %v1429_v51 = vpop.permute.xlu1 %1428 }
 0x8a6   : > { %v2622_v28 = vpop.permute.xlu0 %2621 }
 0x8a7   : > { %2391 = vmatpush3.bf16.msra.mxu0 %v1429_v51  ;;  %v2624_v15 = vunpack.i.h.bf16 %v2622_v28  ;;  %v2623_v16 = vunpack.i.l.bf16 %v2622_v28  ;;  %v2655_v51 = vld [vmem:[%s3809_s10 + $0x28] sm:$0xff]   ;;  %v2200_v28 = vld [vmem:[%s3812_s3] ss:$0 sm:$0xff]  ;;  %s3815_s3 = sld [smem:[#allocation40_spill]] }
 0x8a8   : > { %2396 = vmatprep.subr.bf16.mxu0 %v2985_v0  ;;  %v2617_v11 = vpop.permute.xlu1 %2616 }
 0x8a9   : > { %v2687_v53 = vpop.eup %2686  ;;  %v2619_v12 = vunpack.i.h.bf16 %v2617_v11  ;;  %v2618_v30 = vunpack.i.l.bf16 %v2617_v11 }
 0x8aa   : > { %v1413_v60 = vmul.f32 %v2687_v53, %v2683_v46  ;;  %v2648_v46 = vld [vmem:[#allocation10 + $0x10] sm:$0xff]  }
 0x8ab   : > { %v2689_v52 = vpop.eup %2688  ;;  %v1501_v13 = vsel %vm925_vm2, %v3501_v49, %v2619_v12  ;;  %v1500_v14 = vsel %vm925_vm2, %v3499_v47, %v2618_v30  ;;  %v2192_v47 = vld [vmem:[%s3807_s19] ss:$0 sm:$0xff]  ;;  %v2656_v12 = vld [vmem:[%s3809_s10 + $0x30] sm:$0xff]   ;;  %v2657_v30 = vld [vmem:[%s3809_s10 + $0x38] sm:$0xff]  }
 0x8ac   : > { %v2234_v55 = vpack.c.bf16 %v1413_v60, %v1413_v60  ;;  %v1414_v56 = vmul.f32 %v2689_v52, %v2685_v50  ;;  %v1502_v20 = vsel %vm976_vm3, %v1500_v14, %v2623_v16  ;;  %v1503_v21 = vsel %vm976_vm3, %v1501_v13, %v2624_v15  ;;  %v2650_v50 = vld [vmem:[%s3808_s28] sm:$0xff]   ;;  %s3816_s28 = sld [smem:[#allocation24_spill]] }
 0x8ae   : > { %v2235_v61 = vpack.c.bf16 %v1414_v56, %v1414_v56  ;;  %v1415_v62 = vpack.c.bf16 %v1414_v56, %v1413_v60  ;;  %2189 = vst.msk [vmem:[%s3474_s16 + $0x18] sm:$0xf] %vm1007_vm4, %v2234_v55 }
 0x8b0   : > { %2393 = vmatmul.mubr.msk.bf16.vlgmr.msra.gmra.mrb[16].mxu0 %vm976_vm3, %v1415_v62  ;;  %2190 = vst.msk [vmem:[%s3474_s16 + $0x1c] sm:$0xf] %vm1007_vm4, %v2235_v61 }
 0x8b1   : > { %2404 = vmatprep.mubr.msk.bf16.mxu0 %vm2986_vm0, %v2985_v0  ;;  %2397 = vmatpush3.bf16.msra.mxu0 %v2642_v63 }
 0x8b2   : > { %2398 = vmatprep.subr.bf16.mxu0 %v2985_v0  ;;  %p3818_p10 = scmp.ne.s32.totalorder %s3816_s28, 0 }
 0x8b5   : > { %2399 = vmatpush3.bf16.msra.mxu0 %v2643_v1  ;;  %v2198_v1 = vld [vmem:[%s3810_s24] ss:$0 sm:$0xff] }
 0x8b6   : > { %2400 = vmatprep.subr.bf16.mxu0 %v2985_v0 }
 0x8b9   : > { %2401 = vmatpush3.bf16.msra.mxu0 %v2644_v2 }
 0x8ba   : > { %2402 = vmatprep.subr.bf16.mxu0 %v2985_v0 }
 0x8bd   : > { %2403 = vmatpush3.bf16.msra.mxu0 %v2645_v3 }
 0x8be   : > { %2420 = vmatprep.subr.bf16.mxu0 %v2985_v0 }
 0x983   : > { %v1469_v4 = vpop.f32.mrb[16].mxu0 }
 0x984   : > { %v2394_v6 = vpop.f32.mrb[17].mxu0 }
 0x985   : > { %v1472_v8 = vpop.f32.mrb[18].mxu0  ;;  %v2199_v6 = vld [vmem:[%s3811_s8] ss:$0 sm:$0xff]  ;;  %s2220_s8 = sshll.u32 %s3802_s4, 2 }
 0x986   : > { %v2625_v9 = vpack.i.bf16 %v1472_v8, %v1469_v4  ;;  %v2395_v10 = vpop.f32.mrb[19].mxu0  ;;  %s1903_s20 = sadd.s32 %s2220_s8, %s3367_s15  ;;  %s1886_s8 = scalar_lea.sflag [#allocation4], %s3471_s27 }
 0x987   : > { %s2221_s24 = sshll.u32 %s1903_s20, 7 }
 0x988   : > { %2626 = vrot.lane.b32.xlu1 %v2625_v9, %s2992_s11  ;;  %s3644_s11 = scalar_lea.hbm %s3817_s12, %s2221_s24 }
 0x9fa   : > { %v2627_v17 = vpop.permute.xlu1 %2626 }
 0x9fb   : > { %v2629_v18 = vunpack.i.h.bf16 %v2627_v17  ;;  %v2628_v19 = vunpack.i.l.bf16 %v2627_v17 }
 0x9fd   : > { %v1505_v22 = vsel %vm1504_vm5, %v1502_v20, %v2628_v19  ;;  %v1506_v24 = vsel %vm1504_vm5, %v1503_v21, %v2629_v18 }
 0x9fe   : > { %v1507_v23 = vpack.c.bf16 %v1506_v24, %v1505_v22 }
 0xa00   : > { %2405 = vmatmul.mubr.msk.bf16.vlgmr.msra.gmra.mrb[20].mxu0 %vm705_vm1, %v1507_v23 }
 0xa01   : > { %2436 = vmatprep.mubr.msk.bf16.mxu0 %vm2986_vm0, %v2985_v0  ;;  %2421 = vmatpush3.bf16.msra.mxu0 %v2650_v50 }
 0xa02   : > { %2422 = vmatprep.subr.bf16.mxu0 %v2985_v0 }
 0xa05   : > { %2423 = vmatpush3.bf16.msra.mxu0 %v2651_v54 }
 0xa06   : > { %2424 = vmatprep.subr.bf16.mxu0 %v2985_v0 }
 0xa09   : > { %2425 = vmatpush3.bf16.msra.mxu0 %v2652_v57  ;;  %v2216_v57 = vld [vmem:[%s3815_s3] ss:$0 sm:$0xff] }
 0xa0a   : > { %2426 = vmatprep.subr.bf16.mxu0 %v2985_v0 }
 0xa0d   : > { %2427 = vmatpush3.bf16.msra.mxu0 %v2653_v58 }
 0xa0e   : > { %2428 = vmatprep.subr.bf16.mxu0 %v2985_v0 }
 0xa11   : > { %2429 = vmatpush3.bf16.msra.mxu0 %v2654_v59 }
 0xa12   : > { %2430 = vmatprep.subr.bf16.mxu0 %v2985_v0 }
 0xa15   : > { %2431 = vmatpush3.bf16.msra.mxu0 %v2655_v51 }
 0xa16   : > { %2432 = vmatprep.subr.bf16.mxu0 %v2985_v0 }
 0xa19   : > { %2433 = vmatpush3.bf16.msra.mxu0 %v2656_v12 }
 0xa1a   : > { %2434 = vmatprep.subr.bf16.mxu0 %v2985_v0 }
 0xa1d   : > { %2435 = vmatpush3.bf16.msra.mxu0 %v2657_v30 }
 0xad3   : > { %v1584_v49 = vpop.f32.mrb[20].mxu0 }
 0xad4   : > { %v1585_v25 = vadd.f32 %v2192_v47, %v1584_v49  ;;  %v2406_v26 = vpop.f32.mrb[21].mxu0 }
 0xad5   : > { %v1587_v27 = vpop.f32.mrb[22].mxu0 }
 0xad6   : > { %v1588_v29 = vadd.f32 %v2192_v47, %v1587_v27  ;;  %v2407_v31 = vpop.f32.mrb[23].mxu0  ;;  %v1591_v32 = vadd.f32 %v1585_v25, %v3393_v5 }
 0xad8   : > { %v1595_v33 = vsel %vm705_vm1, %v1591_v32, 0.0  ;;  %v1592_v34 = vadd.f32 %v1588_v29, %v3396_v7  ;;  %v2647_v7 = vld [vmem:[#allocation10 + $0x8] sm:$0xff]  }
 0xad9   : > { %1596 = vadd.xlane.f32.xlu0 %v1595_v33  ;;  %2411 = vmatpush3.bf16.msra.mxu1 %v2647_v7 }
 0xada   : > { %v1598_v35 = vsel %vm705_vm1, %v1592_v34, 0.0  ;;  %2412 = vmatprep.subr.bf16.mxu1 %v2985_v0 }
 0xadb   : > { %1599 = vadd.xlane.f32.xlu1 %v1598_v35 }
 0xadd   : > { %2413 = vmatpush3.bf16.msra.mxu1 %v2648_v46 }
 0xade   : > { %2414 = vmatprep.subr.bf16.mxu1 %v2985_v0  ;;  %v2206_v0 = vld [vmem:[%s3813_s2] ss:$0 sm:$0xff]  ;;  %s643_s2 = scalar_lea.vmem [#allocation11], %s2148_s6 }
 0xadf   : > { %s1906_s1 = sshll.u32 %s643_s2, 4  ;;  %s3646_s1 = int_to_ptr.vmem [resolvable:$true] %s1906_s1 }
 0xae0   : > { %s2840_s6 = scalar_lea.vmem %s3646_s1, 256 }
 0xae1   : > { %2415 = vmatpush3.bf16.msra.mxu1 %v2649_v48  ;;  %v2215_v48 = vld [vmem:[%s3814_s7] ss:$0 sm:$0xff]  ;;  %p2841_p6 = scmp.ne.s32.totalorder %s3646_s1, %s2840_s6  ;;  %s2993_s7 = smov [#allocation11]  }
 0xae2   : > { %s2844_s5 = sshll.u32 %s2993_s7, 4  ;;  %s2845_s5 = int_to_ptr.vmem [resolvable:$false] %s2844_s5 }
 0xae3   : > { %p2842_p13 = pnand %p2841_p6, %p3818_p10  ;;  %s2846_s9 = scalar_lea.vmem %s2845_s5, 512 }
 0xae4   : > { %p2847_p0 = scmp.lt.s32.totalorder %s3646_s1, %s2845_s5  ;;  %p2848_p5 = scmp.lt.s32.totalorder %s2846_s9, %s2840_s6 }
 0xae5   : > { %p2843_p11 = pneg %p2842_p13 }
 0xae6   : > { %p2849_p8 = por %p2848_p5, %p2847_p0 }
 0xae8   : > { %p2850_p12 = pnand %p2849_p8, %p2843_p11 }
 0xb66   : > { %v1597_v36 = vpop.xlane.xlu0 %1596 }
 0xb67   : > { %v1602_v37 = vmul.f32 0.015625, %v1597_v36 }
 0xb68   : > { %v1600_v38 = vpop.xlane.xlu1 %1599 }
 0xb69   : > { %v1604_v39 = vsub.f32 %v1591_v32, %v1602_v37  ;;  %v1603_v40 = vmul.f32 0.015625, %v1600_v38 }
 0xb6b   : > { %v1605_v41 = vsub.f32 %v1592_v34, %v1603_v40  ;;  %v1606_v42 = vmul.f32 %v1604_v39, %v1604_v39 }
 0xb6d   : > { %v1608_v43 = vsel %vm705_vm1, %v1606_v42, 0.0  ;;  %v1607_v44 = vmul.f32 %v1605_v41, %v1605_v41 }
 0xb6e   : > { %1609 = vadd.xlane.f32.xlu0 %v1608_v43 }
 0xb6f   : > { %v1611_v5 = vsel %vm705_vm1, %v1607_v44, 0.0 }
 0xb72   : > { %1612 = vadd.xlane.f32.xlu0 %v1611_v5 }
 0xbfb   : > { %v1610_v53 = vpop.xlane.xlu0 %1609 }
 0xbfc   : > { %v1614_v60 = vmul.f32 0.015625, %v1610_v53 }
 0xbfe   : > { %v1616_v52 = vadd.f32 1e-05, %v1614_v60 }
 0xbff   : > { %v1613_v55 = vpop.xlane.xlu0 %1612 }
 0xc00   : > { %2690 = vrsqrt.f32 %v1616_v52  ;;  %v1615_v56 = vmul.f32 0.015625, %v1613_v55 }
 0xc02   : > { %v1617_v61 = vadd.f32 1e-05, %v1615_v56 }
 0xc04   : > { %2692 = vrsqrt.f32 %v1617_v61 }
 0xc0a   : > { %v2691_v62 = vpop.eup %2690 }
 0xc0b   : > { %v1620_v63 = vmul.f32 %v2691_v62, %v1604_v39 }
 0xc0d   : > { %v1628_v3 = vmul.f32 %v2198_v1, %v1620_v63 }
 0xc0e   : > { %v2693_v2 = vpop.eup %2692 }
 0xc0f   : > { %v1621_v4 = vmul.f32 %v2693_v2, %v1605_v41  ;;  %v1636_v9 = vadd.f32 %v2199_v6, %v1628_v3 }
 0xc11   : > { %v1629_v8 = vmul.f32 %v2198_v1, %v1621_v4 }
 0xc13   : > { %v1637_v10 = vadd.f32 %v2199_v6, %v1629_v8 }
 0xc15   : > { %v1638_v11 = vpack.c.bf16 %v1637_v10, %v1636_v9 }
 0xc17   : > { %2417 = vmatmul.mubr.msk.bf16.vlgmr.msra.gmra.mrb[24].mxu1 %vm705_vm1, %v1638_v11 }
 0xcea   : > { %v1715_v13 = vpop.f32.mrb[24].mxu1 }
 0xceb   : > { %v1716_v14 = vadd.f32 %v2200_v28, %v1715_v13  ;;  %v2418_v15 = vpop.f32.mrb[25].mxu1 }
 0xcec   : > { %v1718_v16 = vpop.f32.mrb[26].mxu1 }
 0xced   : > { %v1719_v17 = vadd.f32 %v2200_v28, %v1718_v16  ;;  %v2419_v18 = vpop.f32.mrb[27].mxu1  ;;  %v1722_v19 = vmax.f32 %v1716_v14, 0.0 }
 0xcef   : > { %v1723_v20 = vmax.f32 %v1719_v17, 0.0 }
 0xcf1   : > { %v1724_v21 = vpack.c.bf16 %v1723_v20, %v1722_v19 }
 0xcf3   : > { %2437 = vmatmul.mubr.bf16.vlgmr.msra.gmra.mrb[24].mxu0 %v1724_v21 }
 0xdc6   : > { %v1830_v22 = vpop.f32.mrb[24].mxu0 }
 0xdc7   : > { %v1831_v24 = vadd.f32 %v2206_v0, %v1830_v22  ;;  %v2438_v23 = vpop.f32.mrb[25].mxu0 }
 0xdc8   : > { %v1833_v47 = vpop.f32.mrb[26].mxu0 }
 0xdc9   : > { %v1834_v49 = vadd.f32 %v2206_v0, %v1833_v47  ;;  %v2439_v25 = vpop.f32.mrb[27].mxu0  ;;  %v1837_v26 = vadd.f32 %v1831_v24, %v1636_v9 }
 0xdcb   : > { %v1841_v27 = vsel %vm705_vm1, %v1837_v26, 0.0  ;;  %v1838_v29 = vadd.f32 %v1834_v49, %v1637_v10 }
 0xdcc   : > { %1842 = vadd.xlane.f32.xlu1 %v1841_v27 }
 0xdcd   : > { %v1844_v31 = vsel %vm705_vm1, %v1838_v29, 0.0 }
 0xdce   : > { %1845 = vadd.xlane.f32.xlu0 %v1844_v31 }
 0xe59   : > { %v1843_v32 = vpop.xlane.xlu1 %1842 }
 0xe5a   : > { %v1847_v33 = vmul.f32 0.015625, %v1843_v32 }
 0xe5b   : > { %v1846_v34 = vpop.xlane.xlu0 %1845 }
 0xe5c   : > { %v1849_v35 = vsub.f32 %v1837_v26, %v1847_v33  ;;  %v1848_v36 = vmul.f32 0.015625, %v1846_v34 }
 0xe5e   : > { %v1850_v37 = vsub.f32 %v1838_v29, %v1848_v36  ;;  %v1851_v38 = vmul.f32 %v1849_v35, %v1849_v35 }
 0xe60   : > { %v1853_v39 = vsel %vm705_vm1, %v1851_v38, 0.0  ;;  %v1852_v40 = vmul.f32 %v1850_v37, %v1850_v37 }
 0xe61   : > { %1854 = vadd.xlane.f32.xlu1 %v1853_v39 }
 0xe62   : > { %v1856_v41 = vsel %vm705_vm1, %v1852_v40, 0.0 }
 0xe63   : > { %1857 = vadd.xlane.f32.xlu0 %v1856_v41 }
 0xeee   : > { %v1855_v42 = vpop.xlane.xlu1 %1854 }
 0xeef   : > { %v1859_v43 = vmul.f32 0.015625, %v1855_v42 }
 0xef0   : > { %v1858_v44 = vpop.xlane.xlu0 %1857 }
 0xef1   : > { %v1861_v5 = vadd.f32 1e-05, %v1859_v43  ;;  %v1860_v45 = vmul.f32 0.015625, %v1858_v44 }
 0xef3   : > { %2694 = vrsqrt.f32 %v1861_v5  ;;  %v1862_v7 = vadd.f32 1e-05, %v1860_v45 }
 0xef5   : > { %2696 = vrsqrt.f32 %v1862_v7 }
 0xefd   : > { %v2695_v46 = vpop.eup %2694 }
 0xefe   : > { %v1865_v50 = vmul.f32 %v2695_v46, %v1849_v35 }
 0xeff   : > { %v2697_v54 = vpop.eup %2696 }
 0xf00   : > { %v1873_v58 = vmul.f32 %v2215_v48, %v1865_v50  ;;  %v1866_v59 = vmul.f32 %v2697_v54, %v1850_v37 }
 0xf02   : > { %v1881_v51 = vadd.f32 %v2216_v57, %v1873_v58  ;;  %v1874_v53 = vmul.f32 %v2215_v48, %v1866_v59 }
 0xf04   : > { %v1882_v60 = vadd.f32 %v2216_v57, %v1874_v53  ;;  %1883 = vst.msk [vmem:[%s643_s2] sm:$0xff] %vm705_vm1, %v1881_v51 }
 0xf06   : > { %1884 = vst.msk [vmem:[%s643_s2 + $0x8] sm:$0xff] %vm705_vm1, %v1882_v60 }
 0xf07   : > { %2853 = shalt.err (!%p2850_p12)
}
 0xf08   : > { %s2854_s20 = scalar_lea.hbm %s3644_s11, 256  ;;  %s2858_s3 = scalar_lea.hbm %s3817_s12, 1024 }
 0xf09   : > { %p2855_p2 = scmp.ne.s32.totalorder %s3644_s11, %s2854_s20  ;;  %p2859_p1 = scmp.lt.u32.totalorder %s3644_s11, %s3817_s12 }
 0xf0a   : > { %p2860_p3 = scmp.lt.u32.totalorder %s2858_s3, %s2854_s20  ;;  %p2862_p6 = scmp.lt.u32.totalorder %s2854_s20, %s3644_s11 }
 0xf0b   : > { %p2856_p7 = pnand %p2855_p2, %p3818_p10 }
 0xf0c   : > { %p2861_p4 = por %p2860_p3, %p2859_p1 }
 0xf0d   : > { %p2857_p9 = pneg %p2856_p7 }
 0xf0e   : > { %p2863_p13 = por %p2862_p6, %p2861_p4 }
 0xf10   : > { %p2864_p11 = pnand %p2863_p13, %p2857_p9 }
 0xf12   : > { %2867 = shalt.err (!%p2864_p11)
}
 0xf13   : > { %s2994_s6 = smov 128   ;;  %s2995_s7 = smov 8  }
 0xf14   : > { %2458 = dma.vmem_to_hbm [thread:$0]  (%p3818_p10), %s3646_s1, 256, %s3644_s11, %s1886_s8, %s2994_s6, %s2994_s6, %s2995_s7  }
 0xf15   : > { %s1891_s5 = scalar_lea.sflag [#allocation13], %s3471_s27 }
 0xf16   : > { %s2223_s9 = sshll.u32 %s3802_s4, 4  ;;  %s1940_s20 = sshll.u32 %s3474_s16, 4  ;;  %s1941_s20 = int_to_ptr.vmem [resolvable:$true] %s1940_s20 }
 0xf17   : > { %s1921_s19 = sadd.s32 %s2223_s9, %s3367_s15  ;;  %s3819_s2 = sld [smem:[#allocation42_spill]] }
 0xf18   : > { %s2224_s22 = sshll.u32 %s1921_s19, 6  ;;  %s2996_s27 = smov 128  }
 0xf19   : > { %2459 = sst [smem:[#allocation15]] (%p3818_p10), %s2996_s27  ;;  %s2997_s11 = smov 256  }
 0xf1a   : > { %2460 = sst [smem:[#allocation15 + $0x1]] (%p3818_p10), %s2997_s11  ;;  %s2998_s8 = smov 2  }
 0xf1b   : > { %2461 = sst [smem:[#allocation15 + $0x2]] (%p3818_p10), %s2998_s8  ;;  %s2999_s4 = smov 64  }
 0xf1c   : > { %2462 = sst [smem:[#allocation15 + $0x3]] (%p3818_p10), %s2999_s4  ;;  %s3000_s15 = smov 4  }
 0xf1d   : > { %s1923_s1 = scalar_lea.hbm %s3819_s2, %s2224_s22  ;;  %2463 = sst [smem:[#allocation15 + $0x4]] (%p3818_p10), %s2999_s4 }
 0xf1e   : > { %2464 = sst [smem:[#allocation15 + $0x5]] (%p3818_p10), %s3000_s15  ;;  %s3001_s16 = smov [#allocation14]  }
 0xf1f   : > { %s3002_s6 = smov 0  }
 0xf20   : > { %2465 = dma.general (%p3818_p10), %s1941_s20, 512, %s1923_s1, %s1891_s5, %s3001_s16, [#allocation15], %s3002_s6, 0  }
 0xf21 PF: > { %s3820_s7 = sld [smem:[#allocation21_spill]]  ;;  %s3821_s9 = sld [smem:[#allocation25_spill]] }
 0xf22   : > { %p2501_p0 = scmp.ge.s32.totalorder %s2974_s0, 2 }
 0xf27   : > { %s1968_s19 = sand.u32 1, %s3820_s7   ;;  %p3822_p5 = scmp.ne.s32.totalorder %s3821_s9, 0 }
 0xf28   : > { %s1969_s22 = scalar_lea.sflag [#allocation4], %s1968_s19 }
 0xf29   : > { %p2486_p8 = pnand %p2501_p0, %p3822_p5 }
 0xf2b   : > { %2925 = dma.done.wait (!%p2486_p8), %s1969_s22, 256  }
 0xf2c   : > { %2927 = vsyncadd (!%p2486_p8), %s1969_s22, 4294967040  ;;  %s1978_s3 = scalar_lea.sflag [#allocation13], %s1968_s19 }
 0xf2d   : > { %2929 = dma.done.wait (!%p2486_p8), %s1978_s3, 512  }
 0xf2e   : > { %2931 = vsyncadd (!%p2486_p8), %s1978_s3, 4294966784  ;;  %s38_s0 = sadd.s32 1, %s2974_s0   ;;  %s3823_s24 = sld [smem:[#allocation22_spill]] }
 0xf2f   : > { %p35_p12 = scmp.ge.s32.totalorder %s38_s0, 6   ;;  %s3824_s5 = smov %s3836_s21 }
 0xf30   : > { %s3826_s22 = smov %s2942_s23  ;;  %s3827_s23 = smov %s3304_s13 }
 0xf31   : > { %s3831_s27 = smov %s2966_s29  ;;  %s3832_s28 = smov %s2970_s30 }
 0xf32   : > { %s3833_s29 = smov %s3824_s5  ;;  %s3834_s30 = smov %s3840_s17 }
 0xf33   :  { %37 = sbr.rel (!%p35_p12) target bundleno = 31 (0x1f), region = 169 }
 0xf34   : > { %s3825_s21 = smov %s3823_s24  ;;  %s3828_s24 = smov %s2950_s25 }
 0xf35   : > { %s3829_s25 = smov %s2954_s26  ;;  %s3830_s26 = smov %s3301_s18 }
 0xf3a   :  { %1983 = vsyncpa [#allocation3], 1 }
 0xf3b   :  { %1985 = vsyncpa [#allocation3 + $0x1], 1 }
 0xf3c   :  { %1986 = vsyncpa [#allocation6], 1 }
 0xf3d   :  { %1987 = vsyncpa [#allocation9], 1 }
 0xf3e   :  { %1988 = vsyncpa [#allocation4], 1 }
 0xf3f   :  { %1990 = vsyncpa [#allocation4 + $0x1], 1 }
 0xf40   :  { %1991 = vsyncpa [#allocation13], 1 }
 0xf41   :  { %1993 = vsyncpa [#allocation13 + $0x1], 1 }

</bundles_post_ra>
